<compile_context>
chip_gen: v6e
topology: v6e:2x2x1
jax: 0.10.0
libtpu: 0.0.40
codegen_flags: <defaults>
</compile_context>

<pallas_src>
import numpy as np
import jax
import jax.numpy as jnp
from jax import lax
from jax.experimental import pallas as pl
from jax.experimental.pallas import tpu as pltpu

BETA = 0.95
THRESHOLD = 1.0

LANE = 128        # vreg lane width   (last dim)
SUBLANE = 8       # vreg sublane width (second-to-last dim)
MAX_BATCH_TILE = 64   # batch rows per grid step; keeps the per-tile record
                      # slab (~48 KB/row, double-buffered) well under the
                      # v7x-safe scoped-VMEM budget.


def _round_up(n, m):
    return ((n + m - 1) // m) * m


def _lif_step(cur, mem_old):
    """snn.Leaky forward (reset_mechanism='subtract', threshold=1.0)."""
    # reset uses the OLD membrane; firing uses strict '>' on the NEW membrane.
    mem_new = BETA * mem_old + cur - jnp.where(mem_old > THRESHOLD,
                                               jnp.float32(THRESHOLD),
                                               jnp.float32(0.0))
    spk = jnp.where(mem_new > THRESHOLD, jnp.float32(1.0), jnp.float32(0.0))
    return spk, mem_new


def snn_kernel(x_ref, w1_ref, b1_ref, w2_ref, b2_ref, w3_ref, b3_ref, rec_ref):
    num_steps = rec_ref.shape[0]

    # Resident bf16 weights for layers 2/3 (cast in the wrapper).
    w2 = w2_ref[...]
    w3 = w3_ref[...]

    # Layer-1 input current is time-invariant -> hoist (1 matmul, kept in f32).
    cur1 = (jnp.dot(x_ref[...], w1_ref[...], preferred_element_type=jnp.float32)
            + b1_ref[...])
    bt, hp = cur1.shape

    # Hoist the (1,HP)->(BT,HP) bias broadcasts out of the unrolled time loop.
    b2 = jnp.broadcast_to(b2_ref[...], (bt, hp))
    b3 = jnp.broadcast_to(b3_ref[...], (bt, hp))

    zeros = jnp.zeros((bt, hp), jnp.float32)  # init_leaky(): mem starts at 0

    def body(t, carry):
        m1, m2, m3 = carry

        s1, m1 = _lif_step(cur1, m1)

        cur2 = jnp.dot(s1.astype(jnp.bfloat16), w2,
                       preferred_element_type=jnp.float32) + b2
        s2, m2 = _lif_step(cur2, m2)

        cur3 = jnp.dot(s2.astype(jnp.bfloat16), w3,
                       preferred_element_type=jnp.float32) + b3
        s3, m3 = _lif_step(cur3, m3)

        # NOTE: the torch forward also runs fc4/fc5 (+LIF dynamics), but nothing
        # from layers 4/5 is returned or feeds layers 1-3 -> dead code dropped.

        # Single lane/sublane-dense slab store per step (6 vst streams -> 1).
        rec_ref[t] = jnp.stack([s1, s2, s3, m1, m2, m3], axis=0)
        return m1, m2, m3

    lax.fori_loop(0, num_steps, body, (zeros, zeros, zeros), unroll=True)


def gaussian_currents(data, M, sigma, ampl_max):
    # data: (B, dims) -> (B, dims, numPerDim) -> (B, dims*numPerDim)
    x = data[:, :, None]
    g = jnp.exp(-0.5 * ((x - M[None]) / sigma[None]) ** 2) * ampl_max
    return g.reshape(data.shape[0], -1)


def net_forward(data, params, M, sigma, ampl_max, num_steps=16):
    x_enc = gaussian_currents(data, M, sigma, ampl_max)
    B, num_inputs = x_enc.shape
    H = params["w1"].shape[1]

    # Pad to full vreg tiles: features -> multiple of 128 lanes,
    # batch -> multiple of 8 sublanes (and of the batch tile).
    NIP = _round_up(num_inputs, LANE)
    HP = _round_up(H, LANE)
    BP0 = _round_up(B, SUBLANE)
    BT = min(BP0, MAX_BATCH_TILE)
    BP = _round_up(BP0, BT)
    n_btiles = BP // BT

    def pad2(a, rows, cols):
        return jnp.pad(a, ((0, rows - a.shape[0]), (0, cols - a.shape[1])))

    x_p = pad2(x_enc, BP, NIP)
    w1_p = pad2(params["w1"], NIP, HP)
    b1_p = pad2(params["b1"], 1, HP)
    w2_p = pad2(params["w2"], HP, HP).astype(jnp.bfloat16)
    b2_p = pad2(params["b2"], 1, HP)
    w3_p = pad2(params["w3"], HP, HP).astype(jnp.bfloat16)
    b3_p = pad2(params["b3"], 1, HP)
    # (Zero-padded feature lanes yield zero currents / zero spikes, so they
    #  never contaminate real lanes; padded batch rows are sliced off.)

    def bcast_spec(shape):
        return pl.BlockSpec(shape, lambda i: (0,) * len(shape))

    in_specs = [
        pl.BlockSpec((BT, NIP), lambda i: (i, 0)),   # x: tiled over batch
        bcast_spec((NIP, HP)), bcast_spec((1, HP)),  # w1, b1
        bcast_spec((HP, HP)), bcast_spec((1, HP)),   # w2 (bf16), b2
        bcast_spec((HP, HP)), bcast_spec((1, HP)),   # w3 (bf16), b3
    ]
    rec_spec = pl.BlockSpec((num_steps, 6, BT, HP), lambda i: (0, 0, i, 0))
    rec_shape = jax.ShapeDtypeStruct((num_steps, 6, BP, HP), jnp.float32)

    # Advisory cost estimate: one hoisted (BPxNIPxHP) matmul + 2 matmuls/step.
    flops = 2 * BP * NIP * HP + num_steps * 2 * (2 * BP * HP * HP)
    bytes_in = (x_p.size * 4 + w1_p.size * 4 + b1_p.size * 4
                + w2_p.size * 2 + b2_p.size * 4
                + w3_p.size * 2 + b3_p.size * 4)
    bytes_out = num_steps * 6 * BP * HP * 4
    cost = pl.CostEstimate(flops=int(flops), transcendentals=0,
                           bytes_accessed=int(bytes_in + bytes_out))

    out = pl.pallas_call(
        snn_kernel,
        out_shape=rec_shape,
        grid_spec=pltpu.PrefetchScalarGridSpec(
            num_scalar_prefetch=0,
            grid=(n_btiles,),
            in_specs=in_specs,
            out_specs=rec_spec,
        ),
        compiler_params=pltpu.CompilerParams(
            dimension_semantics=("parallel",)),   # megacore sharding on v7x
        cost_estimate=cost,
    )(x_p, w1_p, b1_p, w2_p, b2_p, w3_p, b3_p)

    # Slice padding back off and split the merged record slab.
    spk1, spk2, spk3, mem1, mem2, mem3 = (out[:, k, :B, :H] for k in range(6))
    return x_enc, [spk1, spk2, spk3, mem1, mem2, mem3], mem3


def _ref_matmul(a, w, bf16):
    if bf16:
        return jnp.dot(a.astype(jnp.bfloat16), w.astype(jnp.bfloat16),
                       preferred_element_type=jnp.float32)
    return a @ w


def net_forward_reference(data, params, M, sigma, ampl_max, num_steps=16,
                          bf16_matmul=False):
    """Pure-JAX reference of the full (5-layer) torch forward.

    With bf16_matmul=True, layers 2/3 use the same bf16-operand / f32-accumulate
    matmul boundary as the kernel (spikes are exactly representable in bf16, so
    only the weight rounding differs from pure f32).
    """
    x = gaussian_currents(data, M, sigma, ampl_max)
    B = x.shape[0]
    H = params["w1"].shape[1]
    O = params["w5"].shape[1]
    m1 = jnp.zeros((B, H)); m2 = jnp.zeros((B, H)); m3 = jnp.zeros((B, H))
    m4 = jnp.zeros((B, H)); m5 = jnp.zeros((B, O))
    recs = {k: [] for k in ("s1", "s2", "s3", "m1", "m2", "m3")}
    for _ in range(num_steps):
        s1, m1 = _lif_step(x @ params["w1"] + params["b1"], m1)
        s2, m2 = _lif_step(_ref_matmul(s1, params["w2"], bf16_matmul) + params["b2"], m2)
        s3, m3 = _lif_step(_ref_matmul(s2, params["w3"], bf16_matmul) + params["b3"], m3)
        s4, m4 = _lif_step(s3 @ params["w4"] + params["b4"], m4)   # dead wrt outputs
        s5, m5 = _lif_step(s4 @ params["w5"] + params["b5"], m5)   # dead wrt outputs
        recs["s1"].append(s1); recs["s2"].append(s2); recs["s3"].append(s3)
        recs["m1"].append(m1); recs["m2"].append(m2); recs["m3"].append(m3)
    stk = lambda k: jnp.stack(recs[k], axis=0)
    return x, [stk("s1"), stk("s2"), stk("s3"), stk("m1"), stk("m2"), stk("m3")], stk("m3")


def init_params(key, num_inputs, num_hidden, num_outputs):
    """Deterministic nn.Linear-style (uniform +/- 1/sqrt(fan_in)) init."""
    dims = [(num_inputs, num_hidden), (num_hidden, num_hidden),
            (num_hidden, num_hidden), (num_hidden, num_hidden),
            (num_hidden, num_outputs)]
    params = {}
    for i, (fan_in, fan_out) in enumerate(dims, start=1):
        key, kw, kb = jax.random.split(key, 3)
        bound = 1.0 / np.sqrt(fan_in)
        params[f"w{i}"] = jax.random.uniform(
            kw, (fan_in, fan_out), jnp.float32, -bound, bound)
        params[f"b{i}"] = jax.random.uniform(
            kb, (1, fan_out), jnp.float32, -bound, bound)
    return params


def create_gauss(mins, maxes, num_per_dim, dims):
    """Mirror of Net.createGauss."""
    Ms, sigmas = [], []
    for i in range(dims):
        M, step = np.linspace(mins[i], maxes[i], num_per_dim, retstep=True)
        Ms.append(M)
        sigmas += [step] * num_per_dim
    M = jnp.asarray(np.array(Ms).reshape(-1, num_per_dim), jnp.float32)
    sigma = jnp.asarray(np.array(sigmas).reshape(-1, num_per_dim), jnp.float32)
    return M, sigma


if __name__ == "__main__":
    # Small deterministic problem: B=2, 4 input dims, 8 gaussians/dim
    # -> num_inputs=32, num_hidden=32, num_outputs=4, num_steps=16.
    B, dims, num_per_dim = 2, 4, 8
    num_inputs = dims * num_per_dim
    num_hidden = 32
    num_outputs = 4
    num_steps = 16
    ampl_max = 1.0

    key = jax.random.PRNGKey(0)
    key, k_data = jax.random.split(key)
    data = jax.random.uniform(k_data, (B, dims), jnp.float32, -1.0, 1.0)

    params = init_params(key, num_inputs, num_hidden, num_outputs)
    M, sigma = create_gauss([-1.0] * dims, [1.0] * dims, num_per_dim, dims)

    x_enc, recs, mem3_rec = net_forward(data, params, M, sigma, ampl_max, num_steps)
    jax.block_until_ready((x_enc, recs, mem3_rec))

    # Check against the pure-JAX reference that uses the same bf16 matmul
    # boundary as the kernel (layers 2/3); layer 1, LIF state and records
    # are f32 in both.
    x_ref, recs_ref, mem3_ref = net_forward_reference(
        data, params, M, sigma, ampl_max, num_steps, bf16_matmul=True)
    np.testing.assert_allclose(np.asarray(x_enc), np.asarray(x_ref),
                               rtol=1e-5, atol=1e-5)
    for got, want in zip(recs, recs_ref):
        np.testing.assert_allclose(np.asarray(got), np.asarray(want),
                                   rtol=1e-4, atol=1e-4)
    np.testing.assert_allclose(np.asarray(mem3_rec), np.asarray(mem3_ref),
                               rtol=1e-4, atol=1e-4)

    print("KERNEL_OK")
</pallas_src>

<mosaic_0001>
module attributes {stable_mosaic.version = 11 : i64} {
  func.func @snn_kernel(%arg0: i32, %arg1: memref<8x128xf32, #tpu.memory_space<vmem>>, %arg2: memref<128x128xf32, #tpu.memory_space<vmem>>, %arg3: memref<1x128xf32, #tpu.memory_space<vmem>>, %arg4: memref<128x128xbf16, #tpu.memory_space<vmem>>, %arg5: memref<1x128xf32, #tpu.memory_space<vmem>>, %arg6: memref<128x128xbf16, #tpu.memory_space<vmem>>, %arg7: memref<1x128xf32, #tpu.memory_space<vmem>>, %arg8: memref<16x6x8x128xf32, #tpu.memory_space<vmem>>) attributes {dimension_semantics = [#tpu.dimension_semantics<parallel>], iteration_bounds = array<i64: 1>, scalar_prefetch = 0 : i64, scratch_operands = 0 : i64, tpu.core_type = #tpu.core_type<tc>, window_params = [{transform_indices = @transform_0, window_bounds = array<i64: 8, 128>}, {pipeline_mode = #tpu.pipeline_mode<synchronous>, transform_indices = @transform_1, window_bounds = array<i64: 128, 128>}, {pipeline_mode = #tpu.pipeline_mode<synchronous>, transform_indices = @transform_2, window_bounds = array<i64: 1, 128>}, {pipeline_mode = #tpu.pipeline_mode<synchronous>, transform_indices = @transform_3, window_bounds = array<i64: 128, 128>}, {pipeline_mode = #tpu.pipeline_mode<synchronous>, transform_indices = @transform_4, window_bounds = array<i64: 1, 128>}, {pipeline_mode = #tpu.pipeline_mode<synchronous>, transform_indices = @transform_5, window_bounds = array<i64: 128, 128>}, {pipeline_mode = #tpu.pipeline_mode<synchronous>, transform_indices = @transform_6, window_bounds = array<i64: 1, 128>}, {transform_indices = @transform_7, window_bounds = array<i64: 16, 6, 8, 128>}]} {
    %c0 = arith.constant 0 : index
    %c0_0 = arith.constant 0 : index
    %0 = vector.load %arg4[%c0, %c0_0] : memref<128x128xbf16, #tpu.memory_space<vmem>>, vector<128x128xbf16>
    %c0_1 = arith.constant 0 : index
    %c0_2 = arith.constant 0 : index
    %1 = vector.load %arg6[%c0_1, %c0_2] : memref<128x128xbf16, #tpu.memory_space<vmem>>, vector<128x128xbf16>
    %c0_3 = arith.constant 0 : index
    %c0_4 = arith.constant 0 : index
    %2 = vector.load %arg1[%c0_3, %c0_4] : memref<8x128xf32, #tpu.memory_space<vmem>>, vector<8x128xf32>
    %c0_5 = arith.constant 0 : index
    %c0_6 = arith.constant 0 : index
    %3 = vector.load %arg2[%c0_5, %c0_6] : memref<128x128xf32, #tpu.memory_space<vmem>>, vector<128x128xf32>
    %cst = arith.constant dense<0.000000e+00> : vector<8x128xf32>
    %4 = tpu.matmul %2, %3, %cst {dimension_numbers = #tpu.dot_dimension_numbers<[1], [0], [0], [1], [0, 0, 1, 1], [], []>} : vector<8x128xf32>, vector<128x128xf32>, vector<8x128xf32> -> vector<8x128xf32>
    %c0_7 = arith.constant 0 : index
    %c0_8 = arith.constant 0 : index
    %5 = vector.load %arg3[%c0_7, %c0_8] : memref<1x128xf32, #tpu.memory_space<vmem>>, vector<1x128xf32>
    %6 = vector.broadcast %5 : vector<1x128xf32> to vector<8x128xf32>
    %7 = arith.addf %4, %6 : vector<8x128xf32>
    %c0_9 = arith.constant 0 : index
    %c0_10 = arith.constant 0 : index
    %8 = vector.load %arg5[%c0_9, %c0_10] : memref<1x128xf32, #tpu.memory_space<vmem>>, vector<1x128xf32>
    %9 = vector.shape_cast %8 : vector<1x128xf32> to vector<1x128xf32>
    %10 = vector.broadcast %9 : vector<1x128xf32> to vector<8x128xf32>
    %c0_11 = arith.constant 0 : index
    %c0_12 = arith.constant 0 : index
    %11 = vector.load %arg7[%c0_11, %c0_12] : memref<1x128xf32, #tpu.memory_space<vmem>>, vector<1x128xf32>
    %12 = vector.shape_cast %11 : vector<1x128xf32> to vector<1x128xf32>
    %13 = vector.broadcast %12 : vector<1x128xf32> to vector<8x128xf32>
    %cst_13 = arith.constant 0.000000e+00 : f32
    %14 = vector.broadcast %cst_13 : f32 to vector<8x128xf32>
    %c0_i32 = arith.constant 0 : i32
    %cst_14 = arith.constant 0.949999988 : f32
    %15 = vector.broadcast %cst_14 : f32 to vector<8x128xf32>
    %16 = arith.mulf %15, %14 : vector<8x128xf32>
    %17 = arith.addf %16, %7 : vector<8x128xf32>
    %cst_15 = arith.constant 1.000000e+00 : f32
    %18 = vector.broadcast %cst_15 : f32 to vector<8x128xf32>
    %19 = arith.cmpf ogt, %14, %18 : vector<8x128xf32>
    %cst_16 = arith.constant 1.000000e+00 : f32
    %cst_17 = arith.constant 0.000000e+00 : f32
    %20 = vector.broadcast %cst_16 : f32 to vector<8x128xf32>
    %21 = vector.broadcast %cst_17 : f32 to vector<8x128xf32>
    %22 = arith.select %19, %20, %21 : vector<8x128xi1>, vector<8x128xf32>
    %23 = arith.subf %17, %22 : vector<8x128xf32>
    %cst_18 = arith.constant 1.000000e+00 : f32
    %24 = vector.broadcast %cst_18 : f32 to vector<8x128xf32>
    %25 = arith.cmpf ogt, %23, %24 : vector<8x128xf32>
    %cst_19 = arith.constant 1.000000e+00 : f32
    %cst_20 = arith.constant 0.000000e+00 : f32
    %26 = vector.broadcast %cst_19 : f32 to vector<8x128xf32>
    %27 = vector.broadcast %cst_20 : f32 to vector<8x128xf32>
    %28 = arith.select %25, %26, %27 : vector<8x128xi1>, vector<8x128xf32>
    %29 = arith.truncf %28 : vector<8x128xf32> to vector<8x128xbf16>
    %cst_21 = arith.constant dense<0.000000e+00> : vector<8x128xf32>
    %30 = tpu.matmul %29, %0, %cst_21 {dimension_numbers = #tpu.dot_dimension_numbers<[1], [0], [0], [1], [0, 0, 1, 1], [], []>} : vector<8x128xbf16>, vector<128x128xbf16>, vector<8x128xf32> -> vector<8x128xf32>
    %31 = arith.addf %30, %10 : vector<8x128xf32>
    %cst_22 = arith.constant 0.949999988 : f32
    %32 = vector.broadcast %cst_22 : f32 to vector<8x128xf32>
    %33 = arith.mulf %32, %14 : vector<8x128xf32>
    %34 = arith.addf %33, %31 : vector<8x128xf32>
    %cst_23 = arith.constant 1.000000e+00 : f32
    %35 = vector.broadcast %cst_23 : f32 to vector<8x128xf32>
    %36 = arith.cmpf ogt, %14, %35 : vector<8x128xf32>
    %cst_24 = arith.constant 1.000000e+00 : f32
    %cst_25 = arith.constant 0.000000e+00 : f32
    %37 = vector.broadcast %cst_24 : f32 to vector<8x128xf32>
    %38 = vector.broadcast %cst_25 : f32 to vector<8x128xf32>
    %39 = arith.select %36, %37, %38 : vector<8x128xi1>, vector<8x128xf32>
    %40 = arith.subf %34, %39 : vector<8x128xf32>
    %cst_26 = arith.constant 1.000000e+00 : f32
    %41 = vector.broadcast %cst_26 : f32 to vector<8x128xf32>
    %42 = arith.cmpf ogt, %40, %41 : vector<8x128xf32>
    %cst_27 = arith.constant 1.000000e+00 : f32
    %cst_28 = arith.constant 0.000000e+00 : f32
    %43 = vector.broadcast %cst_27 : f32 to vector<8x128xf32>
    %44 = vector.broadcast %cst_28 : f32 to vector<8x128xf32>
    %45 = arith.select %42, %43, %44 : vector<8x128xi1>, vector<8x128xf32>
    %46 = arith.truncf %45 : vector<8x128xf32> to vector<8x128xbf16>
    %cst_29 = arith.constant dense<0.000000e+00> : vector<8x128xf32>
    %47 = tpu.matmul %46, %1, %cst_29 {dimension_numbers = #tpu.dot_dimension_numbers<[1], [0], [0], [1], [0, 0, 1, 1], [], []>} : vector<8x128xbf16>, vector<128x128xbf16>, vector<8x128xf32> -> vector<8x128xf32>
    %48 = arith.addf %47, %13 : vector<8x128xf32>
    %cst_30 = arith.constant 0.949999988 : f32
    %49 = vector.broadcast %cst_30 : f32 to vector<8x128xf32>
    %50 = arith.mulf %49, %14 : vector<8x128xf32>
    %51 = arith.addf %50, %48 : vector<8x128xf32>
    %cst_31 = arith.constant 1.000000e+00 : f32
    %52 = vector.broadcast %cst_31 : f32 to vector<8x128xf32>
    %53 = arith.cmpf ogt, %14, %52 : vector<8x128xf32>
    %cst_32 = arith.constant 1.000000e+00 : f32
    %cst_33 = arith.constant 0.000000e+00 : f32
    %54 = vector.broadcast %cst_32 : f32 to vector<8x128xf32>
    %55 = vector.broadcast %cst_33 : f32 to vector<8x128xf32>
    %56 = arith.select %53, %54, %55 : vector<8x128xi1>, vector<8x128xf32>
    %57 = arith.subf %51, %56 : vector<8x128xf32>
    %cst_34 = arith.constant 1.000000e+00 : f32
    %58 = vector.broadcast %cst_34 : f32 to vector<8x128xf32>
    %59 = arith.cmpf ogt, %57, %58 : vector<8x128xf32>
    %cst_35 = arith.constant 1.000000e+00 : f32
    %cst_36 = arith.constant 0.000000e+00 : f32
    %60 = vector.broadcast %cst_35 : f32 to vector<8x128xf32>
    %61 = vector.broadcast %cst_36 : f32 to vector<8x128xf32>
    %62 = arith.select %59, %60, %61 : vector<8x128xi1>, vector<8x128xf32>
    %63 = vector.shape_cast %28 : vector<8x128xf32> to vector<1x8x128xf32>
    %64 = vector.shape_cast %45 : vector<8x128xf32> to vector<1x8x128xf32>
    %65 = vector.shape_cast %62 : vector<8x128xf32> to vector<1x8x128xf32>
    %66 = vector.shape_cast %23 : vector<8x128xf32> to vector<1x8x128xf32>
    %67 = vector.shape_cast %40 : vector<8x128xf32> to vector<1x8x128xf32>
    %68 = vector.shape_cast %57 : vector<8x128xf32> to vector<1x8x128xf32>
    %69 = tpu.concatenate %63, %64, %65, %66, %67, %68 in 0 : vector<1x8x128xf32>, vector<1x8x128xf32>, vector<1x8x128xf32>, vector<1x8x128xf32>, vector<1x8x128xf32>, vector<1x8x128xf32> -> vector<6x8x128xf32>
    %70 = arith.index_cast %c0_i32 : i32 to index
    %c0_37 = arith.constant 0 : index
    %c0_38 = arith.constant 0 : index
    %c0_39 = arith.constant 0 : index
    %71 = vector.load %arg8[%70, %c0_37, %c0_38, %c0_39] : memref<16x6x8x128xf32, #tpu.memory_space<vmem>>, vector<1x6x8x128xf32>
    %72 = vector.shape_cast %71 : vector<1x6x8x128xf32> to vector<6x8x128xf32>
    %73 = vector.shape_cast %69 : vector<6x8x128xf32> to vector<1x6x8x128xf32>
    tpu.vector_store %arg8[%70, %c0_37, %c0_38, %c0_39], %73 {strides = array<i32>} : memref<16x6x8x128xf32, #tpu.memory_space<vmem>>, vector<1x6x8x128xf32>,
    %c1_i32 = arith.constant 1 : i32
    %cst_40 = arith.constant 0.949999988 : f32
    %74 = vector.broadcast %cst_40 : f32 to vector<8x128xf32>
    %75 = arith.mulf %74, %23 : vector<8x128xf32>
    %76 = arith.addf %75, %7 : vector<8x128xf32>
    %cst_41 = arith.constant 1.000000e+00 : f32
    %77 = vector.broadcast %cst_41 : f32 to vector<8x128xf32>
    %78 = arith.cmpf ogt, %23, %77 : vector<8x128xf32>
    %cst_42 = arith.constant 1.000000e+00 : f32
    %cst_43 = arith.constant 0.000000e+00 : f32
    %79 = vector.broadcast %cst_42 : f32 to vector<8x128xf32>
    %80 = vector.broadcast %cst_43 : f32 to vector<8x128xf32>
    %81 = arith.select %78, %79, %80 : vector<8x128xi1>, vector<8x128xf32>
    %82 = arith.subf %76, %81 : vector<8x128xf32>
    %cst_44 = arith.constant 1.000000e+00 : f32
    %83 = vector.broadcast %cst_44 : f32 to vector<8x128xf32>
    %84 = arith.cmpf ogt, %82, %83 : vector<8x128xf32>
    %cst_45 = arith.constant 1.000000e+00 : f32
    %cst_46 = arith.constant 0.000000e+00 : f32
    %85 = vector.broadcast %cst_45 : f32 to vector<8x128xf32>
    %86 = vector.broadcast %cst_46 : f32 to vector<8x128xf32>
    %87 = arith.select %84, %85, %86 : vector<8x128xi1>, vector<8x128xf32>
    %88 = arith.truncf %87 : vector<8x128xf32> to vector<8x128xbf16>
    %cst_47 = arith.constant dense<0.000000e+00> : vector<8x128xf32>
    %89 = tpu.matmul %88, %0, %cst_47 {dimension_numbers = #tpu.dot_dimension_numbers<[1], [0], [0], [1], [0, 0, 1, 1], [], []>} : vector<8x128xbf16>, vector<128x128xbf16>, vector<8x128xf32> -> vector<8x128xf32>
    %90 = arith.addf %89, %10 : vector<8x128xf32>
    %cst_48 = arith.constant 0.949999988 : f32
    %91 = vector.broadcast %cst_48 : f32 to vector<8x128xf32>
    %92 = arith.mulf %91, %40 : vector<8x128xf32>
    %93 = arith.addf %92, %90 : vector<8x128xf32>
    %cst_49 = arith.constant 1.000000e+00 : f32
    %94 = vector.broadcast %cst_49 : f32 to vector<8x128xf32>
    %95 = arith.cmpf ogt, %40, %94 : vector<8x128xf32>
    %cst_50 = arith.constant 1.000000e+00 : f32
    %cst_51 = arith.constant 0.000000e+00 : f32
    %96 = vector.broadcast %cst_50 : f32 to vector<8x128xf32>
    %97 = vector.broadcast %cst_51 : f32 to vector<8x128xf32>
    %98 = arith.select %95, %96, %97 : vector<8x128xi1>, vector<8x128xf32>
    %99 = arith.subf %93, %98 : vector<8x128xf32>
    %cst_52 = arith.constant 1.000000e+00 : f32
    %100 = vector.broadcast %cst_52 : f32 to vector<8x128xf32>
    %101 = arith.cmpf ogt, %99, %100 : vector<8x128xf32>
    %cst_53 = arith.constant 1.000000e+00 : f32
    %cst_54 = arith.constant 0.000000e+00 : f32
    %102 = vector.broadcast %cst_53 : f32 to vector<8x128xf32>
    %103 = vector.broadcast %cst_54 : f32 to vector<8x128xf32>
    %104 = arith.select %101, %102, %103 : vector<8x128xi1>, vector<8x128xf32>
    %105 = arith.truncf %104 : vector<8x128xf32> to vector<8x128xbf16>
    %cst_55 = arith.constant dense<0.000000e+00> : vector<8x128xf32>
    %106 = tpu.matmul %105, %1, %cst_55 {dimension_numbers = #tpu.dot_dimension_numbers<[1], [0], [0], [1], [0, 0, 1, 1], [], []>} : vector<8x128xbf16>, vector<128x128xbf16>, vector<8x128xf32> -> vector<8x128xf32>
    %107 = arith.addf %106, %13 : vector<8x128xf32>
    %cst_56 = arith.constant 0.949999988 : f32
    %108 = vector.broadcast %cst_56 : f32 to vector<8x128xf32>
    %109 = arith.mulf %108, %57 : vector<8x128xf32>
    %110 = arith.addf %109, %107 : vector<8x128xf32>
    %cst_57 = arith.constant 1.000000e+00 : f32
    %111 = vector.broadcast %cst_57 : f32 to vector<8x128xf32>
    %112 = arith.cmpf ogt, %57, %111 : vector<8x128xf32>
    %cst_58 = arith.constant 1.000000e+00 : f32
    %cst_59 = arith.constant 0.000000e+00 : f32
    %113 = vector.broadcast %cst_58 : f32 to vector<8x128xf32>
    %114 = vector.broadcast %cst_59 : f32 to vector<8x128xf32>
    %115 = arith.select %112, %113, %114 : vector<8x128xi1>, vector<8x128xf32>
    %116 = arith.subf %110, %115 : vector<8x128xf32>
    %cst_60 = arith.constant 1.000000e+00 : f32
    %117 = vector.broadcast %cst_60 : f32 to vector<8x128xf32>
    %118 = arith.cmpf ogt, %116, %117 : vector<8x128xf32>
    %cst_61 = arith.constant 1.000000e+00 : f32
    %cst_62 = arith.constant 0.000000e+00 : f32
    %119 = vector.broadcast %cst_61 : f32 to vector<8x128xf32>
    %120 = vector.broadcast %cst_62 : f32 to vector<8x128xf32>
    %121 = arith.select %118, %119, %120 : vector<8x128xi1>, vector<8x128xf32>
    %122 = vector.shape_cast %87 : vector<8x128xf32> to vector<1x8x128xf32>
    %123 = vector.shape_cast %104 : vector<8x128xf32> to vector<1x8x128xf32>
    %124 = vector.shape_cast %121 : vector<8x128xf32> to vector<1x8x128xf32>
    %125 = vector.shape_cast %82 : vector<8x128xf32> to vector<1x8x128xf32>
    %126 = vector.shape_cast %99 : vector<8x128xf32> to vector<1x8x128xf32>
    %127 = vector.shape_cast %116 : vector<8x128xf32> to vector<1x8x128xf32>
    %128 = tpu.concatenate %122, %123, %124, %125, %126, %127 in 0 : vector<1x8x128xf32>, vector<1x8x128xf32>, vector<1x8x128xf32>, vector<1x8x128xf32>, vector<1x8x128xf32>, vector<1x8x128xf32> -> vector<6x8x128xf32>
    %129 = arith.index_cast %c1_i32 : i32 to index
    %c0_63 = arith.constant 0 : index
    %c0_64 = arith.constant 0 : index
    %c0_65 = arith.constant 0 : index
    %130 = vector.load %arg8[%129, %c0_63, %c0_64, %c0_65] : memref<16x6x8x128xf32, #tpu.memory_space<vmem>>, vector<1x6x8x128xf32>
    %131 = vector.shape_cast %130 : vector<1x6x8x128xf32> to vector<6x8x128xf32>
    %132 = vector.shape_cast %128 : vector<6x8x128xf32> to vector<1x6x8x128xf32>
    tpu.vector_store %arg8[%129, %c0_63, %c0_64, %c0_65], %132 {strides = array<i32>} : memref<16x6x8x128xf32, #tpu.memory_space<vmem>>, vector<1x6x8x128xf32>,
    %c2_i32 = arith.constant 2 : i32
    %cst_66 = arith.constant 0.949999988 : f32
    %133 = vector.broadcast %cst_66 : f32 to vector<8x128xf32>
    %134 = arith.mulf %133, %82 : vector<8x128xf32>
    %135 = arith.addf %134, %7 : vector<8x128xf32>
    %cst_67 = arith.constant 1.000000e+00 : f32
    %136 = vector.broadcast %cst_67 : f32 to vector<8x128xf32>
    %137 = arith.cmpf ogt, %82, %136 : vector<8x128xf32>
    %cst_68 = arith.constant 1.000000e+00 : f32
    %cst_69 = arith.constant 0.000000e+00 : f32
    %138 = vector.broadcast %cst_68 : f32 to vector<8x128xf32>
    %139 = vector.broadcast %cst_69 : f32 to vector<8x128xf32>
    %140 = arith.select %137, %138, %139 : vector<8x128xi1>, vector<8x128xf32>
    %141 = arith.subf %135, %140 : vector<8x128xf32>
    %cst_70 = arith.constant 1.000000e+00 : f32
    %142 = vector.broadcast %cst_70 : f32 to vector<8x128xf32>
    %143 = arith.cmpf ogt, %141, %142 : vector<8x128xf32>
    %cst_71 = arith.constant 1.000000e+00 : f32
    %cst_72 = arith.constant 0.000000e+00 : f32
    %144 = vector.broadcast %cst_71 : f32 to vector<8x128xf32>
    %145 = vector.broadcast %cst_72 : f32 to vector<8x128xf32>
    %146 = arith.select %143, %144, %145 : vector<8x128xi1>, vector<8x128xf32>
    %147 = arith.truncf %146 : vector<8x128xf32> to vector<8x128xbf16>
    %cst_73 = arith.constant dense<0.000000e+00> : vector<8x128xf32>
    %148 = tpu.matmul %147, %0, %cst_73 {dimension_numbers = #tpu.dot_dimension_numbers<[1], [0], [0], [1], [0, 0, 1, 1], [], []>} : vector<8x128xbf16>, vector<128x128xbf16>, vector<8x128xf32> -> vector<8x128xf32>
    %149 = arith.addf %148, %10 : vector<8x128xf32>
    %cst_74 = arith.constant 0.949999988 : f32
    %150 = vector.broadcast %cst_74 : f32 to vector<8x128xf32>
    %151 = arith.mulf %150, %99 : vector<8x128xf32>
    %152 = arith.addf %151, %149 : vector<8x128xf32>
    %cst_75 = arith.constant 1.000000e+00 : f32
    %153 = vector.broadcast %cst_75 : f32 to vector<8x128xf32>
    %154 = arith.cmpf ogt, %99, %153 : vector<8x128xf32>
    %cst_76 = arith.constant 1.000000e+00 : f32
    %cst_77 = arith.constant 0.000000e+00 : f32
    %155 = vector.broadcast %cst_76 : f32 to vector<8x128xf32>
    %156 = vector.broadcast %cst_77 : f32 to vector<8x128xf32>
    %157 = arith.select %154, %155, %156 : vector<8x128xi1>, vector<8x128xf32>
    %158 = arith.subf %152, %157 : vector<8x128xf32>
    %cst_78 = arith.constant 1.000000e+00 : f32
    %159 = vector.broadcast %cst_78 : f32 to vector<8x128xf32>
    %160 = arith.cmpf ogt, %158, %159 : vector<8x128xf32>
    %cst_79 = arith.constant 1.000000e+00 : f32
    %cst_80 = arith.constant 0.000000e+00 : f32
    %161 = vector.broadcast %cst_79 : f32 to vector<8x128xf32>
    %162 = vector.broadcast %cst_80 : f32 to vector<8x128xf32>
    %163 = arith.select %160, %161, %162 : vector<8x128xi1>, vector<8x128xf32>
    %164 = arith.truncf %163 : vector<8x128xf32> to vector<8x128xbf16>
    %cst_81 = arith.constant dense<0.000000e+00> : vector<8x128xf32>
    %165 = tpu.matmul %164, %1, %cst_81 {dimension_numbers = #tpu.dot_dimension_numbers<[1], [0], [0], [1], [0, 0, 1, 1], [], []>} : vector<8x128xbf16>, vector<128x128xbf16>, vector<8x128xf32> -> vector<8x128xf32>
    %166 = arith.addf %165, %13 : vector<8x128xf32>
    %cst_82 = arith.constant 0.949999988 : f32
    %167 = vector.broadcast %cst_82 : f32 to vector<8x128xf32>
    %168 = arith.mulf %167, %116 : vector<8x128xf32>
    %169 = arith.addf %168, %166 : vector<8x128xf32>
    %cst_83 = arith.constant 1.000000e+00 : f32
    %170 = vector.broadcast %cst_83 : f32 to vector<8x128xf32>
    %171 = arith.cmpf ogt, %116, %170 : vector<8x128xf32>
    %cst_84 = arith.constant 1.000000e+00 : f32
    %cst_85 = arith.constant 0.000000e+00 : f32
    %172 = vector.broadcast %cst_84 : f32 to vector<8x128xf32>
    %173 = vector.broadcast %cst_85 : f32 to vector<8x128xf32>
    %174 = arith.select %171, %172, %173 : vector<8x128xi1>, vector<8x128xf32>
    %175 = arith.subf %169, %174 : vector<8x128xf32>
    %cst_86 = arith.constant 1.000000e+00 : f32
    %176 = vector.broadcast %cst_86 : f32 to vector<8x128xf32>
    %177 = arith.cmpf ogt, %175, %176 : vector<8x128xf32>
    %cst_87 = arith.constant 1.000000e+00 : f32
    %cst_88 = arith.constant 0.000000e+00 : f32
    %178 = vector.broadcast %cst_87 : f32 to vector<8x128xf32>
    %179 = vector.broadcast %cst_88 : f32 to vector<8x128xf32>
    %180 = arith.select %177, %178, %179 : vector<8x128xi1>, vector<8x128xf32>
    %181 = vector.shape_cast %146 : vector<8x128xf32> to vector<1x8x128xf32>
    %182 = vector.shape_cast %163 : vector<8x128xf32> to vector<1x8x128xf32>
    %183 = vector.shape_cast %180 : vector<8x128xf32> to vector<1x8x128xf32>
    %184 = vector.shape_cast %141 : vector<8x128xf32> to vector<1x8x128xf32>
    %185 = vector.shape_cast %158 : vector<8x128xf32> to vector<1x8x128xf32>
    %186 = vector.shape_cast %175 : vector<8x128xf32> to vector<1x8x128xf32>
    %187 = tpu.concatenate %181, %182, %183, %184, %185, %186 in 0 : vector<1x8x128xf32>, vector<1x8x128xf32>, vector<1x8x128xf32>, vector<1x8x128xf32>, vector<1x8x128xf32>, vector<1x8x128xf32> -> vector<6x8x128xf32>
    %188 = arith.index_cast %c2_i32 : i32 to index
    %c0_89 = arith.constant 0 : index
    %c0_90 = arith.constant 0 : index
    %c0_91 = arith.constant 0 : index
    %189 = vector.load %arg8[%188, %c0_89, %c0_90, %c0_91] : memref<16x6x8x128xf32, #tpu.memory_space<vmem>>, vector<1x6x8x128xf32>
    %190 = vector.shape_cast %189 : vector<1x6x8x128xf32> to vector<6x8x128xf32>
    %191 = vector.shape_cast %187 : vector<6x8x128xf32> to vector<1x6x8x128xf32>
    tpu.vector_store %arg8[%188, %c0_89, %c0_90, %c0_91], %191 {strides = array<i32>} : memref<16x6x8x128xf32, #tpu.memory_space<vmem>>, vector<1x6x8x128xf32>,
    %c3_i32 = arith.constant 3 : i32
    %cst_92 = arith.constant 0.949999988 : f32
    %192 = vector.broadcast %cst_92 : f32 to vector<8x128xf32>
    %193 = arith.mulf %192, %141 : vector<8x128xf32>
    %194 = arith.addf %193, %7 : vector<8x128xf32>
    %cst_93 = arith.constant 1.000000e+00 : f32
    %195 = vector.broadcast %cst_93 : f32 to vector<8x128xf32>
    %196 = arith.cmpf ogt, %141, %195 : vector<8x128xf32>
    %cst_94 = arith.constant 1.000000e+00 : f32
    %cst_95 = arith.constant 0.000000e+00 : f32
    %197 = vector.broadcast %cst_94 : f32 to vector<8x128xf32>
    %198 = vector.broadcast %cst_95 : f32 to vector<8x128xf32>
    %199 = arith.select %196, %197, %198 : vector<8x128xi1>, vector<8x128xf32>
    %200 = arith.subf %194, %199 : vector<8x128xf32>
    %cst_96 = arith.constant 1.000000e+00 : f32
    %201 = vector.broadcast %cst_96 : f32 to vector<8x128xf32>
    %202 = arith.cmpf ogt, %200, %201 : vector<8x128xf32>
    %cst_97 = arith.constant 1.000000e+00 : f32
    %cst_98 = arith.constant 0.000000e+00 : f32
    %203 = vector.broadcast %cst_97 : f32 to vector<8x128xf32>
    %204 = vector.broadcast %cst_98 : f32 to vector<8x128xf32>
    %205 = arith.select %202, %203, %204 : vector<8x128xi1>, vector<8x128xf32>
    %206 = arith.truncf %205 : vector<8x128xf32> to vector<8x128xbf16>
    %cst_99 = arith.constant dense<0.000000e+00> : vector<8x128xf32>
    %207 = tpu.matmul %206, %0, %cst_99 {dimension_numbers = #tpu.dot_dimension_numbers<[1], [0], [0], [1], [0, 0, 1, 1], [], []>} : vector<8x128xbf16>, vector<128x128xbf16>, vector<8x128xf32> -> vector<8x128xf32>
    %208 = arith.addf %207, %10 : vector<8x128xf32>
    %cst_100 = arith.constant 0.949999988 : f32
    %209 = vector.broadcast %cst_100 : f32 to vector<8x128xf32>
    %210 = arith.mulf %209, %158 : vector<8x128xf32>
    %211 = arith.addf %210, %208 : vector<8x128xf32>
    %cst_101 = arith.constant 1.000000e+00 : f32
    %212 = vector.broadcast %cst_101 : f32 to vector<8x128xf32>
    %213 = arith.cmpf ogt, %158, %212 : vector<8x128xf32>
    %cst_102 = arith.constant 1.000000e+00 : f32
    %cst_103 = arith.constant 0.000000e+00 : f32
    %214 = vector.broadcast %cst_102 : f32 to vector<8x128xf32>
    %215 = vector.broadcast %cst_103 : f32 to vector<8x128xf32>
    %216 = arith.select %213, %214, %215 : vector<8x128xi1>, vector<8x128xf32>
    %217 = arith.subf %211, %216 : vector<8x128xf32>
    %cst_104 = arith.constant 1.000000e+00 : f32
    %218 = vector.broadcast %cst_104 : f32 to vector<8x128xf32>
    %219 = arith.cmpf ogt, %217, %218 : vector<8x128xf32>
    %cst_105 = arith.constant 1.000000e+00 : f32
    %cst_106 = arith.constant 0.000000e+00 : f32
    %220 = vector.broadcast %cst_105 : f32 to vector<8x128xf32>
    %221 = vector.broadcast %cst_106 : f32 to vector<8x128xf32>
    %222 = arith.select %219, %220, %221 : vector<8x128xi1>, vector<8x128xf32>
    %223 = arith.truncf %222 : vector<8x128xf32> to vector<8x128xbf16>
    %cst_107 = arith.constant dense<0.000000e+00> : vector<8x128xf32>
    %224 = tpu.matmul %223, %1, %cst_107 {dimension_numbers = #tpu.dot_dimension_numbers<[1], [0], [0], [1], [0, 0, 1, 1], [], []>} : vector<8x128xbf16>, vector<128x128xbf16>, vector<8x128xf32> -> vector<8x128xf32>
    %225 = arith.addf %224, %13 : vector<8x128xf32>
    %cst_108 = arith.constant 0.949999988 : f32
    %226 = vector.broadcast %cst_108 : f32 to vector<8x128xf32>
    %227 = arith.mulf %226, %175 : vector<8x128xf32>
    %228 = arith.addf %227, %225 : vector<8x128xf32>
    %cst_109 = arith.constant 1.000000e+00 : f32
    %229 = vector.broadcast %cst_109 : f32 to vector<8x128xf32>
    %230 = arith.cmpf ogt, %175, %229 : vector<8x128xf32>
    %cst_110 = arith.constant 1.000000e+00 : f32
    %cst_111 = arith.constant 0.000000e+00 : f32
    %231 = vector.broadcast %cst_110 : f32 to vector<8x128xf32>
    %232 = vector.broadcast %cst_111 : f32 to vector<8x128xf32>
    %233 = arith.select %230, %231, %232 : vector<8x128xi1>, vector<8x128xf32>
    %234 = arith.subf %228, %233 : vector<8x128xf32>
    %cst_112 = arith.constant 1.000000e+00 : f32
    %235 = vector.broadcast %cst_112 : f32 to vector<8x128xf32>
    %236 = arith.cmpf ogt, %234, %235 : vector<8x128xf32>
    %cst_113 = arith.constant 1.000000e+00 : f32
    %cst_114 = arith.constant 0.000000e+00 : f32
    %237 = vector.broadcast %cst_113 : f32 to vector<8x128xf32>
    %238 = vector.broadcast %cst_114 : f32 to vector<8x128xf32>
    %239 = arith.select %236, %237, %238 : vector<8x128xi1>, vector<8x128xf32>
    %240 = vector.shape_cast %205 : vector<8x128xf32> to vector<1x8x128xf32>
    %241 = vector.shape_cast %222 : vector<8x128xf32> to vector<1x8x128xf32>
    %242 = vector.shape_cast %239 : vector<8x128xf32> to vector<1x8x128xf32>
    %243 = vector.shape_cast %200 : vector<8x128xf32> to vector<1x8x128xf32>
    %244 = vector.shape_cast %217 : vector<8x128xf32> to vector<1x8x128xf32>
    %245 = vector.shape_cast %234 : vector<8x128xf32> to vector<1x8x128xf32>
    %246 = tpu.concatenate %240, %241, %242, %243, %244, %245 in 0 : vector<1x8x128xf32>, vector<1x8x128xf32>, vector<1x8x128xf32>, vector<1x8x128xf32>, vector<1x8x128xf32>, vector<1x8x128xf32> -> vector<6x8x128xf32>
    %247 = arith.index_cast %c3_i32 : i32 to index
    %c0_115 = arith.constant 0 : index
    %c0_116 = arith.constant 0 : index
    %c0_117 = arith.constant 0 : index
    %248 = vector.load %arg8[%247, %c0_115, %c0_116, %c0_117] : memref<16x6x8x128xf32, #tpu.memory_space<vmem>>, vector<1x6x8x128xf32>
    %249 = vector.shape_cast %248 : vector<1x6x8x128xf32> to vector<6x8x128xf32>
    %250 = vector.shape_cast %246 : vector<6x8x128xf32> to vector<1x6x8x128xf32>
    tpu.vector_store %arg8[%247, %c0_115, %c0_116, %c0_117], %250 {strides = array<i32>} : memref<16x6x8x128xf32, #tpu.memory_space<vmem>>, vector<1x6x8x128xf32>,
    %c4_i32 = arith.constant 4 : i32
    %cst_118 = arith.constant 0.949999988 : f32
    %251 = vector.broadcast %cst_118 : f32 to vector<8x128xf32>
    %252 = arith.mulf %251, %200 : vector<8x128xf32>
    %253 = arith.addf %252, %7 : vector<8x128xf32>
    %cst_119 = arith.constant 1.000000e+00 : f32
    %254 = vector.broadcast %cst_119 : f32 to vector<8x128xf32>
    %255 = arith.cmpf ogt, %200, %254 : vector<8x128xf32>
    %cst_120 = arith.constant 1.000000e+00 : f32
    %cst_121 = arith.constant 0.000000e+00 : f32
    %256 = vector.broadcast %cst_120 : f32 to vector<8x128xf32>
    %257 = vector.broadcast %cst_121 : f32 to vector<8x128xf32>
    %258 = arith.select %255, %256, %257 : vector<8x128xi1>, vector<8x128xf32>
    %259 = arith.subf %253, %258 : vector<8x128xf32>
    %cst_122 = arith.constant 1.000000e+00 : f32
    %260 = vector.broadcast %cst_122 : f32 to vector<8x128xf32>
    %261 = arith.cmpf ogt, %259, %260 : vector<8x128xf32>
    %cst_123 = arith.constant 1.000000e+00 : f32
    %cst_124 = arith.constant 0.000000e+00 : f32
    %262 = vector.broadcast %cst_123 : f32 to vector<8x128xf32>
    %263 = vector.broadcast %cst_124 : f32 to vector<8x128xf32>
    %264 = arith.select %261, %262, %263 : vector<8x128xi1>, vector<8x128xf32>
    %265 = arith.truncf %264 : vector<8x128xf32> to vector<8x128xbf16>
    %cst_125 = arith.constant dense<0.000000e+00> : vector<8x128xf32>
    %266 = tpu.matmul %265, %0, %cst_125 {dimension_numbers = #tpu.dot_dimension_numbers<[1], [0], [0], [1], [0, 0, 1, 1], [], []>} : vector<8x128xbf16>, vector<128x128xbf16>, vector<8x128xf32> -> vector<8x128xf32>
    %267 = arith.addf %266, %10 : vector<8x128xf32>
    %cst_126 = arith.constant 0.949999988 : f32
    %268 = vector.broadcast %cst_126 : f32 to vector<8x128xf32>
    %269 = arith.mulf %268, %217 : vector<8x128xf32>
    %270 = arith.addf %269, %267 : vector<8x128xf32>
    %cst_127 = arith.constant 1.000000e+00 : f32
    %271 = vector.broadcast %cst_127 : f32 to vector<8x128xf32>
    %272 = arith.cmpf ogt, %217, %271 : vector<8x128xf32>
    %cst_128 = arith.constant 1.000000e+00 : f32
    %cst_129 = arith.constant 0.000000e+00 : f32
    %273 = vector.broadcast %cst_128 : f32 to vector<8x128xf32>
    %274 = vector.broadcast %cst_129 : f32 to vector<8x128xf32>
    %275 = arith.select %272, %273, %274 : vector<8x128xi1>, vector<8x128xf32>
    %276 = arith.subf %270, %275 : vector<8x128xf32>
    %cst_130 = arith.constant 1.000000e+00 : f32
    %277 = vector.broadcast %cst_130 : f32 to vector<8x128xf32>
    %278 = arith.cmpf ogt, %276, %277 : vector<8x128xf32>
    %cst_131 = arith.constant 1.000000e+00 : f32
    %cst_132 = arith.constant 0.000000e+00 : f32
    %279 = vector.broadcast %cst_131 : f32 to vector<8x128xf32>
    %280 = vector.broadcast %cst_132 : f32 to vector<8x128xf32>
    %281 = arith.select %278, %279, %280 : vector<8x128xi1>, vector<8x128xf32>
    %282 = arith.truncf %281 : vector<8x128xf32> to vector<8x128xbf16>
    %cst_133 = arith.constant dense<0.000000e+00> : vector<8x128xf32>
    %283 = tpu.matmul %282, %1, %cst_133 {dimension_numbers = #tpu.dot_dimension_numbers<[1], [0], [0], [1], [0, 0, 1, 1], [], []>} : vector<8x128xbf16>, vector<128x128xbf16>, vector<8x128xf32> -> vector<8x128xf32>
    %284 = arith.addf %283, %13 : vector<8x128xf32>
    %cst_134 = arith.constant 0.949999988 : f32
    %285 = vector.broadcast %cst_134 : f32 to vector<8x128xf32>
    %286 = arith.mulf %285, %234 : vector<8x128xf32>
    %287 = arith.addf %286, %284 : vector<8x128xf32>
    %cst_135 = arith.constant 1.000000e+00 : f32
    %288 = vector.broadcast %cst_135 : f32 to vector<8x128xf32>
    %289 = arith.cmpf ogt, %234, %288 : vector<8x128xf32>
    %cst_136 = arith.constant 1.000000e+00 : f32
    %cst_137 = arith.constant 0.000000e+00 : f32
    %290 = vector.broadcast %cst_136 : f32 to vector<8x128xf32>
    %291 = vector.broadcast %cst_137 : f32 to vector<8x128xf32>
    %292 = arith.select %289, %290, %291 : vector<8x128xi1>, vector<8x128xf32>
    %293 = arith.subf %287, %292 : vector<8x128xf32>
    %cst_138 = arith.constant 1.000000e+00 : f32
    %294 = vector.broadcast %cst_138 : f32 to vector<8x128xf32>
    %295 = arith.cmpf ogt, %293, %294 : vector<8x128xf32>
    %cst_139 = arith.constant 1.000000e+00 : f32
    %cst_140 = arith.constant 0.000000e+00 : f32
    %296 = vector.broadcast %cst_139 : f32 to vector<8x128xf32>
    %297 = vector.broadcast %cst_140 : f32 to vector<8x128xf32>
    %298 = arith.select %295, %296, %297 : vector<8x128xi1>, vector<8x128xf32>
    %299 = vector.shape_cast %264 : vector<8x128xf32> to vector<1x8x128xf32>
    %300 = vector.shape_cast %281 : vector<8x128xf32> to vector<1x8x128xf32>
    %301 = vector.shape_cast %298 : vector<8x128xf32> to vector<1x8x128xf32>
    %302 = vector.shape_cast %259 : vector<8x128xf32> to vector<1x8x128xf32>
    %303 = vector.shape_cast %276 : vector<8x128xf32> to vector<1x8x128xf32>
    %304 = vector.shape_cast %293 : vector<8x128xf32> to vector<1x8x128xf32>
    %305 = tpu.concatenate %299, %300, %301, %302, %303, %304 in 0 : vector<1x8x128xf32>, vector<1x8x128xf32>, vector<1x8x128xf32>, vector<1x8x128xf32>, vector<1x8x128xf32>, vector<1x8x128xf32> -> vector<6x8x128xf32>
    %306 = arith.index_cast %c4_i32 : i32 to index
    %c0_141 = arith.constant 0 : index
    %c0_142 = arith.constant 0 : index
    %c0_143 = arith.constant 0 : index
    %307 = vector.load %arg8[%306, %c0_141, %c0_142, %c0_143] : memref<16x6x8x128xf32, #tpu.memory_space<vmem>>, vector<1x6x8x128xf32>
    %308 = vector.shape_cast %307 : vector<1x6x8x128xf32> to vector<6x8x128xf32>
    %309 = vector.shape_cast %305 : vector<6x8x128xf32> to vector<1x6x8x128xf32>
    tpu.vector_store %arg8[%306, %c0_141, %c0_142, %c0_143], %309 {strides = array<i32>} : memref<16x6x8x128xf32, #tpu.memory_space<vmem>>, vector<1x6x8x128xf32>,
    %c5_i32 = arith.constant 5 : i32
    %cst_144 = arith.constant 0.949999988 : f32
    %310 = vector.broadcast %cst_144 : f32 to vector<8x128xf32>
    %311 = arith.mulf %310, %259 : vector<8x128xf32>
    %312 = arith.addf %311, %7 : vector<8x128xf32>
    %cst_145 = arith.constant 1.000000e+00 : f32
    %313 = vector.broadcast %cst_145 : f32 to vector<8x128xf32>
    %314 = arith.cmpf ogt, %259, %313 : vector<8x128xf32>
    %cst_146 = arith.constant 1.000000e+00 : f32
    %cst_147 = arith.constant 0.000000e+00 : f32
    %315 = vector.broadcast %cst_146 : f32 to vector<8x128xf32>
    %316 = vector.broadcast %cst_147 : f32 to vector<8x128xf32>
    %317 = arith.select %314, %315, %316 : vector<8x128xi1>, vector<8x128xf32>
    %318 = arith.subf %312, %317 : vector<8x128xf32>
    %cst_148 = arith.constant 1.000000e+00 : f32
    %319 = vector.broadcast %cst_148 : f32 to vector<8x128xf32>
    %320 = arith.cmpf ogt, %318, %319 : vector<8x128xf32>
    %cst_149 = arith.constant 1.000000e+00 : f32
    %cst_150 = arith.constant 0.000000e+00 : f32
    %321 = vector.broadcast %cst_149 : f32 to vector<8x128xf32>
    %322 = vector.broadcast %cst_150 : f32 to vector<8x128xf32>
    %323 = arith.select %320, %321, %322 : vector<8x128xi1>, vector<8x128xf32>
    %324 = arith.truncf %323 : vector<8x128xf32> to vector<8x128xbf16>
    %cst_151 = arith.constant dense<0.000000e+00> : vector<8x128xf32>
    %325 = tpu.matmul %324, %0, %cst_151 {dimension_numbers = #tpu.dot_dimension_numbers<[1], [0], [0], [1], [0, 0, 1, 1], [], []>} : vector<8x128xbf16>, vector<128x128xbf16>, vector<8x128xf32> -> vector<8x128xf32>
    %326 = arith.addf %325, %10 : vector<8x128xf32>
    %cst_152 = arith.constant 0.949999988 : f32
    %327 = vector.broadcast %cst_152 : f32 to vector<8x128xf32>
    %328 = arith.mulf %327, %276 : vector<8x128xf32>
    %329 = arith.addf %328, %326 : vector<8x128xf32>
    %cst_153 = arith.constant 1.000000e+00 : f32
    %330 = vector.broadcast %cst_153 : f32 to vector<8x128xf32>
    %331 = arith.cmpf ogt, %276, %330 : vector<8x128xf32>
    %cst_154 = arith.constant 1.000000e+00 : f32
    %cst_155 = arith.constant 0.000000e+00 : f32
    %332 = vector.broadcast %cst_154 : f32 to vector<8x128xf32>
    %333 = vector.broadcast %cst_155 : f32 to vector<8x128xf32>
    %334 = arith.select %331, %332, %333 : vector<8x128xi1>, vector<8x128xf32>
    %335 = arith.subf %329, %334 : vector<8x128xf32>
    %cst_156 = arith.constant 1.000000e+00 : f32
    %336 = vector.broadcast %cst_156 : f32 to vector<8x128xf32>
    %337 = arith.cmpf ogt, %335, %336 : vector<8x128xf32>
    %cst_157 = arith.constant 1.000000e+00 : f32
    %cst_158 = arith.constant 0.000000e+00 : f32
    %338 = vector.broadcast %cst_157 : f32 to vector<8x128xf32>
    %339 = vector.broadcast %cst_158 : f32 to vector<8x128xf32>
    %340 = arith.select %337, %338, %339 : vector<8x128xi1>, vector<8x128xf32>
    %341 = arith.truncf %340 : vector<8x128xf32> to vector<8x128xbf16>
    %cst_159 = arith.constant dense<0.000000e+00> : vector<8x128xf32>
    %342 = tpu.matmul %341, %1, %cst_159 {dimension_numbers = #tpu.dot_dimension_numbers<[1], [0], [0], [1], [0, 0, 1, 1], [], []>} : vector<8x128xbf16>, vector<128x128xbf16>, vector<8x128xf32> -> vector<8x128xf32>
    %343 = arith.addf %342, %13 : vector<8x128xf32>
    %cst_160 = arith.constant 0.949999988 : f32
    %344 = vector.broadcast %cst_160 : f32 to vector<8x128xf32>
    %345 = arith.mulf %344, %293 : vector<8x128xf32>
    %346 = arith.addf %345, %343 : vector<8x128xf32>
    %cst_161 = arith.constant 1.000000e+00 : f32
    %347 = vector.broadcast %cst_161 : f32 to vector<8x128xf32>
    %348 = arith.cmpf ogt, %293, %347 : vector<8x128xf32>
    %cst_162 = arith.constant 1.000000e+00 : f32
    %cst_163 = arith.constant 0.000000e+00 : f32
    %349 = vector.broadcast %cst_162 : f32 to vector<8x128xf32>
    %350 = vector.broadcast %cst_163 : f32 to vector<8x128xf32>
    %351 = arith.select %348, %349, %350 : vector<8x128xi1>, vector<8x128xf32>
    %352 = arith.subf %346, %351 : vector<8x128xf32>
    %cst_164 = arith.constant 1.000000e+00 : f32
    %353 = vector.broadcast %cst_164 : f32 to vector<8x128xf32>
    %354 = arith.cmpf ogt, %352, %353 : vector<8x128xf32>
    %cst_165 = arith.constant 1.000000e+00 : f32
    %cst_166 = arith.constant 0.000000e+00 : f32
    %355 = vector.broadcast %cst_165 : f32 to vector<8x128xf32>
    %356 = vector.broadcast %cst_166 : f32 to vector<8x128xf32>
    %357 = arith.select %354, %355, %356 : vector<8x128xi1>, vector<8x128xf32>
    %358 = vector.shape_cast %323 : vector<8x128xf32> to vector<1x8x128xf32>
    %359 = vector.shape_cast %340 : vector<8x128xf32> to vector<1x8x128xf32>
    %360 = vector.shape_cast %357 : vector<8x128xf32> to vector<1x8x128xf32>
    %361 = vector.shape_cast %318 : vector<8x128xf32> to vector<1x8x128xf32>
    %362 = vector.shape_cast %335 : vector<8x128xf32> to vector<1x8x128xf32>
    %363 = vector.shape_cast %352 : vector<8x128xf32> to vector<1x8x128xf32>
    %364 = tpu.concatenate %358, %359, %360, %361, %362, %363 in 0 : vector<1x8x128xf32>, vector<1x8x128xf32>, vector<1x8x128xf32>, vector<1x8x128xf32>, vector<1x8x128xf32>, vector<1x8x128xf32> -> vector<6x8x128xf32>
    %365 = arith.index_cast %c5_i32 : i32 to index
    %c0_167 = arith.constant 0 : index
    %c0_168 = arith.constant 0 : index
    %c0_169 = arith.constant 0 : index
    %366 = vector.load %arg8[%365, %c0_167, %c0_168, %c0_169] : memref<16x6x8x128xf32, #tpu.memory_space<vmem>>, vector<1x6x8x128xf32>
    %367 = vector.shape_cast %366 : vector<1x6x8x128xf32> to vector<6x8x128xf32>
    %368 = vector.shape_cast %364 : vector<6x8x128xf32> to vector<1x6x8x128xf32>
    tpu.vector_store %arg8[%365, %c0_167, %c0_168, %c0_169], %368 {strides = array<i32>} : memref<16x6x8x128xf32, #tpu.memory_space<vmem>>, vector<1x6x8x128xf32>,
    %c6_i32 = arith.constant 6 : i32
    %cst_170 = arith.constant 0.949999988 : f32
    %369 = vector.broadcast %cst_170 : f32 to vector<8x128xf32>
    %370 = arith.mulf %369, %318 : vector<8x128xf32>
    %371 = arith.addf %370, %7 : vector<8x128xf32>
    %cst_171 = arith.constant 1.000000e+00 : f32
    %372 = vector.broadcast %cst_171 : f32 to vector<8x128xf32>
    %373 = arith.cmpf ogt, %318, %372 : vector<8x128xf32>
    %cst_172 = arith.constant 1.000000e+00 : f32
    %cst_173 = arith.constant 0.000000e+00 : f32
    %374 = vector.broadcast %cst_172 : f32 to vector<8x128xf32>
    %375 = vector.broadcast %cst_173 : f32 to vector<8x128xf32>
    %376 = arith.select %373, %374, %375 : vector<8x128xi1>, vector<8x128xf32>
    %377 = arith.subf %371, %376 : vector<8x128xf32>
    %cst_174 = arith.constant 1.000000e+00 : f32
    %378 = vector.broadcast %cst_174 : f32 to vector<8x128xf32>
    %379 = arith.cmpf ogt, %377, %378 : vector<8x128xf32>
    %cst_175 = arith.constant 1.000000e+00 : f32
    %cst_176 = arith.constant 0.000000e+00 : f32
    %380 = vector.broadcast %cst_175 : f32 to vector<8x128xf32>
    %381 = vector.broadcast %cst_176 : f32 to vector<8x128xf32>
    %382 = arith.select %379, %380, %381 : vector<8x128xi1>, vector<8x128xf32>
    %383 = arith.truncf %382 : vector<8x128xf32> to vector<8x128xbf16>
    %cst_177 = arith.constant dense<0.000000e+00> : vector<8x128xf32>
    %384 = tpu.matmul %383, %0, %cst_177 {dimension_numbers = #tpu.dot_dimension_numbers<[1], [0], [0], [1], [0, 0, 1, 1], [], []>} : vector<8x128xbf16>, vector<128x128xbf16>, vector<8x128xf32> -> vector<8x128xf32>
    %385 = arith.addf %384, %10 : vector<8x128xf32>
    %cst_178 = arith.constant 0.949999988 : f32
    %386 = vector.broadcast %cst_178 : f32 to vector<8x128xf32>
    %387 = arith.mulf %386, %335 : vector<8x128xf32>
    %388 = arith.addf %387, %385 : vector<8x128xf32>
    %cst_179 = arith.constant 1.000000e+00 : f32
    %389 = vector.broadcast %cst_179 : f32 to vector<8x128xf32>
    %390 = arith.cmpf ogt, %335, %389 : vector<8x128xf32>
    %cst_180 = arith.constant 1.000000e+00 : f32
    %cst_181 = arith.constant 0.000000e+00 : f32
    %391 = vector.broadcast %cst_180 : f32 to vector<8x128xf32>
    %392 = vector.broadcast %cst_181 : f32 to vector<8x128xf32>
    %393 = arith.select %390, %391, %392 : vector<8x128xi1>, vector<8x128xf32>
    %394 = arith.subf %388, %393 : vector<8x128xf32>
    %cst_182 = arith.constant 1.000000e+00 : f32
    %395 = vector.broadcast %cst_182 : f32 to vector<8x128xf32>
    %396 = arith.cmpf ogt, %394, %395 : vector<8x128xf32>
    %cst_183 = arith.constant 1.000000e+00 : f32
    %cst_184 = arith.constant 0.000000e+00 : f32
    %397 = vector.broadcast %cst_183 : f32 to vector<8x128xf32>
    %398 = vector.broadcast %cst_184 : f32 to vector<8x128xf32>
    %399 = arith.select %396, %397, %398 : vector<8x128xi1>, vector<8x128xf32>
    %400 = arith.truncf %399 : vector<8x128xf32> to vector<8x128xbf16>
    %cst_185 = arith.constant dense<0.000000e+00> : vector<8x128xf32>
    %401 = tpu.matmul %400, %1, %cst_185 {dimension_numbers = #tpu.dot_dimension_numbers<[1], [0], [0], [1], [0, 0, 1, 1], [], []>} : vector<8x128xbf16>, vector<128x128xbf16>, vector<8x128xf32> -> vector<8x128xf32>
    %402 = arith.addf %401, %13 : vector<8x128xf32>
    %cst_186 = arith.constant 0.949999988 : f32
    %403 = vector.broadcast %cst_186 : f32 to vector<8x128xf32>
    %404 = arith.mulf %403, %352 : vector<8x128xf32>
    %405 = arith.addf %404, %402 : vector<8x128xf32>
    %cst_187 = arith.constant 1.000000e+00 : f32
    %406 = vector.broadcast %cst_187 : f32 to vector<8x128xf32>
    %407 = arith.cmpf ogt, %352, %406 : vector<8x128xf32>
    %cst_188 = arith.constant 1.000000e+00 : f32
    %cst_189 = arith.constant 0.000000e+00 : f32
    %408 = vector.broadcast %cst_188 : f32 to vector<8x128xf32>
    %409 = vector.broadcast %cst_189 : f32 to vector<8x128xf32>
    %410 = arith.select %407, %408, %409 : vector<8x128xi1>, vector<8x128xf32>
    %411 = arith.subf %405, %410 : vector<8x128xf32>
    %cst_190 = arith.constant 1.000000e+00 : f32
    %412 = vector.broadcast %cst_190 : f32 to vector<8x128xf32>
    %413 = arith.cmpf ogt, %411, %412 : vector<8x128xf32>
    %cst_191 = arith.constant 1.000000e+00 : f32
    %cst_192 = arith.constant 0.000000e+00 : f32
    %414 = vector.broadcast %cst_191 : f32 to vector<8x128xf32>
    %415 = vector.broadcast %cst_192 : f32 to vector<8x128xf32>
    %416 = arith.select %413, %414, %415 : vector<8x128xi1>, vector<8x128xf32>
    %417 = vector.shape_cast %382 : vector<8x128xf32> to vector<1x8x128xf32>
    %418 = vector.shape_cast %399 : vector<8x128xf32> to vector<1x8x128xf32>
    %419 = vector.shape_cast %416 : vector<8x128xf32> to vector<1x8x128xf32>
    %420 = vector.shape_cast %377 : vector<8x128xf32> to vector<1x8x128xf32>
    %421 = vector.shape_cast %394 : vector<8x128xf32> to vector<1x8x128xf32>
    %422 = vector.shape_cast %411 : vector<8x128xf32> to vector<1x8x128xf32>
    %423 = tpu.concatenate %417, %418, %419, %420, %421, %422 in 0 : vector<1x8x128xf32>, vector<1x8x128xf32>, vector<1x8x128xf32>, vector<1x8x128xf32>, vector<1x8x128xf32>, vector<1x8x128xf32> -> vector<6x8x128xf32>
    %424 = arith.index_cast %c6_i32 : i32 to index
    %c0_193 = arith.constant 0 : index
    %c0_194 = arith.constant 0 : index
    %c0_195 = arith.constant 0 : index
    %425 = vector.load %arg8[%424, %c0_193, %c0_194, %c0_195] : memref<16x6x8x128xf32, #tpu.memory_space<vmem>>, vector<1x6x8x128xf32>
    %426 = vector.shape_cast %425 : vector<1x6x8x128xf32> to vector<6x8x128xf32>
    %427 = vector.shape_cast %423 : vector<6x8x128xf32> to vector<1x6x8x128xf32>
    tpu.vector_store %arg8[%424, %c0_193, %c0_194, %c0_195], %427 {strides = array<i32>} : memref<16x6x8x128xf32, #tpu.memory_space<vmem>>, vector<1x6x8x128xf32>,
    %c7_i32 = arith.constant 7 : i32
    %cst_196 = arith.constant 0.949999988 : f32
    %428 = vector.broadcast %cst_196 : f32 to vector<8x128xf32>
    %429 = arith.mulf %428, %377 : vector<8x128xf32>
    %430 = arith.addf %429, %7 : vector<8x128xf32>
    %cst_197 = arith.constant 1.000000e+00 : f32
    %431 = vector.broadcast %cst_197 : f32 to vector<8x128xf32>
    %432 = arith.cmpf ogt, %377, %431 : vector<8x128xf32>
    %cst_198 = arith.constant 1.000000e+00 : f32
    %cst_199 = arith.constant 0.000000e+00 : f32
    %433 = vector.broadcast %cst_198 : f32 to vector<8x128xf32>
    %434 = vector.broadcast %cst_199 : f32 to vector<8x128xf32>
    %435 = arith.select %432, %433, %434 : vector<8x128xi1>, vector<8x128xf32>
    %436 = arith.subf %430, %435 : vector<8x128xf32>
    %cst_200 = arith.constant 1.000000e+00 : f32
    %437 = vector.broadcast %cst_200 : f32 to vector<8x128xf32>
    %438 = arith.cmpf ogt, %436, %437 : vector<8x128xf32>
    %cst_201 = arith.constant 1.000000e+00 : f32
    %cst_202 = arith.constant 0.000000e+00 : f32
    %439 = vector.broadcast %cst_201 : f32 to vector<8x128xf32>
    %440 = vector.broadcast %cst_202 : f32 to vector<8x128xf32>
    %441 = arith.select %438, %439, %440 : vector<8x128xi1>, vector<8x128xf32>
    %442 = arith.truncf %441 : vector<8x128xf32> to vector<8x128xbf16>
    %cst_203 = arith.constant dense<0.000000e+00> : vector<8x128xf32>
    %443 = tpu.matmul %442, %0, %cst_203 {dimension_numbers = #tpu.dot_dimension_numbers<[1], [0], [0], [1], [0, 0, 1, 1], [], []>} : vector<8x128xbf16>, vector<128x128xbf16>, vector<8x128xf32> -> vector<8x128xf32>
    %444 = arith.addf %443, %10 : vector<8x128xf32>
    %cst_204 = arith.constant 0.949999988 : f32
    %445 = vector.broadcast %cst_204 : f32 to vector<8x128xf32>
    %446 = arith.mulf %445, %394 : vector<8x128xf32>
    %447 = arith.addf %446, %444 : vector<8x128xf32>
    %cst_205 = arith.constant 1.000000e+00 : f32
    %448 = vector.broadcast %cst_205 : f32 to vector<8x128xf32>
    %449 = arith.cmpf ogt, %394, %448 : vector<8x128xf32>
    %cst_206 = arith.constant 1.000000e+00 : f32
    %cst_207 = arith.constant 0.000000e+00 : f32
    %450 = vector.broadcast %cst_206 : f32 to vector<8x128xf32>
    %451 = vector.broadcast %cst_207 : f32 to vector<8x128xf32>
    %452 = arith.select %449, %450, %451 : vector<8x128xi1>, vector<8x128xf32>
    %453 = arith.subf %447, %452 : vector<8x128xf32>
    %cst_208 = arith.constant 1.000000e+00 : f32
    %454 = vector.broadcast %cst_208 : f32 to vector<8x128xf32>
    %455 = arith.cmpf ogt, %453, %454 : vector<8x128xf32>
    %cst_209 = arith.constant 1.000000e+00 : f32
    %cst_210 = arith.constant 0.000000e+00 : f32
    %456 = vector.broadcast %cst_209 : f32 to vector<8x128xf32>
    %457 = vector.broadcast %cst_210 : f32 to vector<8x128xf32>
    %458 = arith.select %455, %456, %457 : vector<8x128xi1>, vector<8x128xf32>
    %459 = arith.truncf %458 : vector<8x128xf32> to vector<8x128xbf16>
    %cst_211 = arith.constant dense<0.000000e+00> : vector<8x128xf32>
    %460 = tpu.matmul %459, %1, %cst_211 {dimension_numbers = #tpu.dot_dimension_numbers<[1], [0], [0], [1], [0, 0, 1, 1], [], []>} : vector<8x128xbf16>, vector<128x128xbf16>, vector<8x128xf32> -> vector<8x128xf32>
    %461 = arith.addf %460, %13 : vector<8x128xf32>
    %cst_212 = arith.constant 0.949999988 : f32
    %462 = vector.broadcast %cst_212 : f32 to vector<8x128xf32>
    %463 = arith.mulf %462, %411 : vector<8x128xf32>
    %464 = arith.addf %463, %461 : vector<8x128xf32>
    %cst_213 = arith.constant 1.000000e+00 : f32
    %465 = vector.broadcast %cst_213 : f32 to vector<8x128xf32>
    %466 = arith.cmpf ogt, %411, %465 : vector<8x128xf32>
    %cst_214 = arith.constant 1.000000e+00 : f32
    %cst_215 = arith.constant 0.000000e+00 : f32
    %467 = vector.broadcast %cst_214 : f32 to vector<8x128xf32>
    %468 = vector.broadcast %cst_215 : f32 to vector<8x128xf32>
    %469 = arith.select %466, %467, %468 : vector<8x128xi1>, vector<8x128xf32>
    %470 = arith.subf %464, %469 : vector<8x128xf32>
    %cst_216 = arith.constant 1.000000e+00 : f32
    %471 = vector.broadcast %cst_216 : f32 to vector<8x128xf32>
    %472 = arith.cmpf ogt, %470, %471 : vector<8x128xf32>
    %cst_217 = arith.constant 1.000000e+00 : f32
    %cst_218 = arith.constant 0.000000e+00 : f32
    %473 = vector.broadcast %cst_217 : f32 to vector<8x128xf32>
    %474 = vector.broadcast %cst_218 : f32 to vector<8x128xf32>
    %475 = arith.select %472, %473, %474 : vector<8x128xi1>, vector<8x128xf32>
    %476 = vector.shape_cast %441 : vector<8x128xf32> to vector<1x8x128xf32>
    %477 = vector.shape_cast %458 : vector<8x128xf32> to vector<1x8x128xf32>
    %478 = vector.shape_cast %475 : vector<8x128xf32> to vector<1x8x128xf32>
    %479 = vector.shape_cast %436 : vector<8x128xf32> to vector<1x8x128xf32>
    %480 = vector.shape_cast %453 : vector<8x128xf32> to vector<1x8x128xf32>
    %481 = vector.shape_cast %470 : vector<8x128xf32> to vector<1x8x128xf32>
    %482 = tpu.concatenate %476, %477, %478, %479, %480, %481 in 0 : vector<1x8x128xf32>, vector<1x8x128xf32>, vector<1x8x128xf32>, vector<1x8x128xf32>, vector<1x8x128xf32>, vector<1x8x128xf32> -> vector<6x8x128xf32>
    %483 = arith.index_cast %c7_i32 : i32 to index
    %c0_219 = arith.constant 0 : index
    %c0_220 = arith.constant 0 : index
    %c0_221 = arith.constant 0 : index
    %484 = vector.load %arg8[%483, %c0_219, %c0_220, %c0_221] : memref<16x6x8x128xf32, #tpu.memory_space<vmem>>, vector<1x6x8x128xf32>
    %485 = vector.shape_cast %484 : vector<1x6x8x128xf32> to vector<6x8x128xf32>
    %486 = vector.shape_cast %482 : vector<6x8x128xf32> to vector<1x6x8x128xf32>
    tpu.vector_store %arg8[%483, %c0_219, %c0_220, %c0_221], %486 {strides = array<i32>} : memref<16x6x8x128xf32, #tpu.memory_space<vmem>>, vector<1x6x8x128xf32>,
    %c8_i32 = arith.constant 8 : i32
    %cst_222 = arith.constant 0.949999988 : f32
    %487 = vector.broadcast %cst_222 : f32 to vector<8x128xf32>
    %488 = arith.mulf %487, %436 : vector<8x128xf32>
    %489 = arith.addf %488, %7 : vector<8x128xf32>
    %cst_223 = arith.constant 1.000000e+00 : f32
    %490 = vector.broadcast %cst_223 : f32 to vector<8x128xf32>
    %491 = arith.cmpf ogt, %436, %490 : vector<8x128xf32>
    %cst_224 = arith.constant 1.000000e+00 : f32
    %cst_225 = arith.constant 0.000000e+00 : f32
    %492 = vector.broadcast %cst_224 : f32 to vector<8x128xf32>
    %493 = vector.broadcast %cst_225 : f32 to vector<8x128xf32>
    %494 = arith.select %491, %492, %493 : vector<8x128xi1>, vector<8x128xf32>
    %495 = arith.subf %489, %494 : vector<8x128xf32>
    %cst_226 = arith.constant 1.000000e+00 : f32
    %496 = vector.broadcast %cst_226 : f32 to vector<8x128xf32>
    %497 = arith.cmpf ogt, %495, %496 : vector<8x128xf32>
    %cst_227 = arith.constant 1.000000e+00 : f32
    %cst_228 = arith.constant 0.000000e+00 : f32
    %498 = vector.broadcast %cst_227 : f32 to vector<8x128xf32>
    %499 = vector.broadcast %cst_228 : f32 to vector<8x128xf32>
    %500 = arith.select %497, %498, %499 : vector<8x128xi1>, vector<8x128xf32>
    %501 = arith.truncf %500 : vector<8x128xf32> to vector<8x128xbf16>
    %cst_229 = arith.constant dense<0.000000e+00> : vector<8x128xf32>
    %502 = tpu.matmul %501, %0, %cst_229 {dimension_numbers = #tpu.dot_dimension_numbers<[1], [0], [0], [1], [0, 0, 1, 1], [], []>} : vector<8x128xbf16>, vector<128x128xbf16>, vector<8x128xf32> -> vector<8x128xf32>
    %503 = arith.addf %502, %10 : vector<8x128xf32>
    %cst_230 = arith.constant 0.949999988 : f32
    %504 = vector.broadcast %cst_230 : f32 to vector<8x128xf32>
    %505 = arith.mulf %504, %453 : vector<8x128xf32>
    %506 = arith.addf %505, %503 : vector<8x128xf32>
    %cst_231 = arith.constant 1.000000e+00 : f32
    %507 = vector.broadcast %cst_231 : f32 to vector<8x128xf32>
    %508 = arith.cmpf ogt, %453, %507 : vector<8x128xf32>
    %cst_232 = arith.constant 1.000000e+00 : f32
    %cst_233 = arith.constant 0.000000e+00 : f32
    %509 = vector.broadcast %cst_232 : f32 to vector<8x128xf32>
    %510 = vector.broadcast %cst_233 : f32 to vector<8x128xf32>
    %511 = arith.select %508, %509, %510 : vector<8x128xi1>, vector<8x128xf32>
    %512 = arith.subf %506, %511 : vector<8x128xf32>
    %cst_234 = arith.constant 1.000000e+00 : f32
    %513 = vector.broadcast %cst_234 : f32 to vector<8x128xf32>
    %514 = arith.cmpf ogt, %512, %513 : vector<8x128xf32>
    %cst_235 = arith.constant 1.000000e+00 : f32
    %cst_236 = arith.constant 0.000000e+00 : f32
    %515 = vector.broadcast %cst_235 : f32 to vector<8x128xf32>
    %516 = vector.broadcast %cst_236 : f32 to vector<8x128xf32>
    %517 = arith.select %514, %515, %516 : vector<8x128xi1>, vector<8x128xf32>
    %518 = arith.truncf %517 : vector<8x128xf32> to vector<8x128xbf16>
    %cst_237 = arith.constant dense<0.000000e+00> : vector<8x128xf32>
    %519 = tpu.matmul %518, %1, %cst_237 {dimension_numbers = #tpu.dot_dimension_numbers<[1], [0], [0], [1], [0, 0, 1, 1], [], []>} : vector<8x128xbf16>, vector<128x128xbf16>, vector<8x128xf32> -> vector<8x128xf32>
    %520 = arith.addf %519, %13 : vector<8x128xf32>
    %cst_238 = arith.constant 0.949999988 : f32
    %521 = vector.broadcast %cst_238 : f32 to vector<8x128xf32>
    %522 = arith.mulf %521, %470 : vector<8x128xf32>
    %523 = arith.addf %522, %520 : vector<8x128xf32>
    %cst_239 = arith.constant 1.000000e+00 : f32
    %524 = vector.broadcast %cst_239 : f32 to vector<8x128xf32>
    %525 = arith.cmpf ogt, %470, %524 : vector<8x128xf32>
    %cst_240 = arith.constant 1.000000e+00 : f32
    %cst_241 = arith.constant 0.000000e+00 : f32
    %526 = vector.broadcast %cst_240 : f32 to vector<8x128xf32>
    %527 = vector.broadcast %cst_241 : f32 to vector<8x128xf32>
    %528 = arith.select %525, %526, %527 : vector<8x128xi1>, vector<8x128xf32>
    %529 = arith.subf %523, %528 : vector<8x128xf32>
    %cst_242 = arith.constant 1.000000e+00 : f32
    %530 = vector.broadcast %cst_242 : f32 to vector<8x128xf32>
    %531 = arith.cmpf ogt, %529, %530 : vector<8x128xf32>
    %cst_243 = arith.constant 1.000000e+00 : f32
    %cst_244 = arith.constant 0.000000e+00 : f32
    %532 = vector.broadcast %cst_243 : f32 to vector<8x128xf32>
    %533 = vector.broadcast %cst_244 : f32 to vector<8x128xf32>
    %534 = arith.select %531, %532, %533 : vector<8x128xi1>, vector<8x128xf32>
    %535 = vector.shape_cast %500 : vector<8x128xf32> to vector<1x8x128xf32>
    %536 = vector.shape_cast %517 : vector<8x128xf32> to vector<1x8x128xf32>
    %537 = vector.shape_cast %534 : vector<8x128xf32> to vector<1x8x128xf32>
    %538 = vector.shape_cast %495 : vector<8x128xf32> to vector<1x8x128xf32>
    %539 = vector.shape_cast %512 : vector<8x128xf32> to vector<1x8x128xf32>
    %540 = vector.shape_cast %529 : vector<8x128xf32> to vector<1x8x128xf32>
    %541 = tpu.concatenate %535, %536, %537, %538, %539, %540 in 0 : vector<1x8x128xf32>, vector<1x8x128xf32>, vector<1x8x128xf32>, vector<1x8x128xf32>, vector<1x8x128xf32>, vector<1x8x128xf32> -> vector<6x8x128xf32>
    %542 = arith.index_cast %c8_i32 : i32 to index
    %c0_245 = arith.constant 0 : index
    %c0_246 = arith.constant 0 : index
    %c0_247 = arith.constant 0 : index
    %543 = vector.load %arg8[%542, %c0_245, %c0_246, %c0_247] : memref<16x6x8x128xf32, #tpu.memory_space<vmem>>, vector<1x6x8x128xf32>
    %544 = vector.shape_cast %543 : vector<1x6x8x128xf32> to vector<6x8x128xf32>
    %545 = vector.shape_cast %541 : vector<6x8x128xf32> to vector<1x6x8x128xf32>
    tpu.vector_store %arg8[%542, %c0_245, %c0_246, %c0_247], %545 {strides = array<i32>} : memref<16x6x8x128xf32, #tpu.memory_space<vmem>>, vector<1x6x8x128xf32>,
    %c9_i32 = arith.constant 9 : i32
    %cst_248 = arith.constant 0.949999988 : f32
    %546 = vector.broadcast %cst_248 : f32 to vector<8x128xf32>
    %547 = arith.mulf %546, %495 : vector<8x128xf32>
    %548 = arith.addf %547, %7 : vector<8x128xf32>
    %cst_249 = arith.constant 1.000000e+00 : f32
    %549 = vector.broadcast %cst_249 : f32 to vector<8x128xf32>
    %550 = arith.cmpf ogt, %495, %549 : vector<8x128xf32>
    %cst_250 = arith.constant 1.000000e+00 : f32
    %cst_251 = arith.constant 0.000000e+00 : f32
    %551 = vector.broadcast %cst_250 : f32 to vector<8x128xf32>
    %552 = vector.broadcast %cst_251 : f32 to vector<8x128xf32>
    %553 = arith.select %550, %551, %552 : vector<8x128xi1>, vector<8x128xf32>
    %554 = arith.subf %548, %553 : vector<8x128xf32>
    %cst_252 = arith.constant 1.000000e+00 : f32
    %555 = vector.broadcast %cst_252 : f32 to vector<8x128xf32>
    %556 = arith.cmpf ogt, %554, %555 : vector<8x128xf32>
    %cst_253 = arith.constant 1.000000e+00 : f32
    %cst_254 = arith.constant 0.000000e+00 : f32
    %557 = vector.broadcast %cst_253 : f32 to vector<8x128xf32>
    %558 = vector.broadcast %cst_254 : f32 to vector<8x128xf32>
    %559 = arith.select %556, %557, %558 : vector<8x128xi1>, vector<8x128xf32>
    %560 = arith.truncf %559 : vector<8x128xf32> to vector<8x128xbf16>
    %cst_255 = arith.constant dense<0.000000e+00> : vector<8x128xf32>
    %561 = tpu.matmul %560, %0, %cst_255 {dimension_numbers = #tpu.dot_dimension_numbers<[1], [0], [0], [1], [0, 0, 1, 1], [], []>} : vector<8x128xbf16>, vector<128x128xbf16>, vector<8x128xf32> -> vector<8x128xf32>
    %562 = arith.addf %561, %10 : vector<8x128xf32>
    %cst_256 = arith.constant 0.949999988 : f32
    %563 = vector.broadcast %cst_256 : f32 to vector<8x128xf32>
    %564 = arith.mulf %563, %512 : vector<8x128xf32>
    %565 = arith.addf %564, %562 : vector<8x128xf32>
    %cst_257 = arith.constant 1.000000e+00 : f32
    %566 = vector.broadcast %cst_257 : f32 to vector<8x128xf32>
    %567 = arith.cmpf ogt, %512, %566 : vector<8x128xf32>
    %cst_258 = arith.constant 1.000000e+00 : f32
    %cst_259 = arith.constant 0.000000e+00 : f32
    %568 = vector.broadcast %cst_258 : f32 to vector<8x128xf32>
    %569 = vector.broadcast %cst_259 : f32 to vector<8x128xf32>
    %570 = arith.select %567, %568, %569 : vector<8x128xi1>, vector<8x128xf32>
    %571 = arith.subf %565, %570 : vector<8x128xf32>
    %cst_260 = arith.constant 1.000000e+00 : f32
    %572 = vector.broadcast %cst_260 : f32 to vector<8x128xf32>
    %573 = arith.cmpf ogt, %571, %572 : vector<8x128xf32>
    %cst_261 = arith.constant 1.000000e+00 : f32
    %cst_262 = arith.constant 0.000000e+00 : f32
    %574 = vector.broadcast %cst_261 : f32 to vector<8x128xf32>
    %575 = vector.broadcast %cst_262 : f32 to vector<8x128xf32>
    %576 = arith.select %573, %574, %575 : vector<8x128xi1>, vector<8x128xf32>
    %577 = arith.truncf %576 : vector<8x128xf32> to vector<8x128xbf16>
    %cst_263 = arith.constant dense<0.000000e+00> : vector<8x128xf32>
    %578 = tpu.matmul %577, %1, %cst_263 {dimension_numbers = #tpu.dot_dimension_numbers<[1], [0], [0], [1], [0, 0, 1, 1], [], []>} : vector<8x128xbf16>, vector<128x128xbf16>, vector<8x128xf32> -> vector<8x128xf32>
    %579 = arith.addf %578, %13 : vector<8x128xf32>
    %cst_264 = arith.constant 0.949999988 : f32
    %580 = vector.broadcast %cst_264 : f32 to vector<8x128xf32>
    %581 = arith.mulf %580, %529 : vector<8x128xf32>
    %582 = arith.addf %581, %579 : vector<8x128xf32>
    %cst_265 = arith.constant 1.000000e+00 : f32
    %583 = vector.broadcast %cst_265 : f32 to vector<8x128xf32>
    %584 = arith.cmpf ogt, %529, %583 : vector<8x128xf32>
    %cst_266 = arith.constant 1.000000e+00 : f32
    %cst_267 = arith.constant 0.000000e+00 : f32
    %585 = vector.broadcast %cst_266 : f32 to vector<8x128xf32>
    %586 = vector.broadcast %cst_267 : f32 to vector<8x128xf32>
    %587 = arith.select %584, %585, %586 : vector<8x128xi1>, vector<8x128xf32>
    %588 = arith.subf %582, %587 : vector<8x128xf32>
    %cst_268 = arith.constant 1.000000e+00 : f32
    %589 = vector.broadcast %cst_268 : f32 to vector<8x128xf32>
    %590 = arith.cmpf ogt, %588, %589 : vector<8x128xf32>
    %cst_269 = arith.constant 1.000000e+00 : f32
    %cst_270 = arith.constant 0.000000e+00 : f32
    %591 = vector.broadcast %cst_269 : f32 to vector<8x128xf32>
    %592 = vector.broadcast %cst_270 : f32 to vector<8x128xf32>
    %593 = arith.select %590, %591, %592 : vector<8x128xi1>, vector<8x128xf32>
    %594 = vector.shape_cast %559 : vector<8x128xf32> to vector<1x8x128xf32>
    %595 = vector.shape_cast %576 : vector<8x128xf32> to vector<1x8x128xf32>
    %596 = vector.shape_cast %593 : vector<8x128xf32> to vector<1x8x128xf32>
    %597 = vector.shape_cast %554 : vector<8x128xf32> to vector<1x8x128xf32>
    %598 = vector.shape_cast %571 : vector<8x128xf32> to vector<1x8x128xf32>
    %599 = vector.shape_cast %588 : vector<8x128xf32> to vector<1x8x128xf32>
    %600 = tpu.concatenate %594, %595, %596, %597, %598, %599 in 0 : vector<1x8x128xf32>, vector<1x8x128xf32>, vector<1x8x128xf32>, vector<1x8x128xf32>, vector<1x8x128xf32>, vector<1x8x128xf32> -> vector<6x8x128xf32>
    %601 = arith.index_cast %c9_i32 : i32 to index
    %c0_271 = arith.constant 0 : index
    %c0_272 = arith.constant 0 : index
    %c0_273 = arith.constant 0 : index
    %602 = vector.load %arg8[%601, %c0_271, %c0_272, %c0_273] : memref<16x6x8x128xf32, #tpu.memory_space<vmem>>, vector<1x6x8x128xf32>
    %603 = vector.shape_cast %602 : vector<1x6x8x128xf32> to vector<6x8x128xf32>
    %604 = vector.shape_cast %600 : vector<6x8x128xf32> to vector<1x6x8x128xf32>
    tpu.vector_store %arg8[%601, %c0_271, %c0_272, %c0_273], %604 {strides = array<i32>} : memref<16x6x8x128xf32, #tpu.memory_space<vmem>>, vector<1x6x8x128xf32>,
    %c10_i32 = arith.constant 10 : i32
    %cst_274 = arith.constant 0.949999988 : f32
    %605 = vector.broadcast %cst_274 : f32 to vector<8x128xf32>
    %606 = arith.mulf %605, %554 : vector<8x128xf32>
    %607 = arith.addf %606, %7 : vector<8x128xf32>
    %cst_275 = arith.constant 1.000000e+00 : f32
    %608 = vector.broadcast %cst_275 : f32 to vector<8x128xf32>
    %609 = arith.cmpf ogt, %554, %608 : vector<8x128xf32>
    %cst_276 = arith.constant 1.000000e+00 : f32
    %cst_277 = arith.constant 0.000000e+00 : f32
    %610 = vector.broadcast %cst_276 : f32 to vector<8x128xf32>
    %611 = vector.broadcast %cst_277 : f32 to vector<8x128xf32>
    %612 = arith.select %609, %610, %611 : vector<8x128xi1>, vector<8x128xf32>
    %613 = arith.subf %607, %612 : vector<8x128xf32>
    %cst_278 = arith.constant 1.000000e+00 : f32
    %614 = vector.broadcast %cst_278 : f32 to vector<8x128xf32>
    %615 = arith.cmpf ogt, %613, %614 : vector<8x128xf32>
    %cst_279 = arith.constant 1.000000e+00 : f32
    %cst_280 = arith.constant 0.000000e+00 : f32
    %616 = vector.broadcast %cst_279 : f32 to vector<8x128xf32>
    %617 = vector.broadcast %cst_280 : f32 to vector<8x128xf32>
    %618 = arith.select %615, %616, %617 : vector<8x128xi1>, vector<8x128xf32>
    %619 = arith.truncf %618 : vector<8x128xf32> to vector<8x128xbf16>
    %cst_281 = arith.constant dense<0.000000e+00> : vector<8x128xf32>
    %620 = tpu.matmul %619, %0, %cst_281 {dimension_numbers = #tpu.dot_dimension_numbers<[1], [0], [0], [1], [0, 0, 1, 1], [], []>} : vector<8x128xbf16>, vector<128x128xbf16>, vector<8x128xf32> -> vector<8x128xf32>
    %621 = arith.addf %620, %10 : vector<8x128xf32>
    %cst_282 = arith.constant 0.949999988 : f32
    %622 = vector.broadcast %cst_282 : f32 to vector<8x128xf32>
    %623 = arith.mulf %622, %571 : vector<8x128xf32>
    %624 = arith.addf %623, %621 : vector<8x128xf32>
    %cst_283 = arith.constant 1.000000e+00 : f32
    %625 = vector.broadcast %cst_283 : f32 to vector<8x128xf32>
    %626 = arith.cmpf ogt, %571, %625 : vector<8x128xf32>
    %cst_284 = arith.constant 1.000000e+00 : f32
    %cst_285 = arith.constant 0.000000e+00 : f32
    %627 = vector.broadcast %cst_284 : f32 to vector<8x128xf32>
    %628 = vector.broadcast %cst_285 : f32 to vector<8x128xf32>
    %629 = arith.select %626, %627, %628 : vector<8x128xi1>, vector<8x128xf32>
    %630 = arith.subf %624, %629 : vector<8x128xf32>
    %cst_286 = arith.constant 1.000000e+00 : f32
    %631 = vector.broadcast %cst_286 : f32 to vector<8x128xf32>
    %632 = arith.cmpf ogt, %630, %631 : vector<8x128xf32>
    %cst_287 = arith.constant 1.000000e+00 : f32
    %cst_288 = arith.constant 0.000000e+00 : f32
    %633 = vector.broadcast %cst_287 : f32 to vector<8x128xf32>
    %634 = vector.broadcast %cst_288 : f32 to vector<8x128xf32>
    %635 = arith.select %632, %633, %634 : vector<8x128xi1>, vector<8x128xf32>
    %636 = arith.truncf %635 : vector<8x128xf32> to vector<8x128xbf16>
    %cst_289 = arith.constant dense<0.000000e+00> : vector<8x128xf32>
    %637 = tpu.matmul %636, %1, %cst_289 {dimension_numbers = #tpu.dot_dimension_numbers<[1], [0], [0], [1], [0, 0, 1, 1], [], []>} : vector<8x128xbf16>, vector<128x128xbf16>, vector<8x128xf32> -> vector<8x128xf32>
    %638 = arith.addf %637, %13 : vector<8x128xf32>
    %cst_290 = arith.constant 0.949999988 : f32
    %639 = vector.broadcast %cst_290 : f32 to vector<8x128xf32>
    %640 = arith.mulf %639, %588 : vector<8x128xf32>
    %641 = arith.addf %640, %638 : vector<8x128xf32>
    %cst_291 = arith.constant 1.000000e+00 : f32
    %642 = vector.broadcast %cst_291 : f32 to vector<8x128xf32>
    %643 = arith.cmpf ogt, %588, %642 : vector<8x128xf32>
    %cst_292 = arith.constant 1.000000e+00 : f32
    %cst_293 = arith.constant 0.000000e+00 : f32
    %644 = vector.broadcast %cst_292 : f32 to vector<8x128xf32>
    %645 = vector.broadcast %cst_293 : f32 to vector<8x128xf32>
    %646 = arith.select %643, %644, %645 : vector<8x128xi1>, vector<8x128xf32>
    %647 = arith.subf %641, %646 : vector<8x128xf32>
    %cst_294 = arith.constant 1.000000e+00 : f32
    %648 = vector.broadcast %cst_294 : f32 to vector<8x128xf32>
    %649 = arith.cmpf ogt, %647, %648 : vector<8x128xf32>
    %cst_295 = arith.constant 1.000000e+00 : f32
    %cst_296 = arith.constant 0.000000e+00 : f32
    %650 = vector.broadcast %cst_295 : f32 to vector<8x128xf32>
    %651 = vector.broadcast %cst_296 : f32 to vector<8x128xf32>
    %652 = arith.select %649, %650, %651 : vector<8x128xi1>, vector<8x128xf32>
    %653 = vector.shape_cast %618 : vector<8x128xf32> to vector<1x8x128xf32>
    %654 = vector.shape_cast %635 : vector<8x128xf32> to vector<1x8x128xf32>
    %655 = vector.shape_cast %652 : vector<8x128xf32> to vector<1x8x128xf32>
    %656 = vector.shape_cast %613 : vector<8x128xf32> to vector<1x8x128xf32>
    %657 = vector.shape_cast %630 : vector<8x128xf32> to vector<1x8x128xf32>
    %658 = vector.shape_cast %647 : vector<8x128xf32> to vector<1x8x128xf32>
    %659 = tpu.concatenate %653, %654, %655, %656, %657, %658 in 0 : vector<1x8x128xf32>, vector<1x8x128xf32>, vector<1x8x128xf32>, vector<1x8x128xf32>, vector<1x8x128xf32>, vector<1x8x128xf32> -> vector<6x8x128xf32>
    %660 = arith.index_cast %c10_i32 : i32 to index
    %c0_297 = arith.constant 0 : index
    %c0_298 = arith.constant 0 : index
    %c0_299 = arith.constant 0 : index
    %661 = vector.load %arg8[%660, %c0_297, %c0_298, %c0_299] : memref<16x6x8x128xf32, #tpu.memory_space<vmem>>, vector<1x6x8x128xf32>
    %662 = vector.shape_cast %661 : vector<1x6x8x128xf32> to vector<6x8x128xf32>
    %663 = vector.shape_cast %659 : vector<6x8x128xf32> to vector<1x6x8x128xf32>
    tpu.vector_store %arg8[%660, %c0_297, %c0_298, %c0_299], %663 {strides = array<i32>} : memref<16x6x8x128xf32, #tpu.memory_space<vmem>>, vector<1x6x8x128xf32>,
    %c11_i32 = arith.constant 11 : i32
    %cst_300 = arith.constant 0.949999988 : f32
    %664 = vector.broadcast %cst_300 : f32 to vector<8x128xf32>
    %665 = arith.mulf %664, %613 : vector<8x128xf32>
    %666 = arith.addf %665, %7 : vector<8x128xf32>
    %cst_301 = arith.constant 1.000000e+00 : f32
    %667 = vector.broadcast %cst_301 : f32 to vector<8x128xf32>
    %668 = arith.cmpf ogt, %613, %667 : vector<8x128xf32>
    %cst_302 = arith.constant 1.000000e+00 : f32
    %cst_303 = arith.constant 0.000000e+00 : f32
    %669 = vector.broadcast %cst_302 : f32 to vector<8x128xf32>
    %670 = vector.broadcast %cst_303 : f32 to vector<8x128xf32>
    %671 = arith.select %668, %669, %670 : vector<8x128xi1>, vector<8x128xf32>
    %672 = arith.subf %666, %671 : vector<8x128xf32>
    %cst_304 = arith.constant 1.000000e+00 : f32
    %673 = vector.broadcast %cst_304 : f32 to vector<8x128xf32>
    %674 = arith.cmpf ogt, %672, %673 : vector<8x128xf32>
    %cst_305 = arith.constant 1.000000e+00 : f32
    %cst_306 = arith.constant 0.000000e+00 : f32
    %675 = vector.broadcast %cst_305 : f32 to vector<8x128xf32>
    %676 = vector.broadcast %cst_306 : f32 to vector<8x128xf32>
    %677 = arith.select %674, %675, %676 : vector<8x128xi1>, vector<8x128xf32>
    %678 = arith.truncf %677 : vector<8x128xf32> to vector<8x128xbf16>
    %cst_307 = arith.constant dense<0.000000e+00> : vector<8x128xf32>
    %679 = tpu.matmul %678, %0, %cst_307 {dimension_numbers = #tpu.dot_dimension_numbers<[1], [0], [0], [1], [0, 0, 1, 1], [], []>} : vector<8x128xbf16>, vector<128x128xbf16>, vector<8x128xf32> -> vector<8x128xf32>
    %680 = arith.addf %679, %10 : vector<8x128xf32>
    %cst_308 = arith.constant 0.949999988 : f32
    %681 = vector.broadcast %cst_308 : f32 to vector<8x128xf32>
    %682 = arith.mulf %681, %630 : vector<8x128xf32>
    %683 = arith.addf %682, %680 : vector<8x128xf32>
    %cst_309 = arith.constant 1.000000e+00 : f32
    %684 = vector.broadcast %cst_309 : f32 to vector<8x128xf32>
    %685 = arith.cmpf ogt, %630, %684 : vector<8x128xf32>
    %cst_310 = arith.constant 1.000000e+00 : f32
    %cst_311 = arith.constant 0.000000e+00 : f32
    %686 = vector.broadcast %cst_310 : f32 to vector<8x128xf32>
    %687 = vector.broadcast %cst_311 : f32 to vector<8x128xf32>
    %688 = arith.select %685, %686, %687 : vector<8x128xi1>, vector<8x128xf32>
    %689 = arith.subf %683, %688 : vector<8x128xf32>
    %cst_312 = arith.constant 1.000000e+00 : f32
    %690 = vector.broadcast %cst_312 : f32 to vector<8x128xf32>
    %691 = arith.cmpf ogt, %689, %690 : vector<8x128xf32>
    %cst_313 = arith.constant 1.000000e+00 : f32
    %cst_314 = arith.constant 0.000000e+00 : f32
    %692 = vector.broadcast %cst_313 : f32 to vector<8x128xf32>
    %693 = vector.broadcast %cst_314 : f32 to vector<8x128xf32>
    %694 = arith.select %691, %692, %693 : vector<8x128xi1>, vector<8x128xf32>
    %695 = arith.truncf %694 : vector<8x128xf32> to vector<8x128xbf16>
    %cst_315 = arith.constant dense<0.000000e+00> : vector<8x128xf32>
    %696 = tpu.matmul %695, %1, %cst_315 {dimension_numbers = #tpu.dot_dimension_numbers<[1], [0], [0], [1], [0, 0, 1, 1], [], []>} : vector<8x128xbf16>, vector<128x128xbf16>, vector<8x128xf32> -> vector<8x128xf32>
    %697 = arith.addf %696, %13 : vector<8x128xf32>
    %cst_316 = arith.constant 0.949999988 : f32
    %698 = vector.broadcast %cst_316 : f32 to vector<8x128xf32>
    %699 = arith.mulf %698, %647 : vector<8x128xf32>
    %700 = arith.addf %699, %697 : vector<8x128xf32>
    %cst_317 = arith.constant 1.000000e+00 : f32
    %701 = vector.broadcast %cst_317 : f32 to vector<8x128xf32>
    %702 = arith.cmpf ogt, %647, %701 : vector<8x128xf32>
    %cst_318 = arith.constant 1.000000e+00 : f32
    %cst_319 = arith.constant 0.000000e+00 : f32
    %703 = vector.broadcast %cst_318 : f32 to vector<8x128xf32>
    %704 = vector.broadcast %cst_319 : f32 to vector<8x128xf32>
    %705 = arith.select %702, %703, %704 : vector<8x128xi1>, vector<8x128xf32>
    %706 = arith.subf %700, %705 : vector<8x128xf32>
    %cst_320 = arith.constant 1.000000e+00 : f32
    %707 = vector.broadcast %cst_320 : f32 to vector<8x128xf32>
    %708 = arith.cmpf ogt, %706, %707 : vector<8x128xf32>
    %cst_321 = arith.constant 1.000000e+00 : f32
    %cst_322 = arith.constant 0.000000e+00 : f32
    %709 = vector.broadcast %cst_321 : f32 to vector<8x128xf32>
    %710 = vector.broadcast %cst_322 : f32 to vector<8x128xf32>
    %711 = arith.select %708, %709, %710 : vector<8x128xi1>, vector<8x128xf32>
    %712 = vector.shape_cast %677 : vector<8x128xf32> to vector<1x8x128xf32>
    %713 = vector.shape_cast %694 : vector<8x128xf32> to vector<1x8x128xf32>
    %714 = vector.shape_cast %711 : vector<8x128xf32> to vector<1x8x128xf32>
    %715 = vector.shape_cast %672 : vector<8x128xf32> to vector<1x8x128xf32>
    %716 = vector.shape_cast %689 : vector<8x128xf32> to vector<1x8x128xf32>
    %717 = vector.shape_cast %706 : vector<8x128xf32> to vector<1x8x128xf32>
    %718 = tpu.concatenate %712, %713, %714, %715, %716, %717 in 0 : vector<1x8x128xf32>, vector<1x8x128xf32>, vector<1x8x128xf32>, vector<1x8x128xf32>, vector<1x8x128xf32>, vector<1x8x128xf32> -> vector<6x8x128xf32>
    %719 = arith.index_cast %c11_i32 : i32 to index
    %c0_323 = arith.constant 0 : index
    %c0_324 = arith.constant 0 : index
    %c0_325 = arith.constant 0 : index
    %720 = vector.load %arg8[%719, %c0_323, %c0_324, %c0_325] : memref<16x6x8x128xf32, #tpu.memory_space<vmem>>, vector<1x6x8x128xf32>
    %721 = vector.shape_cast %720 : vector<1x6x8x128xf32> to vector<6x8x128xf32>
    %722 = vector.shape_cast %718 : vector<6x8x128xf32> to vector<1x6x8x128xf32>
    tpu.vector_store %arg8[%719, %c0_323, %c0_324, %c0_325], %722 {strides = array<i32>} : memref<16x6x8x128xf32, #tpu.memory_space<vmem>>, vector<1x6x8x128xf32>,
    %c12_i32 = arith.constant 12 : i32
    %cst_326 = arith.constant 0.949999988 : f32
    %723 = vector.broadcast %cst_326 : f32 to vector<8x128xf32>
    %724 = arith.mulf %723, %672 : vector<8x128xf32>
    %725 = arith.addf %724, %7 : vector<8x128xf32>
    %cst_327 = arith.constant 1.000000e+00 : f32
    %726 = vector.broadcast %cst_327 : f32 to vector<8x128xf32>
    %727 = arith.cmpf ogt, %672, %726 : vector<8x128xf32>
    %cst_328 = arith.constant 1.000000e+00 : f32
    %cst_329 = arith.constant 0.000000e+00 : f32
    %728 = vector.broadcast %cst_328 : f32 to vector<8x128xf32>
    %729 = vector.broadcast %cst_329 : f32 to vector<8x128xf32>
    %730 = arith.select %727, %728, %729 : vector<8x128xi1>, vector<8x128xf32>
    %731 = arith.subf %725, %730 : vector<8x128xf32>
    %cst_330 = arith.constant 1.000000e+00 : f32
    %732 = vector.broadcast %cst_330 : f32 to vector<8x128xf32>
    %733 = arith.cmpf ogt, %731, %732 : vector<8x128xf32>
    %cst_331 = arith.constant 1.000000e+00 : f32
    %cst_332 = arith.constant 0.000000e+00 : f32
    %734 = vector.broadcast %cst_331 : f32 to vector<8x128xf32>
    %735 = vector.broadcast %cst_332 : f32 to vector<8x128xf32>
    %736 = arith.select %733, %734, %735 : vector<8x128xi1>, vector<8x128xf32>
    %737 = arith.truncf %736 : vector<8x128xf32> to vector<8x128xbf16>
    %cst_333 = arith.constant dense<0.000000e+00> : vector<8x128xf32>
    %738 = tpu.matmul %737, %0, %cst_333 {dimension_numbers = #tpu.dot_dimension_numbers<[1], [0], [0], [1], [0, 0, 1, 1], [], []>} : vector<8x128xbf16>, vector<128x128xbf16>, vector<8x128xf32> -> vector<8x128xf32>
    %739 = arith.addf %738, %10 : vector<8x128xf32>
    %cst_334 = arith.constant 0.949999988 : f32
    %740 = vector.broadcast %cst_334 : f32 to vector<8x128xf32>
    %741 = arith.mulf %740, %689 : vector<8x128xf32>
    %742 = arith.addf %741, %739 : vector<8x128xf32>
    %cst_335 = arith.constant 1.000000e+00 : f32
    %743 = vector.broadcast %cst_335 : f32 to vector<8x128xf32>
    %744 = arith.cmpf ogt, %689, %743 : vector<8x128xf32>
    %cst_336 = arith.constant 1.000000e+00 : f32
    %cst_337 = arith.constant 0.000000e+00 : f32
    %745 = vector.broadcast %cst_336 : f32 to vector<8x128xf32>
    %746 = vector.broadcast %cst_337 : f32 to vector<8x128xf32>
    %747 = arith.select %744, %745, %746 : vector<8x128xi1>, vector<8x128xf32>
    %748 = arith.subf %742, %747 : vector<8x128xf32>
    %cst_338 = arith.constant 1.000000e+00 : f32
    %749 = vector.broadcast %cst_338 : f32 to vector<8x128xf32>
    %750 = arith.cmpf ogt, %748, %749 : vector<8x128xf32>
    %cst_339 = arith.constant 1.000000e+00 : f32
    %cst_340 = arith.constant 0.000000e+00 : f32
    %751 = vector.broadcast %cst_339 : f32 to vector<8x128xf32>
    %752 = vector.broadcast %cst_340 : f32 to vector<8x128xf32>
    %753 = arith.select %750, %751, %752 : vector<8x128xi1>, vector<8x128xf32>
    %754 = arith.truncf %753 : vector<8x128xf32> to vector<8x128xbf16>
    %cst_341 = arith.constant dense<0.000000e+00> : vector<8x128xf32>
    %755 = tpu.matmul %754, %1, %cst_341 {dimension_numbers = #tpu.dot_dimension_numbers<[1], [0], [0], [1], [0, 0, 1, 1], [], []>} : vector<8x128xbf16>, vector<128x128xbf16>, vector<8x128xf32> -> vector<8x128xf32>
    %756 = arith.addf %755, %13 : vector<8x128xf32>
    %cst_342 = arith.constant 0.949999988 : f32
    %757 = vector.broadcast %cst_342 : f32 to vector<8x128xf32>
    %758 = arith.mulf %757, %706 : vector<8x128xf32>
    %759 = arith.addf %758, %756 : vector<8x128xf32>
    %cst_343 = arith.constant 1.000000e+00 : f32
    %760 = vector.broadcast %cst_343 : f32 to vector<8x128xf32>
    %761 = arith.cmpf ogt, %706, %760 : vector<8x128xf32>
    %cst_344 = arith.constant 1.000000e+00 : f32
    %cst_345 = arith.constant 0.000000e+00 : f32
    %762 = vector.broadcast %cst_344 : f32 to vector<8x128xf32>
    %763 = vector.broadcast %cst_345 : f32 to vector<8x128xf32>
    %764 = arith.select %761, %762, %763 : vector<8x128xi1>, vector<8x128xf32>
    %765 = arith.subf %759, %764 : vector<8x128xf32>
    %cst_346 = arith.constant 1.000000e+00 : f32
    %766 = vector.broadcast %cst_346 : f32 to vector<8x128xf32>
    %767 = arith.cmpf ogt, %765, %766 : vector<8x128xf32>
    %cst_347 = arith.constant 1.000000e+00 : f32
    %cst_348 = arith.constant 0.000000e+00 : f32
    %768 = vector.broadcast %cst_347 : f32 to vector<8x128xf32>
    %769 = vector.broadcast %cst_348 : f32 to vector<8x128xf32>
    %770 = arith.select %767, %768, %769 : vector<8x128xi1>, vector<8x128xf32>
    %771 = vector.shape_cast %736 : vector<8x128xf32> to vector<1x8x128xf32>
    %772 = vector.shape_cast %753 : vector<8x128xf32> to vector<1x8x128xf32>
    %773 = vector.shape_cast %770 : vector<8x128xf32> to vector<1x8x128xf32>
    %774 = vector.shape_cast %731 : vector<8x128xf32> to vector<1x8x128xf32>
    %775 = vector.shape_cast %748 : vector<8x128xf32> to vector<1x8x128xf32>
    %776 = vector.shape_cast %765 : vector<8x128xf32> to vector<1x8x128xf32>
    %777 = tpu.concatenate %771, %772, %773, %774, %775, %776 in 0 : vector<1x8x128xf32>, vector<1x8x128xf32>, vector<1x8x128xf32>, vector<1x8x128xf32>, vector<1x8x128xf32>, vector<1x8x128xf32> -> vector<6x8x128xf32>
    %778 = arith.index_cast %c12_i32 : i32 to index
    %c0_349 = arith.constant 0 : index
    %c0_350 = arith.constant 0 : index
    %c0_351 = arith.constant 0 : index
    %779 = vector.load %arg8[%778, %c0_349, %c0_350, %c0_351] : memref<16x6x8x128xf32, #tpu.memory_space<vmem>>, vector<1x6x8x128xf32>
    %780 = vector.shape_cast %779 : vector<1x6x8x128xf32> to vector<6x8x128xf32>
    %781 = vector.shape_cast %777 : vector<6x8x128xf32> to vector<1x6x8x128xf32>
    tpu.vector_store %arg8[%778, %c0_349, %c0_350, %c0_351], %781 {strides = array<i32>} : memref<16x6x8x128xf32, #tpu.memory_space<vmem>>, vector<1x6x8x128xf32>,
    %c13_i32 = arith.constant 13 : i32
    %cst_352 = arith.constant 0.949999988 : f32
    %782 = vector.broadcast %cst_352 : f32 to vector<8x128xf32>
    %783 = arith.mulf %782, %731 : vector<8x128xf32>
    %784 = arith.addf %783, %7 : vector<8x128xf32>
    %cst_353 = arith.constant 1.000000e+00 : f32
    %785 = vector.broadcast %cst_353 : f32 to vector<8x128xf32>
    %786 = arith.cmpf ogt, %731, %785 : vector<8x128xf32>
    %cst_354 = arith.constant 1.000000e+00 : f32
    %cst_355 = arith.constant 0.000000e+00 : f32
    %787 = vector.broadcast %cst_354 : f32 to vector<8x128xf32>
    %788 = vector.broadcast %cst_355 : f32 to vector<8x128xf32>
    %789 = arith.select %786, %787, %788 : vector<8x128xi1>, vector<8x128xf32>
    %790 = arith.subf %784, %789 : vector<8x128xf32>
    %cst_356 = arith.constant 1.000000e+00 : f32
    %791 = vector.broadcast %cst_356 : f32 to vector<8x128xf32>
    %792 = arith.cmpf ogt, %790, %791 : vector<8x128xf32>
    %cst_357 = arith.constant 1.000000e+00 : f32
    %cst_358 = arith.constant 0.000000e+00 : f32
    %793 = vector.broadcast %cst_357 : f32 to vector<8x128xf32>
    %794 = vector.broadcast %cst_358 : f32 to vector<8x128xf32>
    %795 = arith.select %792, %793, %794 : vector<8x128xi1>, vector<8x128xf32>
    %796 = arith.truncf %795 : vector<8x128xf32> to vector<8x128xbf16>
    %cst_359 = arith.constant dense<0.000000e+00> : vector<8x128xf32>
    %797 = tpu.matmul %796, %0, %cst_359 {dimension_numbers = #tpu.dot_dimension_numbers<[1], [0], [0], [1], [0, 0, 1, 1], [], []>} : vector<8x128xbf16>, vector<128x128xbf16>, vector<8x128xf32> -> vector<8x128xf32>
    %798 = arith.addf %797, %10 : vector<8x128xf32>
    %cst_360 = arith.constant 0.949999988 : f32
    %799 = vector.broadcast %cst_360 : f32 to vector<8x128xf32>
    %800 = arith.mulf %799, %748 : vector<8x128xf32>
    %801 = arith.addf %800, %798 : vector<8x128xf32>
    %cst_361 = arith.constant 1.000000e+00 : f32
    %802 = vector.broadcast %cst_361 : f32 to vector<8x128xf32>
    %803 = arith.cmpf ogt, %748, %802 : vector<8x128xf32>
    %cst_362 = arith.constant 1.000000e+00 : f32
    %cst_363 = arith.constant 0.000000e+00 : f32
    %804 = vector.broadcast %cst_362 : f32 to vector<8x128xf32>
    %805 = vector.broadcast %cst_363 : f32 to vector<8x128xf32>
    %806 = arith.select %803, %804, %805 : vector<8x128xi1>, vector<8x128xf32>
    %807 = arith.subf %801, %806 : vector<8x128xf32>
    %cst_364 = arith.constant 1.000000e+00 : f32
    %808 = vector.broadcast %cst_364 : f32 to vector<8x128xf32>
    %809 = arith.cmpf ogt, %807, %808 : vector<8x128xf32>
    %cst_365 = arith.constant 1.000000e+00 : f32
    %cst_366 = arith.constant 0.000000e+00 : f32
    %810 = vector.broadcast %cst_365 : f32 to vector<8x128xf32>
    %811 = vector.broadcast %cst_366 : f32 to vector<8x128xf32>
    %812 = arith.select %809, %810, %811 : vector<8x128xi1>, vector<8x128xf32>
    %813 = arith.truncf %812 : vector<8x128xf32> to vector<8x128xbf16>
    %cst_367 = arith.constant dense<0.000000e+00> : vector<8x128xf32>
    %814 = tpu.matmul %813, %1, %cst_367 {dimension_numbers = #tpu.dot_dimension_numbers<[1], [0], [0], [1], [0, 0, 1, 1], [], []>} : vector<8x128xbf16>, vector<128x128xbf16>, vector<8x128xf32> -> vector<8x128xf32>
    %815 = arith.addf %814, %13 : vector<8x128xf32>
    %cst_368 = arith.constant 0.949999988 : f32
    %816 = vector.broadcast %cst_368 : f32 to vector<8x128xf32>
    %817 = arith.mulf %816, %765 : vector<8x128xf32>
    %818 = arith.addf %817, %815 : vector<8x128xf32>
    %cst_369 = arith.constant 1.000000e+00 : f32
    %819 = vector.broadcast %cst_369 : f32 to vector<8x128xf32>
    %820 = arith.cmpf ogt, %765, %819 : vector<8x128xf32>
    %cst_370 = arith.constant 1.000000e+00 : f32
    %cst_371 = arith.constant 0.000000e+00 : f32
    %821 = vector.broadcast %cst_370 : f32 to vector<8x128xf32>
    %822 = vector.broadcast %cst_371 : f32 to vector<8x128xf32>
    %823 = arith.select %820, %821, %822 : vector<8x128xi1>, vector<8x128xf32>
    %824 = arith.subf %818, %823 : vector<8x128xf32>
    %cst_372 = arith.constant 1.000000e+00 : f32
    %825 = vector.broadcast %cst_372 : f32 to vector<8x128xf32>
    %826 = arith.cmpf ogt, %824, %825 : vector<8x128xf32>
    %cst_373 = arith.constant 1.000000e+00 : f32
    %cst_374 = arith.constant 0.000000e+00 : f32
    %827 = vector.broadcast %cst_373 : f32 to vector<8x128xf32>
    %828 = vector.broadcast %cst_374 : f32 to vector<8x128xf32>
    %829 = arith.select %826, %827, %828 : vector<8x128xi1>, vector<8x128xf32>
    %830 = vector.shape_cast %795 : vector<8x128xf32> to vector<1x8x128xf32>
    %831 = vector.shape_cast %812 : vector<8x128xf32> to vector<1x8x128xf32>
    %832 = vector.shape_cast %829 : vector<8x128xf32> to vector<1x8x128xf32>
    %833 = vector.shape_cast %790 : vector<8x128xf32> to vector<1x8x128xf32>
    %834 = vector.shape_cast %807 : vector<8x128xf32> to vector<1x8x128xf32>
    %835 = vector.shape_cast %824 : vector<8x128xf32> to vector<1x8x128xf32>
    %836 = tpu.concatenate %830, %831, %832, %833, %834, %835 in 0 : vector<1x8x128xf32>, vector<1x8x128xf32>, vector<1x8x128xf32>, vector<1x8x128xf32>, vector<1x8x128xf32>, vector<1x8x128xf32> -> vector<6x8x128xf32>
    %837 = arith.index_cast %c13_i32 : i32 to index
    %c0_375 = arith.constant 0 : index
    %c0_376 = arith.constant 0 : index
    %c0_377 = arith.constant 0 : index
    %838 = vector.load %arg8[%837, %c0_375, %c0_376, %c0_377] : memref<16x6x8x128xf32, #tpu.memory_space<vmem>>, vector<1x6x8x128xf32>
    %839 = vector.shape_cast %838 : vector<1x6x8x128xf32> to vector<6x8x128xf32>
    %840 = vector.shape_cast %836 : vector<6x8x128xf32> to vector<1x6x8x128xf32>
    tpu.vector_store %arg8[%837, %c0_375, %c0_376, %c0_377], %840 {strides = array<i32>} : memref<16x6x8x128xf32, #tpu.memory_space<vmem>>, vector<1x6x8x128xf32>,
    %c14_i32 = arith.constant 14 : i32
    %cst_378 = arith.constant 0.949999988 : f32
    %841 = vector.broadcast %cst_378 : f32 to vector<8x128xf32>
    %842 = arith.mulf %841, %790 : vector<8x128xf32>
    %843 = arith.addf %842, %7 : vector<8x128xf32>
    %cst_379 = arith.constant 1.000000e+00 : f32
    %844 = vector.broadcast %cst_379 : f32 to vector<8x128xf32>
    %845 = arith.cmpf ogt, %790, %844 : vector<8x128xf32>
    %cst_380 = arith.constant 1.000000e+00 : f32
    %cst_381 = arith.constant 0.000000e+00 : f32
    %846 = vector.broadcast %cst_380 : f32 to vector<8x128xf32>
    %847 = vector.broadcast %cst_381 : f32 to vector<8x128xf32>
    %848 = arith.select %845, %846, %847 : vector<8x128xi1>, vector<8x128xf32>
    %849 = arith.subf %843, %848 : vector<8x128xf32>
    %cst_382 = arith.constant 1.000000e+00 : f32
    %850 = vector.broadcast %cst_382 : f32 to vector<8x128xf32>
    %851 = arith.cmpf ogt, %849, %850 : vector<8x128xf32>
    %cst_383 = arith.constant 1.000000e+00 : f32
    %cst_384 = arith.constant 0.000000e+00 : f32
    %852 = vector.broadcast %cst_383 : f32 to vector<8x128xf32>
    %853 = vector.broadcast %cst_384 : f32 to vector<8x128xf32>
    %854 = arith.select %851, %852, %853 : vector<8x128xi1>, vector<8x128xf32>
    %855 = arith.truncf %854 : vector<8x128xf32> to vector<8x128xbf16>
    %cst_385 = arith.constant dense<0.000000e+00> : vector<8x128xf32>
    %856 = tpu.matmul %855, %0, %cst_385 {dimension_numbers = #tpu.dot_dimension_numbers<[1], [0], [0], [1], [0, 0, 1, 1], [], []>} : vector<8x128xbf16>, vector<128x128xbf16>, vector<8x128xf32> -> vector<8x128xf32>
    %857 = arith.addf %856, %10 : vector<8x128xf32>
    %cst_386 = arith.constant 0.949999988 : f32
    %858 = vector.broadcast %cst_386 : f32 to vector<8x128xf32>
    %859 = arith.mulf %858, %807 : vector<8x128xf32>
    %860 = arith.addf %859, %857 : vector<8x128xf32>
    %cst_387 = arith.constant 1.000000e+00 : f32
    %861 = vector.broadcast %cst_387 : f32 to vector<8x128xf32>
    %862 = arith.cmpf ogt, %807, %861 : vector<8x128xf32>
    %cst_388 = arith.constant 1.000000e+00 : f32
    %cst_389 = arith.constant 0.000000e+00 : f32
    %863 = vector.broadcast %cst_388 : f32 to vector<8x128xf32>
    %864 = vector.broadcast %cst_389 : f32 to vector<8x128xf32>
    %865 = arith.select %862, %863, %864 : vector<8x128xi1>, vector<8x128xf32>
    %866 = arith.subf %860, %865 : vector<8x128xf32>
    %cst_390 = arith.constant 1.000000e+00 : f32
    %867 = vector.broadcast %cst_390 : f32 to vector<8x128xf32>
    %868 = arith.cmpf ogt, %866, %867 : vector<8x128xf32>
    %cst_391 = arith.constant 1.000000e+00 : f32
    %cst_392 = arith.constant 0.000000e+00 : f32
    %869 = vector.broadcast %cst_391 : f32 to vector<8x128xf32>
    %870 = vector.broadcast %cst_392 : f32 to vector<8x128xf32>
    %871 = arith.select %868, %869, %870 : vector<8x128xi1>, vector<8x128xf32>
    %872 = arith.truncf %871 : vector<8x128xf32> to vector<8x128xbf16>
    %cst_393 = arith.constant dense<0.000000e+00> : vector<8x128xf32>
    %873 = tpu.matmul %872, %1, %cst_393 {dimension_numbers = #tpu.dot_dimension_numbers<[1], [0], [0], [1], [0, 0, 1, 1], [], []>} : vector<8x128xbf16>, vector<128x128xbf16>, vector<8x128xf32> -> vector<8x128xf32>
    %874 = arith.addf %873, %13 : vector<8x128xf32>
    %cst_394 = arith.constant 0.949999988 : f32
    %875 = vector.broadcast %cst_394 : f32 to vector<8x128xf32>
    %876 = arith.mulf %875, %824 : vector<8x128xf32>
    %877 = arith.addf %876, %874 : vector<8x128xf32>
    %cst_395 = arith.constant 1.000000e+00 : f32
    %878 = vector.broadcast %cst_395 : f32 to vector<8x128xf32>
    %879 = arith.cmpf ogt, %824, %878 : vector<8x128xf32>
    %cst_396 = arith.constant 1.000000e+00 : f32
    %cst_397 = arith.constant 0.000000e+00 : f32
    %880 = vector.broadcast %cst_396 : f32 to vector<8x128xf32>
    %881 = vector.broadcast %cst_397 : f32 to vector<8x128xf32>
    %882 = arith.select %879, %880, %881 : vector<8x128xi1>, vector<8x128xf32>
    %883 = arith.subf %877, %882 : vector<8x128xf32>
    %cst_398 = arith.constant 1.000000e+00 : f32
    %884 = vector.broadcast %cst_398 : f32 to vector<8x128xf32>
    %885 = arith.cmpf ogt, %883, %884 : vector<8x128xf32>
    %cst_399 = arith.constant 1.000000e+00 : f32
    %cst_400 = arith.constant 0.000000e+00 : f32
    %886 = vector.broadcast %cst_399 : f32 to vector<8x128xf32>
    %887 = vector.broadcast %cst_400 : f32 to vector<8x128xf32>
    %888 = arith.select %885, %886, %887 : vector<8x128xi1>, vector<8x128xf32>
    %889 = vector.shape_cast %854 : vector<8x128xf32> to vector<1x8x128xf32>
    %890 = vector.shape_cast %871 : vector<8x128xf32> to vector<1x8x128xf32>
    %891 = vector.shape_cast %888 : vector<8x128xf32> to vector<1x8x128xf32>
    %892 = vector.shape_cast %849 : vector<8x128xf32> to vector<1x8x128xf32>
    %893 = vector.shape_cast %866 : vector<8x128xf32> to vector<1x8x128xf32>
    %894 = vector.shape_cast %883 : vector<8x128xf32> to vector<1x8x128xf32>
    %895 = tpu.concatenate %889, %890, %891, %892, %893, %894 in 0 : vector<1x8x128xf32>, vector<1x8x128xf32>, vector<1x8x128xf32>, vector<1x8x128xf32>, vector<1x8x128xf32>, vector<1x8x128xf32> -> vector<6x8x128xf32>
    %896 = arith.index_cast %c14_i32 : i32 to index
    %c0_401 = arith.constant 0 : index
    %c0_402 = arith.constant 0 : index
    %c0_403 = arith.constant 0 : index
    %897 = vector.load %arg8[%896, %c0_401, %c0_402, %c0_403] : memref<16x6x8x128xf32, #tpu.memory_space<vmem>>, vector<1x6x8x128xf32>
    %898 = vector.shape_cast %897 : vector<1x6x8x128xf32> to vector<6x8x128xf32>
    %899 = vector.shape_cast %895 : vector<6x8x128xf32> to vector<1x6x8x128xf32>
    tpu.vector_store %arg8[%896, %c0_401, %c0_402, %c0_403], %899 {strides = array<i32>} : memref<16x6x8x128xf32, #tpu.memory_space<vmem>>, vector<1x6x8x128xf32>,
    %c15_i32 = arith.constant 15 : i32
    %cst_404 = arith.constant 0.949999988 : f32
    %900 = vector.broadcast %cst_404 : f32 to vector<8x128xf32>
    %901 = arith.mulf %900, %849 : vector<8x128xf32>
    %902 = arith.addf %901, %7 : vector<8x128xf32>
    %cst_405 = arith.constant 1.000000e+00 : f32
    %903 = vector.broadcast %cst_405 : f32 to vector<8x128xf32>
    %904 = arith.cmpf ogt, %849, %903 : vector<8x128xf32>
    %cst_406 = arith.constant 1.000000e+00 : f32
    %cst_407 = arith.constant 0.000000e+00 : f32
    %905 = vector.broadcast %cst_406 : f32 to vector<8x128xf32>
    %906 = vector.broadcast %cst_407 : f32 to vector<8x128xf32>
    %907 = arith.select %904, %905, %906 : vector<8x128xi1>, vector<8x128xf32>
    %908 = arith.subf %902, %907 : vector<8x128xf32>
    %cst_408 = arith.constant 1.000000e+00 : f32
    %909 = vector.broadcast %cst_408 : f32 to vector<8x128xf32>
    %910 = arith.cmpf ogt, %908, %909 : vector<8x128xf32>
    %cst_409 = arith.constant 1.000000e+00 : f32
    %cst_410 = arith.constant 0.000000e+00 : f32
    %911 = vector.broadcast %cst_409 : f32 to vector<8x128xf32>
    %912 = vector.broadcast %cst_410 : f32 to vector<8x128xf32>
    %913 = arith.select %910, %911, %912 : vector<8x128xi1>, vector<8x128xf32>
    %914 = arith.truncf %913 : vector<8x128xf32> to vector<8x128xbf16>
    %cst_411 = arith.constant dense<0.000000e+00> : vector<8x128xf32>
    %915 = tpu.matmul %914, %0, %cst_411 {dimension_numbers = #tpu.dot_dimension_numbers<[1], [0], [0], [1], [0, 0, 1, 1], [], []>} : vector<8x128xbf16>, vector<128x128xbf16>, vector<8x128xf32> -> vector<8x128xf32>
    %916 = arith.addf %915, %10 : vector<8x128xf32>
    %cst_412 = arith.constant 0.949999988 : f32
    %917 = vector.broadcast %cst_412 : f32 to vector<8x128xf32>
    %918 = arith.mulf %917, %866 : vector<8x128xf32>
    %919 = arith.addf %918, %916 : vector<8x128xf32>
    %cst_413 = arith.constant 1.000000e+00 : f32
    %920 = vector.broadcast %cst_413 : f32 to vector<8x128xf32>
    %921 = arith.cmpf ogt, %866, %920 : vector<8x128xf32>
    %cst_414 = arith.constant 1.000000e+00 : f32
    %cst_415 = arith.constant 0.000000e+00 : f32
    %922 = vector.broadcast %cst_414 : f32 to vector<8x128xf32>
    %923 = vector.broadcast %cst_415 : f32 to vector<8x128xf32>
    %924 = arith.select %921, %922, %923 : vector<8x128xi1>, vector<8x128xf32>
    %925 = arith.subf %919, %924 : vector<8x128xf32>
    %cst_416 = arith.constant 1.000000e+00 : f32
    %926 = vector.broadcast %cst_416 : f32 to vector<8x128xf32>
    %927 = arith.cmpf ogt, %925, %926 : vector<8x128xf32>
    %cst_417 = arith.constant 1.000000e+00 : f32
    %cst_418 = arith.constant 0.000000e+00 : f32
    %928 = vector.broadcast %cst_417 : f32 to vector<8x128xf32>
    %929 = vector.broadcast %cst_418 : f32 to vector<8x128xf32>
    %930 = arith.select %927, %928, %929 : vector<8x128xi1>, vector<8x128xf32>
    %931 = arith.truncf %930 : vector<8x128xf32> to vector<8x128xbf16>
    %cst_419 = arith.constant dense<0.000000e+00> : vector<8x128xf32>
    %932 = tpu.matmul %931, %1, %cst_419 {dimension_numbers = #tpu.dot_dimension_numbers<[1], [0], [0], [1], [0, 0, 1, 1], [], []>} : vector<8x128xbf16>, vector<128x128xbf16>, vector<8x128xf32> -> vector<8x128xf32>
    %933 = arith.addf %932, %13 : vector<8x128xf32>
    %cst_420 = arith.constant 0.949999988 : f32
    %934 = vector.broadcast %cst_420 : f32 to vector<8x128xf32>
    %935 = arith.mulf %934, %883 : vector<8x128xf32>
    %936 = arith.addf %935, %933 : vector<8x128xf32>
    %cst_421 = arith.constant 1.000000e+00 : f32
    %937 = vector.broadcast %cst_421 : f32 to vector<8x128xf32>
    %938 = arith.cmpf ogt, %883, %937 : vector<8x128xf32>
    %cst_422 = arith.constant 1.000000e+00 : f32
    %cst_423 = arith.constant 0.000000e+00 : f32
    %939 = vector.broadcast %cst_422 : f32 to vector<8x128xf32>
    %940 = vector.broadcast %cst_423 : f32 to vector<8x128xf32>
    %941 = arith.select %938, %939, %940 : vector<8x128xi1>, vector<8x128xf32>
    %942 = arith.subf %936, %941 : vector<8x128xf32>
    %cst_424 = arith.constant 1.000000e+00 : f32
    %943 = vector.broadcast %cst_424 : f32 to vector<8x128xf32>
    %944 = arith.cmpf ogt, %942, %943 : vector<8x128xf32>
    %cst_425 = arith.constant 1.000000e+00 : f32
    %cst_426 = arith.constant 0.000000e+00 : f32
    %945 = vector.broadcast %cst_425 : f32 to vector<8x128xf32>
    %946 = vector.broadcast %cst_426 : f32 to vector<8x128xf32>
    %947 = arith.select %944, %945, %946 : vector<8x128xi1>, vector<8x128xf32>
    %948 = vector.shape_cast %913 : vector<8x128xf32> to vector<1x8x128xf32>
    %949 = vector.shape_cast %930 : vector<8x128xf32> to vector<1x8x128xf32>
    %950 = vector.shape_cast %947 : vector<8x128xf32> to vector<1x8x128xf32>
    %951 = vector.shape_cast %908 : vector<8x128xf32> to vector<1x8x128xf32>
    %952 = vector.shape_cast %925 : vector<8x128xf32> to vector<1x8x128xf32>
    %953 = vector.shape_cast %942 : vector<8x128xf32> to vector<1x8x128xf32>
    %954 = tpu.concatenate %948, %949, %950, %951, %952, %953 in 0 : vector<1x8x128xf32>, vector<1x8x128xf32>, vector<1x8x128xf32>, vector<1x8x128xf32>, vector<1x8x128xf32>, vector<1x8x128xf32> -> vector<6x8x128xf32>
    %955 = arith.index_cast %c15_i32 : i32 to index
    %c0_427 = arith.constant 0 : index
    %c0_428 = arith.constant 0 : index
    %c0_429 = arith.constant 0 : index
    %956 = vector.load %arg8[%955, %c0_427, %c0_428, %c0_429] : memref<16x6x8x128xf32, #tpu.memory_space<vmem>>, vector<1x6x8x128xf32>
    %957 = vector.shape_cast %956 : vector<1x6x8x128xf32> to vector<6x8x128xf32>
    %958 = vector.shape_cast %954 : vector<6x8x128xf32> to vector<1x6x8x128xf32>
    tpu.vector_store %arg8[%955, %c0_427, %c0_428, %c0_429], %958 {strides = array<i32>} : memref<16x6x8x128xf32, #tpu.memory_space<vmem>>, vector<1x6x8x128xf32>,
    %c16_i32 = arith.constant 16 : i32
    return
  }
  func.func @transform_0(%arg0: i32) -> (i32, i32) {
    %c0_i32 = arith.constant 0 : i32
    %c0_i32_0 = arith.constant 0 : i32
    return %arg0, %c0_i32 : i32, i32
  }
  func.func @transform_1(%arg0: i32) -> (i32, i32) {
    %c0_i32 = arith.constant 0 : i32
    %c0_i32_0 = arith.constant 0 : i32
    %c0_i32_1 = arith.constant 0 : i32
    return %c0_i32, %c0_i32_0 : i32, i32
  }
  func.func @transform_2(%arg0: i32) -> (i32, i32) {
    %c0_i32 = arith.constant 0 : i32
    %c0_i32_0 = arith.constant 0 : i32
    %c0_i32_1 = arith.constant 0 : i32
    return %c0_i32, %c0_i32_0 : i32, i32
  }
  func.func @transform_3(%arg0: i32) -> (i32, i32) {
    %c0_i32 = arith.constant 0 : i32
    %c0_i32_0 = arith.constant 0 : i32
    %c0_i32_1 = arith.constant 0 : i32
    return %c0_i32, %c0_i32_0 : i32, i32
  }
  func.func @transform_4(%arg0: i32) -> (i32, i32) {
    %c0_i32 = arith.constant 0 : i32
    %c0_i32_0 = arith.constant 0 : i32
    %c0_i32_1 = arith.constant 0 : i32
    return %c0_i32, %c0_i32_0 : i32, i32
  }
  func.func @transform_5(%arg0: i32) -> (i32, i32) {
    %c0_i32 = arith.constant 0 : i32
    %c0_i32_0 = arith.constant 0 : i32
    %c0_i32_1 = arith.constant 0 : i32
    return %c0_i32, %c0_i32_0 : i32, i32
  }
  func.func @transform_6(%arg0: i32) -> (i32, i32) {
    %c0_i32 = arith.constant 0 : i32
    %c0_i32_0 = arith.constant 0 : i32
    %c0_i32_1 = arith.constant 0 : i32
    return %c0_i32, %c0_i32_0 : i32, i32
  }
  func.func @transform_7(%arg0: i32) -> (i32, i32, i32, i32) {
    %c0_i32 = arith.constant 0 : i32
    %c0_i32_0 = arith.constant 0 : i32
    %c0_i32_1 = arith.constant 0 : i32
    %c0_i32_2 = arith.constant 0 : i32
    return %c0_i32, %c0_i32_0, %arg0, %c0_i32_1 : i32, i32, i32, i32
  }
}

</mosaic_0001>

<bundles_post_ra>
// kernel: tpu_custom_call.1
= control target key start
LH: loop header
LB: loop body
LE: loop exit
PB: predicated region body
PF: predicated region fallthrough
CT: control target
= control target key end

     0   :  { %12 = vsyncpa [#allocation3], 0  ;;  %s4249_s0 = inlined_call_operand.hbm [shape: f32[8,128], index: 0, kind: input, shape index: {}]   ;;  %s4250_s1 = inlined_call_operand.hbm [shape: f32[128,128], index: 1, kind: input, shape index: {}]   ;;  %s4251_s2 = inlined_call_operand.vmem [shape: f32[1,128], index: 2, kind: input, shape index: {}]   ;;  %s4252_s3 = inlined_call_operand.hbm [shape: bf16[128,128], index: 3, kind: input, shape index: {}]   ;;  %s4253_s4 = inlined_call_operand.vmem [shape: f32[1,128], index: 4, kind: input, shape index: {}]   ;;  %s4254_s5 = inlined_call_operand.hbm [shape: bf16[128,128], index: 5, kind: input, shape index: {}]   ;;  %s4255_s6 = inlined_call_operand.vmem [shape: f32[1,128], index: 6, kind: input, shape index: {}]   ;;  %s4256_s7 = inlined_call_operand.hbm [shape: f32[16,6,8,128], index: 7, kind: output, shape index: {}]  }
   0x1   :  { %13 = vsyncpa [#allocation6], 0 }
   0x2   :  { %14 = vsyncpa [#allocation9], 0 }
   0x3   :  { %15 = vsyncpa [#allocation4], 0  ;;  %s3215_s24 = smov [#allocation5]  }
   0x4   :  { %s31_s25 = sshll.u32 %s3215_s24, 4  ;;  %s32_s25 = int_to_ptr.vmem [resolvable:$true] %s31_s25 }
   0x5   :  { %s3115_s26 = scalar_lea.vmem %s32_s25, 2048  ;;  %p3120_p1 = scmp.lt.s32.totalorder %s32_s25, %s32_s25 }
   0x6   :  { %p3116_p0 = scmp.ne.s32.totalorder %s32_s25, %s3115_s26  ;;  %p3121_p2 = scmp.lt.s32.totalorder %s3115_s26, %s3115_s26 }
   0x8   :  { %p3122_p3 = por %p3121_p2, %p3120_p1 }
   0xa   :  { %p3123_p4 = pnand %p3122_p3, %p3116_p0 }
   0xc   :  { %3126 = shalt.err (!%p3123_p4)
}
   0xd   :  { %s3216_s27 = smov 128   ;;  %s3217_s28 = smov 8  }
   0xe   :  { %37 = dma.hbm_to_vmem [thread:$0]  %s4250_s1, 2048, %s32_s25, [#allocation6], %s3216_s27, %s3216_s27, %s3217_s28  }
   0xf   :  { %s3218_s8 = smov [#allocation2]   ;;  %s3219_s10 = smov [#allocation7]  }
  0x10   :  { %s22_s9 = sshll.u32 %s3218_s8, 4  ;;  %s45_s11 = sshll.u32 %s3219_s10, 4  ;;  %s23_s9 = int_to_ptr.vmem [resolvable:$true] %s22_s9  ;;  %s46_s11 = int_to_ptr.vmem [resolvable:$true] %s45_s11 }
  0x11   :  { %s3135_s12 = scalar_lea.vmem %s23_s9, 128  ;;  %p3140_p6 = scmp.lt.s32.totalorder %s23_s9, %s23_s9 }
  0x12   :  { %p3136_p5 = scmp.ne.s32.totalorder %s23_s9, %s3135_s12  ;;  %p3141_p7 = scmp.lt.s32.totalorder %s3135_s12, %s3135_s12 }
  0x14   :  { %p3142_p8 = por %p3141_p7, %p3140_p6 }
  0x16   :  { %p3143_p9 = pnand %p3142_p8, %p3136_p5 }
  0x18   :  { %3146 = shalt.err (!%p3143_p9)
}
  0x19   :  { %25 = dma.hbm_to_vmem [thread:$0]  %s4249_s0, 128, %s23_s9, [#allocation3]  }
  0x1a   :  { %s3155_s15 = scalar_lea.vmem %s46_s11, 1024  ;;  %p3160_p11 = scmp.lt.s32.totalorder %s46_s11, %s46_s11 }
  0x1b   :  { %p3156_p10 = scmp.ne.s32.totalorder %s46_s11, %s3155_s15  ;;  %p3161_p12 = scmp.lt.s32.totalorder %s3155_s15, %s3155_s15 }
  0x1d   :  { %p3162_p13 = por %p3161_p12, %p3160_p11 }
  0x1f   :  { %p3163_p0 = pnand %p3162_p13, %p3156_p10 }
  0x21   :  { %3166 = shalt.err (!%p3163_p0)
}
  0x22   :  { %s3220_s1 = smov 64   ;;  %s3221_s16 = smov 4  }
  0x23   :  { %51 = dma.hbm_to_vmem [thread:$0]  %s4252_s3, 1024, %s46_s11, [#allocation6], %s3220_s1, %s3220_s1, %s3221_s16  }
  0x24   :  { %s3222_s19 = smov [#allocation8]  }
  0x25   :  { %s59_s20 = sshll.u32 %s3222_s19, 4  ;;  %s60_s20 = int_to_ptr.vmem [resolvable:$true] %s59_s20 }
  0x26   :  { %s3175_s21 = scalar_lea.vmem %s60_s20, 1024  ;;  %p3180_p2 = scmp.lt.s32.totalorder %s60_s20, %s60_s20 }
  0x27   :  { %p3176_p1 = scmp.ne.s32.totalorder %s60_s20, %s3175_s21  ;;  %p3181_p3 = scmp.lt.s32.totalorder %s3175_s21, %s3175_s21 }
  0x29   :  { %p3182_p4 = por %p3181_p3, %p3180_p2 }
  0x2b   :  { %p3183_p5 = pnand %p3182_p4, %p3176_p1 }
  0x2d   :  { %3186 = shalt.err (!%p3183_p5)
}
  0x2e   :  { %65 = dma.hbm_to_vmem [thread:$0]  %s4254_s5, 1024, %s60_s20, [#allocation9], %s3220_s1, %s3220_s1, %s3221_s16  }
  0x2f   :  { %3207 = dma.done.wait [#allocation3], 128  }
  0x30   :  { %3208 = vsyncadd [#allocation3], 4294967168 }
  0x31   :  { %3209 = dma.done.wait [#allocation6], 3072  }
  0x32   :  { %3210 = vsyncadd [#allocation6], 4294964224 }
  0x33   :  { %3211 = dma.done.wait [#allocation9], 1024  }
  0x34   :  { %3212 = vsyncadd [#allocation9], 4294966272  ;;  %v3223_v0 = vmov 0.0   ;;  %vm3224_vm0 = vmmov 0   ;;  %v129_v1 = vld [vmem:[#allocation5 + $0x78] sm:$0xff]  ;;  %v128_v2 = vld [vmem:[#allocation5 + $0x70] sm:$0xff] }
  0x35   :  { %2386 = vmatprep.subr.mxu0 %v3223_v0  ;;  %2418 = vmatprep.mubr.msk.f32.mxu0 %vm3224_vm0, %v3223_v0  ;;  %v127_v3 = vld [vmem:[#allocation5 + $0x68] sm:$0xff]  ;;  %v126_v4 = vld [vmem:[#allocation5 + $0x60] sm:$0xff]  ;;  %v125_v5 = vld [vmem:[#allocation5 + $0x58] sm:$0xff]  ;;  %v3225_v32 = vmov 1.0|1.0   ;;  %s3226_s8 = smov [#allocation10]  }
  0x36   :  { %2421 = vmatprep.subr.bf16.mxu1 %v3223_v0  ;;  %2437 = vmatprep.mubr.msk.bf16.mxu1 %vm3224_vm0, %v3223_v0  ;;  %v3291_v6 = vld [vmem:[#allocation7 + $0x38] sm:$0xff]   ;;  %v124_v7 = vld [vmem:[#allocation5 + $0x50] sm:$0xff]  ;;  %v123_v9 = vld [vmem:[#allocation5 + $0x48] sm:$0xff]  ;;  %s1984_s9 = sshll.u32 %s3226_s8, 4  ;;  %s1985_s9 = int_to_ptr.vmem [resolvable:$true] %s1984_s9 }
  0x37   :  { %2387 = vmatpush3.msra.mxu0 %v129_v1  ;;  %2422 = vmatpush3.bf16.msra.mxu1 %v3291_v6  ;;  %v3295_v8 = vld [vmem:[#allocation7 + $0x30] sm:$0xff]   ;;  %v122_v10 = vld [vmem:[#allocation5 + $0x40] sm:$0xff]  ;;  %v121_v11 = vld [vmem:[#allocation5 + $0x38] sm:$0xff]  ;;  %s3187_s10 = scalar_lea.vmem %s1985_s9, 12288  ;;  %p3192_p7 = scmp.lt.s32.totalorder %s1985_s9, %s1985_s9 }
  0x38   :  { %2388 = vmatprep.subr.mxu0 %v3223_v0  ;;  %2423 = vmatprep.subr.bf16.mxu1 %v3223_v0  ;;  %v3301_v12 = vld [vmem:[#allocation7 + $0x28] sm:$0xff]   ;;  %v120_v13 = vld [vmem:[#allocation5 + $0x30] sm:$0xff]  ;;  %v3305_v14 = vld [vmem:[#allocation7 + $0x20] sm:$0xff]   ;;  %p3188_p6 = scmp.ne.s32.totalorder %s1985_s9, %s3187_s10  ;;  %p3193_p8 = scmp.lt.s32.totalorder %s3187_s10, %s3187_s10 }
  0x39   :  { %2389 = vmatpush3.msra.mxu0 %v128_v2  ;;  %v119_v15 = vld [vmem:[#allocation5 + $0x28] sm:$0xff]  ;;  %v118_v16 = vld [vmem:[#allocation5 + $0x20] sm:$0xff]  ;;  %v3313_v17 = vld [vmem:[#allocation7 + $0x18] sm:$0xff]  }
  0x3a   :  { %2390 = vmatprep.subr.mxu0 %v3223_v0  ;;  %v117_v18 = vld [vmem:[#allocation5 + $0x18] sm:$0xff]  ;;  %v116_v19 = vld [vmem:[#allocation5 + $0x10] sm:$0xff]  ;;  %v115_v21 = vld [vmem:[#allocation5 + $0x8] sm:$0xff]  ;;  %p3194_p9 = por %p3193_p8, %p3192_p7 }
  0x3b   :  { %2391 = vmatpush3.msra.mxu0 %v127_v3  ;;  %2424 = vmatpush3.bf16.msra.mxu1 %v3295_v8  ;;  %v3319_v20 = vld [vmem:[#allocation7 + $0x10] sm:$0xff]   ;;  %v114_v22 = vld [vmem:[#allocation5] sm:$0xff]  ;;  %v3325_v23 = vld [vmem:[#allocation7 + $0x8] sm:$0xff]  }
  0x3c   :  { %2392 = vmatprep.subr.mxu0 %v3223_v0  ;;  %2425 = vmatprep.subr.bf16.mxu1 %v3223_v0  ;;  %v113_v24 = vld [vmem:[#allocation2] sm:$0xff]  ;;  %v3334_v25 = vld [vmem:[#allocation7] sm:$0xff]   ;;  %v3434_v61 = vld [vmem:[#allocation8 + $0x30] sm:$0xff]   ;;  %p3195_p10 = pnand %p3194_p9, %p3188_p6 }
  0x3d   :  { %2393 = vmatpush3.msra.mxu0 %v126_v4  ;;  %v1998_v26 = vld [vmem:[%s4251_s2] ss:$0 sm:$0xff]  ;;  %v3446_v2 = vld [vmem:[#allocation8 + $0x28] sm:$0xff]  }
  0x3e   :  { %2394 = vmatprep.subr.mxu0 %v3223_v0  ;;  %v3423_v58 = vld [vmem:[#allocation8 + $0x38] sm:$0xff]  }
  0x3f   :  { %2395 = vmatpush3.msra.mxu0 %v125_v5  ;;  %2426 = vmatpush3.bf16.msra.mxu1 %v3301_v12 }
  0x40   :  { %2396 = vmatprep.subr.mxu0 %v3223_v0  ;;  %2427 = vmatprep.subr.bf16.mxu1 %v3223_v0 }
  0x41   :  { %2397 = vmatpush3.msra.mxu0 %v124_v7  ;;  %v3459_v7 = vld [vmem:[#allocation8 + $0x20] sm:$0xff]  }
  0x42   :  { %2398 = vmatprep.subr.mxu0 %v3223_v0 }
  0x43   :  { %2399 = vmatpush3.msra.mxu0 %v123_v9  ;;  %2428 = vmatpush3.bf16.msra.mxu1 %v3305_v14 }
  0x44   :  { %2400 = vmatprep.subr.mxu0 %v3223_v0  ;;  %2429 = vmatprep.subr.bf16.mxu1 %v3223_v0 }
  0x45   :  { %2401 = vmatpush3.msra.mxu0 %v122_v10 }
  0x46   :  { %2402 = vmatprep.subr.mxu0 %v3223_v0 }
  0x47   :  { %2403 = vmatpush3.msra.mxu0 %v121_v11  ;;  %2430 = vmatpush3.bf16.msra.mxu1 %v3313_v17  ;;  %v3470_v11 = vld [vmem:[#allocation8 + $0x18] sm:$0xff]  }
  0x48   :  { %2404 = vmatprep.subr.mxu0 %v3223_v0  ;;  %2431 = vmatprep.subr.bf16.mxu1 %v3223_v0 }
  0x49   :  { %2405 = vmatpush3.msra.mxu0 %v120_v13 }
  0x4a   :  { %2406 = vmatprep.subr.mxu0 %v3223_v0 }
  0x4b   :  { %2407 = vmatpush3.msra.mxu0 %v119_v15  ;;  %2432 = vmatpush3.bf16.msra.mxu1 %v3319_v20 }
  0x4c   :  { %2408 = vmatprep.subr.mxu0 %v3223_v0  ;;  %2433 = vmatprep.subr.bf16.mxu1 %v3223_v0 }
  0x4d   :  { %2409 = vmatpush3.msra.mxu0 %v118_v16 }
  0x4e   :  { %2410 = vmatprep.subr.mxu0 %v3223_v0 }
  0x4f   :  { %2411 = vmatpush3.msra.mxu0 %v117_v18  ;;  %2434 = vmatpush3.bf16.msra.mxu1 %v3325_v23  ;;  %v3482_v18 = vld [vmem:[#allocation8 + $0x10] sm:$0xff]  }
  0x50   :  { %2412 = vmatprep.subr.mxu0 %v3223_v0  ;;  %2435 = vmatprep.subr.bf16.mxu1 %v3223_v0 }
  0x51   :  { %2413 = vmatpush3.msra.mxu0 %v116_v19 }
  0x52   :  { %2414 = vmatprep.subr.mxu0 %v3223_v0 }
  0x53   :  { %2415 = vmatpush3.msra.mxu0 %v115_v21  ;;  %2436 = vmatpush3.bf16.msra.mxu1 %v3334_v25 }
  0x54   :  { %2416 = vmatprep.subr.mxu0 %v3223_v0  ;;  %2461 = vmatprep.subr.bf16.mxu1 %v3223_v0 }
  0x55   :  { %2417 = vmatpush3.msra.mxu0 %v114_v22 }
  0x56   :  { %2419 = vmatmul.mubr.f32.vlgmr.msra.gmra.mxu0 %v113_v24  ;;  %2441 = vmatprep.subr.bf16.mxu0 %v3223_v0  ;;  %v3495_v24 = vld [vmem:[#allocation8 + $0x8] sm:$0xff]  }
  0x57   :  { %2457 = vmatprep.mubr.msk.bf16.mxu0 %vm3224_vm0, %v3223_v0  ;;  %2442 = vmatpush3.bf16.msra.mxu0 %v3423_v58 }
  0x58   :  { %2443 = vmatprep.subr.bf16.mxu0 %v3223_v0 }
  0x5b   :  { %2444 = vmatpush3.bf16.msra.mxu0 %v3434_v61 }
  0x5c   :  { %2445 = vmatprep.subr.bf16.mxu0 %v3223_v0 }
  0x5f   :  { %2446 = vmatpush3.bf16.msra.mxu0 %v3446_v2 }
  0x60   :  { %2447 = vmatprep.subr.bf16.mxu0 %v3223_v0 }
  0x63   :  { %2448 = vmatpush3.bf16.msra.mxu0 %v3459_v7 }
  0x64   :  { %2449 = vmatprep.subr.bf16.mxu0 %v3223_v0 }
  0x67   :  { %2450 = vmatpush3.bf16.msra.mxu0 %v3470_v11 }
  0x68   :  { %2451 = vmatprep.subr.bf16.mxu0 %v3223_v0 }
  0x6b   :  { %2452 = vmatpush3.bf16.msra.mxu0 %v3482_v18 }
  0x6c   :  { %2453 = vmatprep.subr.bf16.mxu0 %v3223_v0 }
  0x6f   :  { %2454 = vmatpush3.bf16.msra.mxu0 %v3495_v24 }
  0x70   :  { %2455 = vmatprep.subr.bf16.mxu0 %v3223_v0 }
 0x116   :  { %v203_v27 = vpop.f32.mrf.mxu0 }
 0x117   :  { %v3341_v28 = vadd.f32 %v1998_v26, %v203_v27 }
 0x118   :  { %v2420_v29 = vpop.f32.mrf.mxu0 }
 0x119   :  { %416 = vst [vmem:[#allocation10 + $0x18] sm:$0xff] %v3341_v28  ;;  %vm225_vm1 = vcmp.gt.f32.partialorder %v3341_v28, 1.0  ;;  %v419_v30 = vmul.f32 0.95, %v3341_v28  ;;  %v3512_v29 = vld [vmem:[#allocation8] sm:$0xff]  }
 0x11a   :  { %v226_v31 = vsel %vm225_vm1, 1.0, %v3223_v0  ;;  %vm2009_vm2 = vmpackc.low %vm225_vm1, %vm225_vm1  ;;  %2456 = vmatpush3.bf16.msra.mxu0 %v3512_v29 }
 0x11b   :  { %2438 = vmatmul.mubr.msk.bf16.vlgmr.msra.gmra.mxu1 %vm2009_vm2, %v3225_v32  ;;  %413 = vst [vmem:[#allocation10] sm:$0xff] %v226_v31  ;;  %v420_v33 = vadd.f32 %v419_v30, %v3341_v28  ;;  %2481 = vmatprep.subr.bf16.mxu0 %v3223_v0 }
 0x11c   :  { %2462 = vmatpush3.bf16.msra.mxu1 %v3291_v6  ;;  %2477 = vmatprep.mubr.msk.bf16.mxu1 %vm3224_vm0, %v3223_v0 }
 0x11d   :  { %v421_v34 = vsub.f32 %v420_v33, %v226_v31  ;;  %2463 = vmatprep.subr.bf16.mxu1 %v3223_v0 }
 0x11f   :  { %520 = vst [vmem:[#allocation10 + $0x48] sm:$0xff] %v421_v34  ;;  %v523_v35 = vmul.f32 0.95, %v421_v34  ;;  %vm422_vm3 = vcmp.gt.f32.partialorder %v421_v34, 1.0 }
 0x120   :  { %2464 = vmatpush3.bf16.msra.mxu1 %v3295_v8  ;;  %v423_v36 = vsel %vm422_vm3, 1.0, %v3223_v0  ;;  %vm2021_vm8 = vmpackc.low %vm422_vm3, %vm422_vm3 }
 0x121   :  { %2465 = vmatprep.subr.bf16.mxu1 %v3223_v0  ;;  %517 = vst [vmem:[#allocation10 + $0x30] sm:$0xff] %v423_v36  ;;  %v524_v37 = vadd.f32 %v523_v35, %v3341_v28 }
 0x123   :  { %v3358_v38 = vsub.f32 %v524_v37, %v423_v36 }
 0x124   :  { %2466 = vmatpush3.bf16.msra.mxu1 %v3301_v12 }
 0x125   :  { %2467 = vmatprep.subr.bf16.mxu1 %v3223_v0  ;;  %624 = vst [vmem:[#allocation10 + $0x78] sm:$0xff] %v3358_v38  ;;  %vm526_vm4 = vcmp.gt.f32.partialorder %v3358_v38, 1.0  ;;  %v627_v39 = vmul.f32 0.95, %v3358_v38 }
 0x126   :  { %v527_v40 = vsel %vm526_vm4, 1.0, %v3223_v0  ;;  %vm2025_vm14 = vmpackc.low %vm526_vm4, %vm526_vm4 }
 0x127   :  { %621 = vst [vmem:[#allocation10 + $0x60] sm:$0xff] %v527_v40  ;;  %v628_v41 = vadd.f32 %v627_v39, %v3341_v28 }
 0x128   :  { %2468 = vmatpush3.bf16.msra.mxu1 %v3305_v14 }
 0x129   :  { %2469 = vmatprep.subr.bf16.mxu1 %v3223_v0  ;;  %v3371_v42 = vsub.f32 %v628_v41, %v527_v40 }
 0x12b   :  { %728 = vst [vmem:[#allocation10 + $0xa8] sm:$0xff] %v3371_v42  ;;  %vm630_vm5 = vcmp.gt.f32.partialorder %v3371_v42, 1.0  ;;  %v731_v43 = vmul.f32 0.95, %v3371_v42 }
 0x12c   :  { %2470 = vmatpush3.bf16.msra.mxu1 %v3313_v17  ;;  %v631_v44 = vsel %vm630_vm5, 1.0, %v3223_v0 }
 0x12d   :  { %2471 = vmatprep.subr.bf16.mxu1 %v3223_v0  ;;  %725 = vst [vmem:[#allocation10 + $0x90] sm:$0xff] %v631_v44  ;;  %v732_v45 = vadd.f32 %v731_v43, %v3341_v28 }
 0x12f   :  { %v3382_v46 = vsub.f32 %v732_v45, %v631_v44 }
 0x130   :  { %2472 = vmatpush3.bf16.msra.mxu1 %v3319_v20 }
 0x131   :  { %2473 = vmatprep.subr.bf16.mxu1 %v3223_v0  ;;  %832 = vst [vmem:[#allocation10 + $0xd8] sm:$0xff] %v3382_v46  ;;  %vm734_vm6 = vcmp.gt.f32.partialorder %v3382_v46, 1.0  ;;  %v835_v47 = vmul.f32 0.95, %v3382_v46 }
 0x132   :  { %v735_v48 = vsel %vm734_vm6, 1.0, %v3223_v0 }
 0x133   :  { %829 = vst [vmem:[#allocation10 + $0xc0] sm:$0xff] %v735_v48  ;;  %v836_v49 = vadd.f32 %v835_v47, %v3341_v28 }
 0x134   :  { %2474 = vmatpush3.bf16.msra.mxu1 %v3325_v23 }
 0x135   :  { %2475 = vmatprep.subr.bf16.mxu1 %v3223_v0  ;;  %v3395_v50 = vsub.f32 %v836_v49, %v735_v48 }
 0x137   :  { %936 = vst [vmem:[#allocation10 + $0x108] sm:$0xff] %v3395_v50  ;;  %vm838_vm7 = vcmp.gt.f32.partialorder %v3395_v50, 1.0  ;;  %v939_v51 = vmul.f32 0.95, %v3395_v50 }
 0x138   :  { %2476 = vmatpush3.bf16.msra.mxu1 %v3334_v25  ;;  %v839_v52 = vsel %vm838_vm7, 1.0, %v3223_v0 }
 0x139   :  { %2501 = vmatprep.subr.bf16.mxu1 %v3223_v0  ;;  %933 = vst [vmem:[#allocation10 + $0xf0] sm:$0xff] %v839_v52  ;;  %v940_v53 = vadd.f32 %v939_v51, %v3341_v28 }
 0x13b   :  { %2478 = vmatmul.mubr.msk.bf16.vlgmr.msra.gmra.mxu1 %vm2021_vm8, %v3225_v32  ;;  %v3409_v54 = vsub.f32 %v940_v53, %v839_v52  ;;  %vm2029_vm8 = vmpackc.low %vm630_vm5, %vm630_vm5 }
 0x13c   :  { %2502 = vmatpush3.bf16.msra.mxu1 %v3291_v6  ;;  %2517 = vmatprep.mubr.msk.bf16.mxu1 %vm3224_vm0, %v3223_v0  ;;  %vm2033_vm5 = vmpackc.low %vm734_vm6, %vm734_vm6 }
 0x13d   :  { %2503 = vmatprep.subr.bf16.mxu1 %v3223_v0  ;;  %1040 = vst [vmem:[#allocation10 + $0x138] sm:$0xff] %v3409_v54  ;;  %vm942_vm9 = vcmp.gt.f32.partialorder %v3409_v54, 1.0  ;;  %v1043_v55 = vmul.f32 0.95, %v3409_v54  ;;  %vm2037_vm6 = vmpackc.low %vm838_vm7, %vm838_vm7 }
 0x13e   :  { %v943_v56 = vsel %vm942_vm9, 1.0, %v3223_v0  ;;  %vm2041_vm7 = vmpackc.low %vm942_vm9, %vm942_vm9 }
 0x13f   :  { %1037 = vst [vmem:[#allocation10 + $0x120] sm:$0xff] %v943_v56  ;;  %v1044_v57 = vadd.f32 %v1043_v55, %v3341_v28 }
 0x140   :  { %2504 = vmatpush3.bf16.msra.mxu1 %v3295_v8 }
 0x141   :  { %2505 = vmatprep.subr.bf16.mxu1 %v3223_v0  ;;  %v3426_v59 = vsub.f32 %v1044_v57, %v943_v56 }
 0x143   :  { %1144 = vst [vmem:[#allocation10 + $0x168] sm:$0xff] %v3426_v59  ;;  %vm1046_vm10 = vcmp.gt.f32.partialorder %v3426_v59, 1.0  ;;  %v1147_v60 = vmul.f32 0.95, %v3426_v59 }
 0x144   :  { %2506 = vmatpush3.bf16.msra.mxu1 %v3301_v12  ;;  %v1047_v62 = vsel %vm1046_vm10, 1.0, %v3223_v0  ;;  %vm2045_vm9 = vmpackc.low %vm1046_vm10, %vm1046_vm10 }
 0x145   :  { %2507 = vmatprep.subr.bf16.mxu1 %v3223_v0  ;;  %1141 = vst [vmem:[#allocation10 + $0x150] sm:$0xff] %v1047_v62  ;;  %v1148_v63 = vadd.f32 %v1147_v60, %v3341_v28 }
 0x147   :  { %v3443_v1 = vsub.f32 %v1148_v63, %v1047_v62 }
 0x148   :  { %2508 = vmatpush3.bf16.msra.mxu1 %v3305_v14 }
 0x149   :  { %2509 = vmatprep.subr.bf16.mxu1 %v3223_v0  ;;  %1248 = vst [vmem:[#allocation10 + $0x198] sm:$0xff] %v3443_v1  ;;  %vm1150_vm11 = vcmp.gt.f32.partialorder %v3443_v1, 1.0  ;;  %v1251_v3 = vmul.f32 0.95, %v3443_v1 }
 0x14a   :  { %v1151_v4 = vsel %vm1150_vm11, 1.0, %v3223_v0 }
 0x14b   :  { %1245 = vst [vmem:[#allocation10 + $0x180] sm:$0xff] %v1151_v4  ;;  %v1252_v5 = vadd.f32 %v1251_v3, %v3341_v28 }
 0x14c   :  { %2510 = vmatpush3.bf16.msra.mxu1 %v3313_v17 }
 0x14d   :  { %2511 = vmatprep.subr.bf16.mxu1 %v3223_v0  ;;  %v3462_v9 = vsub.f32 %v1252_v5, %v1151_v4 }
 0x14f   :  { %1352 = vst [vmem:[#allocation10 + $0x1c8] sm:$0xff] %v3462_v9  ;;  %vm1254_vm12 = vcmp.gt.f32.partialorder %v3462_v9, 1.0  ;;  %v1355_v10 = vmul.f32 0.95, %v3462_v9 }
 0x150   :  { %2512 = vmatpush3.bf16.msra.mxu1 %v3319_v20  ;;  %v1255_v13 = vsel %vm1254_vm12, 1.0, %v3223_v0 }
 0x151   :  { %2513 = vmatprep.subr.bf16.mxu1 %v3223_v0  ;;  %1349 = vst [vmem:[#allocation10 + $0x1b0] sm:$0xff] %v1255_v13  ;;  %v1356_v15 = vadd.f32 %v1355_v10, %v3341_v28 }
 0x153   :  { %v3479_v16 = vsub.f32 %v1356_v15, %v1255_v13 }
 0x154   :  { %2514 = vmatpush3.bf16.msra.mxu1 %v3325_v23 }
 0x155   :  { %2515 = vmatprep.subr.bf16.mxu1 %v3223_v0  ;;  %1456 = vst [vmem:[#allocation10 + $0x1f8] sm:$0xff] %v3479_v16  ;;  %vm1358_vm13 = vcmp.gt.f32.partialorder %v3479_v16, 1.0  ;;  %v1459_v19 = vmul.f32 0.95, %v3479_v16 }
 0x156   :  { %v1359_v21 = vsel %vm1358_vm13, 1.0, %v3223_v0 }
 0x157   :  { %1453 = vst [vmem:[#allocation10 + $0x1e0] sm:$0xff] %v1359_v21  ;;  %v1460_v22 = vadd.f32 %v1459_v19, %v3341_v28 }
 0x158   :  { %2516 = vmatpush3.bf16.msra.mxu1 %v3334_v25 }
 0x159   :  { %2541 = vmatprep.subr.bf16.mxu1 %v3223_v0  ;;  %v3498_v26 = vsub.f32 %v1460_v22, %v1359_v21 }
 0x15b   :  { %2518 = vmatmul.mubr.msk.bf16.vlgmr.msra.gmra.mxu1 %vm2025_vm14, %v3225_v32  ;;  %1560 = vst [vmem:[#allocation10 + $0x228] sm:$0xff] %v3498_v26  ;;  %vm1462_vm15 = vcmp.gt.f32.partialorder %v3498_v26, 1.0  ;;  %v1563_v27 = vmul.f32 0.95, %v3498_v26 }
 0x15c   :  { %2542 = vmatpush3.bf16.msra.mxu1 %v3291_v6  ;;  %2557 = vmatprep.mubr.msk.bf16.mxu1 %vm3224_vm0, %v3223_v0  ;;  %v1463_v30 = vsel %vm1462_vm15, 1.0, %v3223_v0 }
 0x15d   :  { %2543 = vmatprep.subr.bf16.mxu1 %v3223_v0  ;;  %1557 = vst [vmem:[#allocation10 + $0x210] sm:$0xff] %v1463_v30  ;;  %v1564_v31 = vadd.f32 %v1563_v27, %v3341_v28 }
 0x15f   :  { %v3521_v33 = vsub.f32 %v1564_v31, %v1463_v30 }
 0x160   :  { %2544 = vmatpush3.bf16.msra.mxu1 %v3295_v8 }
 0x161   :  { %2545 = vmatprep.subr.bf16.mxu1 %v3223_v0  ;;  %1664 = vst [vmem:[#allocation10 + $0x258] sm:$0xff] %v3521_v33  ;;  %vm1566_vm1 = vcmp.gt.f32.partialorder %v3521_v33, 1.0  ;;  %v1667_v34 = vmul.f32 0.95, %v3521_v33 }
 0x162   :  { %v1567_v35 = vsel %vm1566_vm1, 1.0, %v3223_v0 }
 0x163   :  { %1661 = vst [vmem:[#allocation10 + $0x240] sm:$0xff] %v1567_v35  ;;  %v1668_v36 = vadd.f32 %v1667_v34, %v3341_v28 }
 0x164   :  { %2546 = vmatpush3.bf16.msra.mxu1 %v3301_v12 }
 0x165   :  { %2547 = vmatprep.subr.bf16.mxu1 %v3223_v0  ;;  %v3534_v37 = vsub.f32 %v1668_v36, %v1567_v35 }
 0x167   :  { %1768 = vst [vmem:[#allocation10 + $0x288] sm:$0xff] %v3534_v37  ;;  %vm1670_vm2 = vcmp.gt.f32.partialorder %v3534_v37, 1.0  ;;  %v1771_v38 = vmul.f32 0.95, %v3534_v37 }
 0x168   :  { %2548 = vmatpush3.bf16.msra.mxu1 %v3305_v14  ;;  %v1671_v39 = vsel %vm1670_vm2, 1.0, %v3223_v0 }
 0x169   :  { %2549 = vmatprep.subr.bf16.mxu1 %v3223_v0  ;;  %1765 = vst [vmem:[#allocation10 + $0x270] sm:$0xff] %v1671_v39  ;;  %v1772_v40 = vadd.f32 %v1771_v38, %v3341_v28 }
 0x16b   :  { %v3545_v41 = vsub.f32 %v1772_v40, %v1671_v39 }
 0x16c   :  { %2550 = vmatpush3.bf16.msra.mxu1 %v3313_v17 }
 0x16d   :  { %2551 = vmatprep.subr.bf16.mxu1 %v3223_v0  ;;  %1872 = vst [vmem:[#allocation10 + $0x2b8] sm:$0xff] %v3545_v41  ;;  %vm1774_vm3 = vcmp.gt.f32.partialorder %v3545_v41, 1.0  ;;  %v1875_v43 = vmul.f32 0.95, %v3545_v41 }
 0x16e   :  { %v1775_v44 = vsel %vm1774_vm3, 1.0, %v3223_v0 }
 0x16f   :  { %1869 = vst [vmem:[#allocation10 + $0x2a0] sm:$0xff] %v1775_v44  ;;  %v1876_v45 = vadd.f32 %v1875_v43, %v3341_v28  ;;  %v3638_v28 = vld [vmem:[%s4253_s4] ss:$0 sm:$0xff]  ;;  %v3821_v43 = vld [vmem:[#allocation7 + $0x30] sm:$0xff]  }
 0x170   :  { %2552 = vmatpush3.bf16.msra.mxu1 %v3319_v20 }
 0x171   :  { %2553 = vmatprep.subr.bf16.mxu1 %v3223_v0  ;;  %v3558_v47 = vsub.f32 %v1876_v45, %v1775_v44 }
 0x173   :  { %vm1878_vm4 = vcmp.gt.f32.partialorder %v3558_v47, 1.0  ;;  %1976 = vst [vmem:[#allocation10 + $0x2e8] sm:$0xff] %v3558_v47 }
 0x174   :  { %2554 = vmatpush3.bf16.msra.mxu1 %v3325_v23  ;;  %v1879_v48 = vsel %vm1878_vm4, 1.0, %v3223_v0 }
 0x175   :  { %2555 = vmatprep.subr.bf16.mxu1 %v3223_v0  ;;  %1973 = vst [vmem:[#allocation10 + $0x2d0] sm:$0xff] %v1879_v48  ;;  %v3829_v48 = vld [vmem:[#allocation7 + $0x28] sm:$0xff]  }
 0x178   :  { %2556 = vmatpush3.bf16.msra.mxu1 %v3334_v25 }
 0x179   :  { %2581 = vmatprep.subr.bf16.mxu1 %v3223_v0 }
 0x17b   :  { %2558 = vmatmul.mubr.msk.bf16.vlgmr.msra.gmra.mxu1 %vm2029_vm8, %v3225_v32 }
 0x17c   :  { %2582 = vmatpush3.bf16.msra.mxu1 %v3291_v6  ;;  %2597 = vmatprep.mubr.msk.bf16.mxu1 %vm3224_vm0, %v3223_v0 }
 0x17d   :  { %2583 = vmatprep.subr.bf16.mxu1 %v3223_v0 }
 0x180   :  { %2584 = vmatpush3.bf16.msra.mxu1 %v3295_v8 }
 0x181   :  { %2585 = vmatprep.subr.bf16.mxu1 %v3223_v0 }
 0x184   :  { %2586 = vmatpush3.bf16.msra.mxu1 %v3301_v12 }
 0x185   :  { %2587 = vmatprep.subr.bf16.mxu1 %v3223_v0 }
 0x188   :  { %2588 = vmatpush3.bf16.msra.mxu1 %v3305_v14 }
 0x189   :  { %2589 = vmatprep.subr.bf16.mxu1 %v3223_v0 }
 0x18c   :  { %2590 = vmatpush3.bf16.msra.mxu1 %v3313_v17 }
 0x18d   :  { %2591 = vmatprep.subr.bf16.mxu1 %v3223_v0 }
 0x190   :  { %2592 = vmatpush3.bf16.msra.mxu1 %v3319_v20 }
 0x191   :  { %2593 = vmatprep.subr.bf16.mxu1 %v3223_v0 }
 0x194   :  { %2594 = vmatpush3.bf16.msra.mxu1 %v3325_v23 }
 0x195   :  { %2595 = vmatprep.subr.bf16.mxu1 %v3223_v0 }
 0x198   :  { %2596 = vmatpush3.bf16.msra.mxu1 %v3334_v25 }
 0x199   :  { %2621 = vmatprep.subr.bf16.mxu1 %v3223_v0 }
 0x19b   :  { %2598 = vmatmul.mubr.msk.bf16.vlgmr.msra.gmra.mxu1 %vm2033_vm5, %v3225_v32 }
 0x19c   :  { %2622 = vmatpush3.bf16.msra.mxu1 %v3291_v6  ;;  %2637 = vmatprep.mubr.msk.bf16.mxu1 %vm3224_vm0, %v3223_v0 }
 0x19d   :  { %2623 = vmatprep.subr.bf16.mxu1 %v3223_v0 }
 0x1a0   :  { %2624 = vmatpush3.bf16.msra.mxu1 %v3295_v8 }
 0x1a1   :  { %2625 = vmatprep.subr.bf16.mxu1 %v3223_v0 }
 0x1a4   :  { %2626 = vmatpush3.bf16.msra.mxu1 %v3301_v12 }
 0x1a5   :  { %2627 = vmatprep.subr.bf16.mxu1 %v3223_v0 }
 0x1a8   :  { %2628 = vmatpush3.bf16.msra.mxu1 %v3305_v14 }
 0x1a9   :  { %2629 = vmatprep.subr.bf16.mxu1 %v3223_v0 }
 0x1ac   :  { %2630 = vmatpush3.bf16.msra.mxu1 %v3313_v17 }
 0x1ad   :  { %2631 = vmatprep.subr.bf16.mxu1 %v3223_v0 }
 0x1b0   :  { %2632 = vmatpush3.bf16.msra.mxu1 %v3319_v20 }
 0x1b1   :  { %2633 = vmatprep.subr.bf16.mxu1 %v3223_v0 }
 0x1b4   :  { %2634 = vmatpush3.bf16.msra.mxu1 %v3325_v23 }
 0x1b5   :  { %2635 = vmatprep.subr.bf16.mxu1 %v3223_v0 }
 0x1b8   :  { %2636 = vmatpush3.bf16.msra.mxu1 %v3334_v25 }
 0x1b9   :  { %2661 = vmatprep.subr.bf16.mxu1 %v3223_v0 }
 0x1bb   :  { %2638 = vmatmul.mubr.msk.bf16.vlgmr.msra.gmra.mxu1 %vm2037_vm6, %v3225_v32  ;;  %vm2049_vm6 = vmpackc.low %vm1150_vm11, %vm1150_vm11 }
 0x1bc   :  { %2662 = vmatpush3.bf16.msra.mxu1 %v3291_v6  ;;  %2677 = vmatprep.mubr.msk.bf16.mxu1 %vm3224_vm0, %v3223_v0 }
 0x1bd   :  { %2663 = vmatprep.subr.bf16.mxu1 %v3223_v0 }
 0x1c0   :  { %2664 = vmatpush3.bf16.msra.mxu1 %v3295_v8 }
 0x1c1   :  { %2665 = vmatprep.subr.bf16.mxu1 %v3223_v0 }
 0x1c4   :  { %2666 = vmatpush3.bf16.msra.mxu1 %v3301_v12 }
 0x1c5   :  { %2667 = vmatprep.subr.bf16.mxu1 %v3223_v0 }
 0x1c8   :  { %2668 = vmatpush3.bf16.msra.mxu1 %v3305_v14 }
 0x1c9   :  { %2669 = vmatprep.subr.bf16.mxu1 %v3223_v0 }
 0x1cc   :  { %2670 = vmatpush3.bf16.msra.mxu1 %v3313_v17 }
 0x1cd   :  { %2671 = vmatprep.subr.bf16.mxu1 %v3223_v0 }
 0x1d0   :  { %2672 = vmatpush3.bf16.msra.mxu1 %v3319_v20 }
 0x1d1   :  { %2673 = vmatprep.subr.bf16.mxu1 %v3223_v0 }
 0x1d4   :  { %2674 = vmatpush3.bf16.msra.mxu1 %v3325_v23 }
 0x1d5   :  { %2675 = vmatprep.subr.bf16.mxu1 %v3223_v0 }
 0x1d8   :  { %2676 = vmatpush3.bf16.msra.mxu1 %v3334_v25 }
 0x1d9   :  { %2701 = vmatprep.subr.bf16.mxu1 %v3223_v0 }
 0x1db   :  { %2678 = vmatmul.mubr.msk.bf16.vlgmr.msra.gmra.mxu1 %vm2041_vm7, %v3225_v32  ;;  %v310_v42 = vpop.f32.mrf.mxu1 }
 0x1dc   :  { %v311_v46 = vadd.f32 %v3638_v28, %v310_v42  ;;  %2702 = vmatpush3.bf16.msra.mxu1 %v3291_v6  ;;  %2717 = vmatprep.mubr.msk.bf16.mxu1 %vm3224_vm0, %v3223_v0  ;;  %v3837_v42 = vld [vmem:[#allocation7 + $0x20] sm:$0xff]  }
 0x1dd   :  { %v2439_v49 = vpop.f32.mrf.mxu1  ;;  %2703 = vmatprep.subr.bf16.mxu1 %v3223_v0 }
 0x1de   :  { %vm318_vm14 = vcmp.gt.f32.partialorder %v311_v46, 1.0  ;;  %417 = vst [vmem:[#allocation10 + $0x20] sm:$0xff] %v311_v46  ;;  %v465_v55 = vmul.f32 0.95, %v311_v46  ;;  %v3843_v46 = vld [vmem:[#allocation7 + $0x18] sm:$0xff]  }
 0x1df   :  { %v313_v50 = vpop.f32.mrf.mxu1  ;;  %vm2019_vm8 = vmpackc.low %vm318_vm14, %vm318_vm14  ;;  %v319_v51 = vsel %vm318_vm14, 1.0, %v3223_v0 }
 0x1e0   :  { %2704 = vmatpush3.bf16.msra.mxu1 %v3295_v8  ;;  %2458 = vmatmul.mubr.msk.bf16.vlgmr.msra.gmra.mxu0 %vm2019_vm8, %v3225_v32  ;;  %414 = vst [vmem:[#allocation10 + $0x8] sm:$0xff] %v319_v51  ;;  %vm2053_vm14 = vmpackc.low %vm1254_vm12, %vm1254_vm12 }
 0x1e1   :  { %v2440_v52 = vpop.f32.mrf.mxu1  ;;  %2705 = vmatprep.subr.bf16.mxu1 %v3223_v0  ;;  %2482 = vmatpush3.bf16.msra.mxu0 %v3423_v58 }
 0x1e2   :  { %2483 = vmatprep.subr.bf16.mxu0 %v3223_v0  ;;  %2497 = vmatprep.mubr.msk.bf16.mxu0 %vm3224_vm0, %v3223_v0 }
 0x1e4   :  { %2706 = vmatpush3.bf16.msra.mxu1 %v3301_v12 }
 0x1e5   :  { %2707 = vmatprep.subr.bf16.mxu1 %v3223_v0  ;;  %2484 = vmatpush3.bf16.msra.mxu0 %v3434_v61 }
 0x1e6   :  { %2485 = vmatprep.subr.bf16.mxu0 %v3223_v0 }
 0x1e8   :  { %2708 = vmatpush3.bf16.msra.mxu1 %v3305_v14 }
 0x1e9   :  { %2709 = vmatprep.subr.bf16.mxu1 %v3223_v0  ;;  %2486 = vmatpush3.bf16.msra.mxu0 %v3446_v2 }
 0x1ea   :  { %2487 = vmatprep.subr.bf16.mxu0 %v3223_v0 }
 0x1ec   :  { %2710 = vmatpush3.bf16.msra.mxu1 %v3313_v17 }
 0x1ed   :  { %2711 = vmatprep.subr.bf16.mxu1 %v3223_v0  ;;  %2488 = vmatpush3.bf16.msra.mxu0 %v3459_v7 }
 0x1ee   :  { %2489 = vmatprep.subr.bf16.mxu0 %v3223_v0 }
 0x1f0   :  { %2712 = vmatpush3.bf16.msra.mxu1 %v3319_v20 }
 0x1f1   :  { %2713 = vmatprep.subr.bf16.mxu1 %v3223_v0  ;;  %2490 = vmatpush3.bf16.msra.mxu0 %v3470_v11 }
 0x1f2   :  { %2491 = vmatprep.subr.bf16.mxu0 %v3223_v0 }
 0x1f4   :  { %2714 = vmatpush3.bf16.msra.mxu1 %v3325_v23 }
 0x1f5   :  { %2715 = vmatprep.subr.bf16.mxu1 %v3223_v0  ;;  %2492 = vmatpush3.bf16.msra.mxu0 %v3482_v18 }
 0x1f6   :  { %2493 = vmatprep.subr.bf16.mxu0 %v3223_v0 }
 0x1f8   :  { %2716 = vmatpush3.bf16.msra.mxu1 %v3334_v25 }
 0x1f9   :  { %2741 = vmatprep.subr.bf16.mxu1 %v3223_v0  ;;  %2494 = vmatpush3.bf16.msra.mxu0 %v3495_v24 }
 0x1fa   :  { %2495 = vmatprep.subr.bf16.mxu0 %v3223_v0 }
 0x1fb   :  { %v459_v53 = vpop.f32.mrf.mxu1  ;;  %2718 = vmatmul.mubr.msk.bf16.vlgmr.msra.gmra.mxu1 %vm2045_vm9, %v3225_v32  ;;  %vm2057_vm9 = vmpackc.low %vm1358_vm13, %vm1358_vm13 }
 0x1fc   :  { %v460_v54 = vadd.f32 %v3638_v28, %v459_v53  ;;  %2742 = vmatpush3.bf16.msra.mxu1 %v3291_v6  ;;  %2757 = vmatprep.mubr.msk.bf16.mxu1 %vm3224_vm0, %v3223_v0 }
 0x1fd   :  { %v2479_v56 = vpop.f32.mrf.mxu1  ;;  %2743 = vmatprep.subr.bf16.mxu1 %v3223_v0  ;;  %2496 = vmatpush3.bf16.msra.mxu0 %v3512_v29 }
 0x1fe   :  { %v466_v57 = vadd.f32 %v465_v55, %v460_v54  ;;  %2521 = vmatprep.subr.bf16.mxu0 %v3223_v0  ;;  %v3892_v54 = vld [vmem:[#allocation7 + $0x10] sm:$0xff]   ;;  %v3898_v55 = vld [vmem:[#allocation7 + $0x8] sm:$0xff]   ;;  %v3904_v56 = vld [vmem:[#allocation7] sm:$0xff]  }
 0x1ff   :  { %v462_v59 = vpop.f32.mrf.mxu1 }
 0x200   :  { %v467_v60 = vsub.f32 %v466_v57, %v319_v51  ;;  %2744 = vmatpush3.bf16.msra.mxu1 %v3295_v8 }
 0x201   :  { %v2480_v62 = vpop.f32.mrf.mxu1  ;;  %2745 = vmatprep.subr.bf16.mxu1 %v3223_v0 }
 0x202   :  { %521 = vst [vmem:[#allocation10 + $0x50] sm:$0xff] %v467_v60  ;;  %vm468_vm10 = vcmp.gt.f32.partialorder %v467_v60, 1.0  ;;  %v569_v5 = vmul.f32 0.95, %v467_v60 }
 0x203   :  { %vm2023_vm5 = vmpackc.low %vm468_vm10, %vm468_vm10  ;;  %v469_v63 = vsel %vm468_vm10, 1.0, %v3223_v0 }
 0x204   :  { %2498 = vmatmul.mubr.msk.bf16.vlgmr.msra.gmra.mxu0 %vm2023_vm5, %v3225_v32  ;;  %2746 = vmatpush3.bf16.msra.mxu1 %v3301_v12  ;;  %518 = vst [vmem:[#allocation10 + $0x38] sm:$0xff] %v469_v63  ;;  %vm2061_vm5 = vmpackc.low %vm1462_vm15, %vm1462_vm15 }
 0x205   :  { %2522 = vmatpush3.bf16.msra.mxu0 %v3423_v58  ;;  %2747 = vmatprep.subr.bf16.mxu1 %v3223_v0 }
 0x206   :  { %2523 = vmatprep.subr.bf16.mxu0 %v3223_v0  ;;  %2537 = vmatprep.mubr.msk.bf16.mxu0 %vm3224_vm0, %v3223_v0 }
 0x208   :  { %2748 = vmatpush3.bf16.msra.mxu1 %v3305_v14 }
 0x209   :  { %2524 = vmatpush3.bf16.msra.mxu0 %v3434_v61  ;;  %2749 = vmatprep.subr.bf16.mxu1 %v3223_v0 }
 0x20a   :  { %2525 = vmatprep.subr.bf16.mxu0 %v3223_v0 }
 0x20c   :  { %2750 = vmatpush3.bf16.msra.mxu1 %v3313_v17 }
 0x20d   :  { %2526 = vmatpush3.bf16.msra.mxu0 %v3446_v2  ;;  %2751 = vmatprep.subr.bf16.mxu1 %v3223_v0 }
 0x20e   :  { %2527 = vmatprep.subr.bf16.mxu0 %v3223_v0 }
 0x210   :  { %2752 = vmatpush3.bf16.msra.mxu1 %v3319_v20 }
 0x211   :  { %2528 = vmatpush3.bf16.msra.mxu0 %v3459_v7  ;;  %2753 = vmatprep.subr.bf16.mxu1 %v3223_v0 }
 0x212   :  { %2529 = vmatprep.subr.bf16.mxu0 %v3223_v0 }
 0x214   :  { %2754 = vmatpush3.bf16.msra.mxu1 %v3325_v23 }
 0x215   :  { %2530 = vmatpush3.bf16.msra.mxu0 %v3470_v11  ;;  %2755 = vmatprep.subr.bf16.mxu1 %v3223_v0 }
 0x216   :  { %2531 = vmatprep.subr.bf16.mxu0 %v3223_v0 }
 0x218   :  { %2756 = vmatpush3.bf16.msra.mxu1 %v3334_v25 }
 0x219   :  { %2532 = vmatpush3.bf16.msra.mxu0 %v3482_v18  ;;  %2781 = vmatprep.subr.bf16.mxu1 %v3223_v0 }
 0x21a   :  { %2533 = vmatprep.subr.bf16.mxu0 %v3223_v0 }
 0x21b   :  { %v563_v3 = vpop.f32.mrf.mxu1  ;;  %2758 = vmatmul.mubr.msk.bf16.vlgmr.msra.gmra.mxu1 %vm2049_vm6, %v3225_v32 }
 0x21c   :  { %v564_v4 = vadd.f32 %v3638_v28, %v563_v3  ;;  %2782 = vmatpush3.bf16.msra.mxu1 %v3291_v6  ;;  %2797 = vmatprep.mubr.msk.bf16.mxu1 %vm3224_vm0, %v3223_v0 }
 0x21d   :  { %v2519_v10 = vpop.f32.mrf.mxu1  ;;  %2534 = vmatpush3.bf16.msra.mxu0 %v3495_v24  ;;  %2783 = vmatprep.subr.bf16.mxu1 %v3223_v0 }
 0x21e   :  { %v570_v1 = vadd.f32 %v569_v5, %v564_v4  ;;  %2535 = vmatprep.subr.bf16.mxu0 %v3223_v0 }
 0x21f   :  { %v566_v13 = vpop.f32.mrf.mxu1 }
 0x220   :  { %v571_v15 = vsub.f32 %v570_v1, %v469_v63  ;;  %2784 = vmatpush3.bf16.msra.mxu1 %v3295_v8  ;;  %v3924_v63 = vld [vmem:[%s4255_s6] ss:$0 sm:$0xff] }
 0x221   :  { %v2520_v19 = vpop.f32.mrf.mxu1  ;;  %2536 = vmatpush3.bf16.msra.mxu0 %v3512_v29  ;;  %2785 = vmatprep.subr.bf16.mxu1 %v3223_v0 }
 0x222   :  { %625 = vst [vmem:[#allocation10 + $0x80] sm:$0xff] %v571_v15  ;;  %vm572_vm11 = vcmp.gt.f32.partialorder %v571_v15, 1.0  ;;  %2561 = vmatprep.subr.bf16.mxu0 %v3223_v0  ;;  %v673_v30 = vmul.f32 0.95, %v571_v15 }
 0x223   :  { %vm2027_vm7 = vmpackc.low %vm572_vm11, %vm572_vm11  ;;  %v573_v21 = vsel %vm572_vm11, 1.0, %v3223_v0 }
 0x224   :  { %2538 = vmatmul.mubr.msk.bf16.vlgmr.msra.gmra.mxu0 %vm2027_vm7, %v3225_v32  ;;  %2786 = vmatpush3.bf16.msra.mxu1 %v3301_v12  ;;  %622 = vst [vmem:[#allocation10 + $0x68] sm:$0xff] %v573_v21  ;;  %vm2065_vm11 = vmpackc.low %vm1566_vm1, %vm1566_vm1 }
 0x225   :  { %2562 = vmatpush3.bf16.msra.mxu0 %v3423_v58  ;;  %2787 = vmatprep.subr.bf16.mxu1 %v3223_v0 }
 0x226   :  { %2563 = vmatprep.subr.bf16.mxu0 %v3223_v0  ;;  %2577 = vmatprep.mubr.msk.bf16.mxu0 %vm3224_vm0, %v3223_v0 }
 0x228   :  { %2788 = vmatpush3.bf16.msra.mxu1 %v3305_v14 }
 0x229   :  { %2564 = vmatpush3.bf16.msra.mxu0 %v3434_v61  ;;  %2789 = vmatprep.subr.bf16.mxu1 %v3223_v0 }
 0x22a   :  { %2565 = vmatprep.subr.bf16.mxu0 %v3223_v0 }
 0x22c   :  { %2790 = vmatpush3.bf16.msra.mxu1 %v3313_v17 }
 0x22d   :  { %2566 = vmatpush3.bf16.msra.mxu0 %v3446_v2  ;;  %2791 = vmatprep.subr.bf16.mxu1 %v3223_v0 }
 0x22e   :  { %2567 = vmatprep.subr.bf16.mxu0 %v3223_v0 }
 0x230   :  { %2792 = vmatpush3.bf16.msra.mxu1 %v3319_v20 }
 0x231   :  { %2568 = vmatpush3.bf16.msra.mxu0 %v3459_v7  ;;  %2793 = vmatprep.subr.bf16.mxu1 %v3223_v0 }
 0x232   :  { %2569 = vmatprep.subr.bf16.mxu0 %v3223_v0 }
 0x234   :  { %2794 = vmatpush3.bf16.msra.mxu1 %v3325_v23 }
 0x235   :  { %2570 = vmatpush3.bf16.msra.mxu0 %v3470_v11  ;;  %2795 = vmatprep.subr.bf16.mxu1 %v3223_v0 }
 0x236   :  { %2571 = vmatprep.subr.bf16.mxu0 %v3223_v0 }
 0x238   :  { %2796 = vmatpush3.bf16.msra.mxu1 %v3334_v25 }
 0x239   :  { %2572 = vmatpush3.bf16.msra.mxu0 %v3482_v18  ;;  %2821 = vmatprep.subr.bf16.mxu1 %v3223_v0 }
 0x23a   :  { %2573 = vmatprep.subr.bf16.mxu0 %v3223_v0 }
 0x23b   :  { %v667_v22 = vpop.f32.mrf.mxu1  ;;  %2798 = vmatmul.mubr.msk.bf16.vlgmr.msra.gmra.mxu1 %vm2053_vm14, %v3225_v32 }
 0x23c   :  { %v668_v27 = vadd.f32 %v3638_v28, %v667_v22  ;;  %2822 = vmatpush3.bf16.msra.mxu1 %v3291_v6  ;;  %2837 = vmatprep.mubr.msk.bf16.mxu1 %vm3224_vm0, %v3223_v0 }
 0x23d   :  { %v2559_v31 = vpop.f32.mrf.mxu1  ;;  %2574 = vmatpush3.bf16.msra.mxu0 %v3495_v24  ;;  %2823 = vmatprep.subr.bf16.mxu1 %v3223_v0 }
 0x23e   :  { %v674_v9 = vadd.f32 %v673_v30, %v668_v27  ;;  %2575 = vmatprep.subr.bf16.mxu0 %v3223_v0 }
 0x23f   :  { %v670_v34 = vpop.f32.mrf.mxu1 }
 0x240   :  { %v675_v35 = vsub.f32 %v674_v9, %v573_v21  ;;  %2824 = vmatpush3.bf16.msra.mxu1 %v3295_v8 }
 0x241   :  { %v2560_v36 = vpop.f32.mrf.mxu1  ;;  %2576 = vmatpush3.bf16.msra.mxu0 %v3512_v29  ;;  %2825 = vmatprep.subr.bf16.mxu1 %v3223_v0 }
 0x242   :  { %729 = vst [vmem:[#allocation10 + $0xb0] sm:$0xff] %v675_v35  ;;  %vm676_vm12 = vcmp.gt.f32.partialorder %v675_v35, 1.0  ;;  %2601 = vmatprep.subr.bf16.mxu0 %v3223_v0 }
 0x243   :  { %vm2031_vm8 = vmpackc.low %vm676_vm12, %vm676_vm12  ;;  %v677_v6 = vsel %vm676_vm12, 1.0, %v3223_v0 }
 0x244   :  { %2578 = vmatmul.mubr.msk.bf16.vlgmr.msra.gmra.mxu0 %vm2031_vm8, %v3225_v32  ;;  %2826 = vmatpush3.bf16.msra.mxu1 %v3301_v12  ;;  %726 = vst [vmem:[#allocation10 + $0x98] sm:$0xff] %v677_v6  ;;  %vm2069_vm12 = vmpackc.low %vm1670_vm2, %vm1670_vm2 }
 0x245   :  { %2602 = vmatpush3.bf16.msra.mxu0 %v3423_v58  ;;  %2827 = vmatprep.subr.bf16.mxu1 %v3223_v0 }
 0x246   :  { %2603 = vmatprep.subr.bf16.mxu0 %v3223_v0  ;;  %2617 = vmatprep.mubr.msk.bf16.mxu0 %vm3224_vm0, %v3223_v0 }
 0x248   :  { %2828 = vmatpush3.bf16.msra.mxu1 %v3305_v14  ;;  %v777_v14 = vmul.f32 0.95, %v675_v35 }
 0x249   :  { %2604 = vmatpush3.bf16.msra.mxu0 %v3434_v61  ;;  %2829 = vmatprep.subr.bf16.mxu1 %v3223_v0 }
 0x24a   :  { %2605 = vmatprep.subr.bf16.mxu0 %v3223_v0 }
 0x24c   :  { %2830 = vmatpush3.bf16.msra.mxu1 %v3313_v17  ;;  %v3813_v17 = vld [vmem:[#allocation7 + $0x38] sm:$0xff]  }
 0x24d   :  { %2606 = vmatpush3.bf16.msra.mxu0 %v3446_v2  ;;  %2831 = vmatprep.subr.bf16.mxu1 %v3223_v0 }
 0x24e   :  { %2607 = vmatprep.subr.bf16.mxu0 %v3223_v0 }
 0x250   :  { %2832 = vmatpush3.bf16.msra.mxu1 %v3319_v20 }
 0x251   :  { %2608 = vmatpush3.bf16.msra.mxu0 %v3459_v7  ;;  %2833 = vmatprep.subr.bf16.mxu1 %v3223_v0 }
 0x252   :  { %2609 = vmatprep.subr.bf16.mxu0 %v3223_v0 }
 0x254   :  { %2834 = vmatpush3.bf16.msra.mxu1 %v3325_v23 }
 0x255   :  { %2610 = vmatpush3.bf16.msra.mxu0 %v3470_v11  ;;  %2835 = vmatprep.subr.bf16.mxu1 %v3223_v0 }
 0x256   :  { %2611 = vmatprep.subr.bf16.mxu0 %v3223_v0 }
 0x258   :  { %2836 = vmatpush3.bf16.msra.mxu1 %v3334_v25 }
 0x259   :  { %2612 = vmatpush3.bf16.msra.mxu0 %v3482_v18  ;;  %2861 = vmatprep.subr.bf16.mxu1 %v3223_v0 }
 0x25a   :  { %2613 = vmatprep.subr.bf16.mxu0 %v3223_v0 }
 0x25b   :  { %v771_v8 = vpop.f32.mrf.mxu1  ;;  %2838 = vmatmul.mubr.msk.bf16.vlgmr.msra.gmra.mxu1 %vm2057_vm9, %v3225_v32 }
 0x25c   :  { %v772_v12 = vadd.f32 %v3638_v28, %v771_v8  ;;  %2862 = vmatpush3.bf16.msra.mxu1 %v3813_v17  ;;  %2877 = vmatprep.mubr.msk.bf16.mxu1 %vm3224_vm0, %v3223_v0  ;;  %v3996_v8 = vld [vmem:[#allocation8 + $0x30] sm:$0xff]  }
 0x25d   :  { %v2599_v38 = vpop.f32.mrf.mxu1  ;;  %2614 = vmatpush3.bf16.msra.mxu0 %v3495_v24  ;;  %2863 = vmatprep.subr.bf16.mxu1 %v3223_v0 }
 0x25e   :  { %v778_v16 = vadd.f32 %v777_v14, %v772_v12  ;;  %2615 = vmatprep.subr.bf16.mxu0 %v3223_v0  ;;  %v4003_v38 = vld [vmem:[#allocation8 + $0x28] sm:$0xff]  }
 0x25f   :  { %v774_v39 = vpop.f32.mrf.mxu1 }
 0x260   :  { %v779_v40 = vsub.f32 %v778_v16, %v677_v6  ;;  %2864 = vmatpush3.bf16.msra.mxu1 %v3821_v43  ;;  %v4009_v16 = vld [vmem:[#allocation8 + $0x20] sm:$0xff]   ;;  %v4015_v39 = vld [vmem:[#allocation8 + $0x18] sm:$0xff]  }
 0x261   :  { %v2600_v44 = vpop.f32.mrf.mxu1  ;;  %2616 = vmatpush3.bf16.msra.mxu0 %v3512_v29  ;;  %2865 = vmatprep.subr.bf16.mxu1 %v3223_v0 }
 0x262   :  { %833 = vst [vmem:[#allocation10 + $0xe0] sm:$0xff] %v779_v40  ;;  %vm780_vm13 = vcmp.gt.f32.partialorder %v779_v40, 1.0  ;;  %2641 = vmatprep.subr.bf16.mxu0 %v3223_v0  ;;  %v881_v49 = vmul.f32 0.95, %v779_v40  ;;  %v4021_v40 = vld [vmem:[#allocation8 + $0x10] sm:$0xff]  }
 0x263   :  { %vm2035_vm10 = vmpackc.low %vm780_vm13, %vm780_vm13  ;;  %v781_v45 = vsel %vm780_vm13, 1.0, %v3223_v0 }
 0x264   :  { %2618 = vmatmul.mubr.msk.bf16.vlgmr.msra.gmra.mxu0 %vm2035_vm10, %v3225_v32  ;;  %2866 = vmatpush3.bf16.msra.mxu1 %v3829_v48  ;;  %830 = vst [vmem:[#allocation10 + $0xc8] sm:$0xff] %v781_v45  ;;  %vm2073_vm13 = vmpackc.low %vm1774_vm3, %vm1774_vm3 }
 0x265   :  { %2642 = vmatpush3.bf16.msra.mxu0 %v3423_v58  ;;  %2867 = vmatprep.subr.bf16.mxu1 %v3223_v0 }
 0x266   :  { %2643 = vmatprep.subr.bf16.mxu0 %v3223_v0  ;;  %2657 = vmatprep.mubr.msk.bf16.mxu0 %vm3224_vm0, %v3223_v0 }
 0x268   :  { %2868 = vmatpush3.bf16.msra.mxu1 %v3837_v42 }
 0x269   :  { %2644 = vmatpush3.bf16.msra.mxu0 %v3434_v61  ;;  %2869 = vmatprep.subr.bf16.mxu1 %v3223_v0 }
 0x26a   :  { %2645 = vmatprep.subr.bf16.mxu0 %v3223_v0 }
 0x26c   :  { %2870 = vmatpush3.bf16.msra.mxu1 %v3843_v46 }
 0x26d   :  { %2646 = vmatpush3.bf16.msra.mxu0 %v3446_v2  ;;  %2871 = vmatprep.subr.bf16.mxu1 %v3223_v0 }
 0x26e   :  { %2647 = vmatprep.subr.bf16.mxu0 %v3223_v0 }
 0x270   :  { %2872 = vmatpush3.bf16.msra.mxu1 %v3319_v20 }
 0x271   :  { %2648 = vmatpush3.bf16.msra.mxu0 %v3459_v7  ;;  %2873 = vmatprep.subr.bf16.mxu1 %v3223_v0 }
 0x272   :  { %2649 = vmatprep.subr.bf16.mxu0 %v3223_v0 }
 0x274   :  { %2874 = vmatpush3.bf16.msra.mxu1 %v3325_v23 }
 0x275   :  { %2650 = vmatpush3.bf16.msra.mxu0 %v3470_v11  ;;  %2875 = vmatprep.subr.bf16.mxu1 %v3223_v0 }
 0x276   :  { %2651 = vmatprep.subr.bf16.mxu0 %v3223_v0 }
 0x278   :  { %2876 = vmatpush3.bf16.msra.mxu1 %v3334_v25 }
 0x279   :  { %2652 = vmatpush3.bf16.msra.mxu0 %v3482_v18  ;;  %2901 = vmatprep.subr.bf16.mxu1 %v3223_v0 }
 0x27a   :  { %2653 = vmatprep.subr.bf16.mxu0 %v3223_v0 }
 0x27b   :  { %v875_v20 = vpop.f32.mrf.mxu1  ;;  %2878 = vmatmul.mubr.msk.bf16.vlgmr.msra.gmra.mxu1 %vm2061_vm5, %v3225_v32 }
 0x27c   :  { %v876_v23 = vadd.f32 %v3638_v28, %v875_v20  ;;  %2902 = vmatpush3.bf16.msra.mxu1 %v3813_v17  ;;  %2917 = vmatprep.mubr.msk.bf16.mxu1 %vm3224_vm0, %v3223_v0 }
 0x27d   :  { %v2639_v25 = vpop.f32.mrf.mxu1  ;;  %2654 = vmatpush3.bf16.msra.mxu0 %v3495_v24  ;;  %2903 = vmatprep.subr.bf16.mxu1 %v3223_v0 }
 0x27e   :  { %v882_v26 = vadd.f32 %v881_v49, %v876_v23  ;;  %2655 = vmatprep.subr.bf16.mxu0 %v3223_v0  ;;  %v4034_v49 = vld [vmem:[#allocation8 + $0x8] sm:$0xff]  }
 0x27f   :  { %v878_v50 = vpop.f32.mrf.mxu1 }
 0x280   :  { %v883_v51 = vsub.f32 %v882_v26, %v781_v45  ;;  %2904 = vmatpush3.bf16.msra.mxu1 %v3821_v43 }
 0x281   :  { %v2640_v52 = vpop.f32.mrf.mxu1  ;;  %2656 = vmatpush3.bf16.msra.mxu0 %v3512_v29  ;;  %2905 = vmatprep.subr.bf16.mxu1 %v3223_v0 }
 0x282   :  { %937 = vst [vmem:[#allocation10 + $0x110] sm:$0xff] %v883_v51  ;;  %vm884_vm15 = vcmp.gt.f32.partialorder %v883_v51, 1.0  ;;  %2681 = vmatprep.subr.bf16.mxu0 %v3223_v0  ;;  %v985_v60 = vmul.f32 0.95, %v883_v51  ;;  %v4040_v51 = vld [vmem:[#allocation8] sm:$0xff]  }
 0x283   :  { %vm2039_vm6 = vmpackc.low %vm884_vm15, %vm884_vm15  ;;  %v885_v53 = vsel %vm884_vm15, 1.0, %v3223_v0 }
 0x284   :  { %2658 = vmatmul.mubr.msk.bf16.vlgmr.msra.gmra.mxu0 %vm2039_vm6, %v3225_v32  ;;  %2906 = vmatpush3.bf16.msra.mxu1 %v3829_v48  ;;  %934 = vst [vmem:[#allocation10 + $0xf8] sm:$0xff] %v885_v53  ;;  %vm2077_vm15 = vmpackc.low %vm1878_vm4, %vm1878_vm4 }
 0x285   :  { %2682 = vmatpush3.bf16.msra.mxu0 %v3423_v58  ;;  %2907 = vmatprep.subr.bf16.mxu1 %v3223_v0 }
 0x286   :  { %2683 = vmatprep.subr.bf16.mxu0 %v3223_v0  ;;  %2697 = vmatprep.mubr.msk.bf16.mxu0 %vm3224_vm0, %v3223_v0 }
 0x288   :  { %2908 = vmatpush3.bf16.msra.mxu1 %v3837_v42 }
 0x289   :  { %2684 = vmatpush3.bf16.msra.mxu0 %v3434_v61  ;;  %2909 = vmatprep.subr.bf16.mxu1 %v3223_v0 }
 0x28a   :  { %2685 = vmatprep.subr.bf16.mxu0 %v3223_v0 }
 0x28c   :  { %2910 = vmatpush3.bf16.msra.mxu1 %v3843_v46 }
 0x28d   :  { %2686 = vmatpush3.bf16.msra.mxu0 %v3446_v2  ;;  %2911 = vmatprep.subr.bf16.mxu1 %v3223_v0 }
 0x28e   :  { %2687 = vmatprep.subr.bf16.mxu0 %v3223_v0 }
 0x290   :  { %2912 = vmatpush3.bf16.msra.mxu1 %v3892_v54 }
 0x291   :  { %2688 = vmatpush3.bf16.msra.mxu0 %v3459_v7  ;;  %2913 = vmatprep.subr.bf16.mxu1 %v3223_v0 }
 0x292   :  { %2689 = vmatprep.subr.bf16.mxu0 %v3223_v0 }
 0x294   :  { %2914 = vmatpush3.bf16.msra.mxu1 %v3898_v55 }
 0x295   :  { %2690 = vmatpush3.bf16.msra.mxu0 %v3470_v11  ;;  %2915 = vmatprep.subr.bf16.mxu1 %v3223_v0 }
 0x296   :  { %2691 = vmatprep.subr.bf16.mxu0 %v3223_v0 }
 0x298   :  { %2916 = vmatpush3.bf16.msra.mxu1 %v3904_v56 }
 0x299   :  { %2692 = vmatpush3.bf16.msra.mxu0 %v3482_v18  ;;  %2941 = vmatprep.subr.bf16.mxu1 %v3223_v0 }
 0x29a   :  { %2693 = vmatprep.subr.bf16.mxu0 %v3223_v0 }
 0x29b   :  { %v979_v57 = vpop.f32.mrf.mxu1  ;;  %2918 = vmatmul.mubr.msk.bf16.vlgmr.msra.gmra.mxu1 %vm2065_vm11, %v3225_v32 }
 0x29c   :  { %v980_v59 = vadd.f32 %v3638_v28, %v979_v57  ;;  %2942 = vmatpush3.bf16.msra.mxu1 %v3813_v17  ;;  %2957 = vmatprep.mubr.msk.bf16.mxu1 %vm3224_vm0, %v3223_v0 }
 0x29d   :  { %v2679_v62 = vpop.f32.mrf.mxu1  ;;  %2694 = vmatpush3.bf16.msra.mxu0 %v3495_v24  ;;  %2943 = vmatprep.subr.bf16.mxu1 %v3223_v0 }
 0x29e   :  { %v986_v33 = vadd.f32 %v985_v60, %v980_v59  ;;  %2695 = vmatprep.subr.bf16.mxu0 %v3223_v0 }
 0x29f   :  { %v982_v3 = vpop.f32.mrf.mxu1 }
 0x2a0   :  { %v987_v4 = vsub.f32 %v986_v33, %v885_v53  ;;  %2944 = vmatpush3.bf16.msra.mxu1 %v3821_v43  ;;  %v403_v5 = vpop.f32.mrf.mxu0 }
 0x2a1   :  { %v3928_v10 = vadd.f32 %v3924_v63, %v403_v5  ;;  %v2680_v1 = vpop.f32.mrf.mxu1  ;;  %2696 = vmatpush3.bf16.msra.mxu0 %v3512_v29  ;;  %2945 = vmatprep.subr.bf16.mxu1 %v3223_v0 }
 0x2a2   :  { %1041 = vst [vmem:[#allocation10 + $0x140] sm:$0xff] %v987_v4  ;;  %v2459_v13 = vpop.f32.mrf.mxu0  ;;  %vm988_vm1 = vcmp.gt.f32.partialorder %v987_v4, 1.0  ;;  %2721 = vmatprep.subr.bf16.mxu0 %v3223_v0 }
 0x2a3   :  { %vm411_vm7 = vcmp.gt.f32.partialorder %v3928_v10, 1.0  ;;  %418 = vst [vmem:[#allocation10 + $0x28] sm:$0xff] %v3928_v10  ;;  %vm2043_vm14 = vmpackc.low %vm988_vm1, %vm988_vm1  ;;  %v989_v15 = vsel %vm988_vm1, 1.0, %v3223_v0  ;;  %v511_v9 = vmul.f32 0.95, %v3928_v10 }
 0x2a4   :  { %v3937_v19 = vsel %vm411_vm7, 1.0, %v3223_v0  ;;  %2698 = vmatmul.mubr.msk.bf16.vlgmr.msra.gmra.mxu0 %vm2043_vm14, %v3225_v32  ;;  %2946 = vmatpush3.bf16.msra.mxu1 %v3829_v48  ;;  %v406_v21 = vpop.f32.mrf.mxu0  ;;  %1038 = vst [vmem:[#allocation10 + $0x128] sm:$0xff] %v989_v15 }
 0x2a5   :  { %415 = vst [vmem:[#allocation10 + $0x10] sm:$0xff] %v3937_v19  ;;  %2722 = vmatpush3.bf16.msra.mxu0 %v3423_v58  ;;  %2947 = vmatprep.subr.bf16.mxu1 %v3223_v0 }
 0x2a6   :  { %v2460_v22 = vpop.f32.mrf.mxu0  ;;  %2723 = vmatprep.subr.bf16.mxu0 %v3223_v0  ;;  %2737 = vmatprep.mubr.msk.bf16.mxu0 %vm3224_vm0, %v3223_v0 }
 0x2a8   :  { %2948 = vmatpush3.bf16.msra.mxu1 %v3837_v42 }
 0x2a9   :  { %2724 = vmatpush3.bf16.msra.mxu0 %v3434_v61  ;;  %2949 = vmatprep.subr.bf16.mxu1 %v3223_v0 }
 0x2aa   :  { %2725 = vmatprep.subr.bf16.mxu0 %v3223_v0 }
 0x2ac   :  { %2950 = vmatpush3.bf16.msra.mxu1 %v3843_v46 }
 0x2ad   :  { %2726 = vmatpush3.bf16.msra.mxu0 %v3446_v2  ;;  %2951 = vmatprep.subr.bf16.mxu1 %v3223_v0  ;;  %v1089_v2 = vmul.f32 0.95, %v987_v4 }
 0x2ae   :  { %2727 = vmatprep.subr.bf16.mxu0 %v3223_v0 }
 0x2b0   :  { %2952 = vmatpush3.bf16.msra.mxu1 %v3892_v54 }
 0x2b1   :  { %2728 = vmatpush3.bf16.msra.mxu0 %v3459_v7  ;;  %2953 = vmatprep.subr.bf16.mxu1 %v3223_v0 }
 0x2b2   :  { %2729 = vmatprep.subr.bf16.mxu0 %v3223_v0 }
 0x2b4   :  { %2954 = vmatpush3.bf16.msra.mxu1 %v3898_v55 }
 0x2b5   :  { %2730 = vmatpush3.bf16.msra.mxu0 %v3470_v11  ;;  %2955 = vmatprep.subr.bf16.mxu1 %v3223_v0 }
 0x2b6   :  { %2731 = vmatprep.subr.bf16.mxu0 %v3223_v0 }
 0x2b8   :  { %2956 = vmatpush3.bf16.msra.mxu1 %v3904_v56 }
 0x2b9   :  { %2732 = vmatpush3.bf16.msra.mxu0 %v3482_v18  ;;  %2981 = vmatprep.subr.bf16.mxu1 %v3223_v0 }
 0x2ba   :  { %2733 = vmatprep.subr.bf16.mxu0 %v3223_v0 }
 0x2bb   :  { %v1083_v58 = vpop.f32.mrf.mxu1  ;;  %2958 = vmatmul.mubr.msk.bf16.vlgmr.msra.gmra.mxu1 %vm2069_vm12, %v3225_v32 }
 0x2bc   :  { %v1084_v61 = vadd.f32 %v3638_v28, %v1083_v58  ;;  %2982 = vmatpush3.bf16.msra.mxu1 %v3813_v17  ;;  %2997 = vmatprep.mubr.msk.bf16.mxu1 %vm3224_vm0, %v3223_v0 }
 0x2bd   :  { %v2719_v7 = vpop.f32.mrf.mxu1  ;;  %2734 = vmatpush3.bf16.msra.mxu0 %v3495_v24  ;;  %2983 = vmatprep.subr.bf16.mxu1 %v3223_v0 }
 0x2be   :  { %v1090_v11 = vadd.f32 %v1089_v2, %v1084_v61  ;;  %2735 = vmatprep.subr.bf16.mxu0 %v3223_v0  ;;  %v4104_v2 = vld [vmem:[%s4253_s4] ss:$0 sm:$0xff] }
 0x2bf   :  { %v1086_v18 = vpop.f32.mrf.mxu1 }
 0x2c0   :  { %v1091_v37 = vsub.f32 %v1090_v11, %v989_v15  ;;  %2984 = vmatpush3.bf16.msra.mxu1 %v3821_v43 }
 0x2c1   :  { %v2720_v27 = vpop.f32.mrf.mxu1  ;;  %2736 = vmatpush3.bf16.msra.mxu0 %v3512_v29  ;;  %2985 = vmatprep.subr.bf16.mxu1 %v3223_v0  ;;  %v3987_v29 = vld [vmem:[#allocation8 + $0x38] sm:$0xff]  }
 0x2c2   :  { %1145 = vst [vmem:[#allocation10 + $0x170] sm:$0xff] %v1091_v37  ;;  %vm1092_vm2 = vcmp.gt.f32.partialorder %v1091_v37, 1.0  ;;  %2761 = vmatprep.subr.bf16.mxu0 %v3223_v0  ;;  %v1193_v20 = vmul.f32 0.95, %v1091_v37 }
 0x2c3   :  { %vm2047_vm8 = vmpackc.low %vm1092_vm2, %vm1092_vm2  ;;  %v1093_v24 = vsel %vm1092_vm2, 1.0, %v3223_v0 }
 0x2c4   :  { %v505_v30 = vpop.f32.mrf.mxu0  ;;  %2738 = vmatmul.mubr.msk.bf16.vlgmr.msra.gmra.mxu0 %vm2047_vm8, %v3225_v32  ;;  %2986 = vmatpush3.bf16.msra.mxu1 %v3829_v48  ;;  %1142 = vst [vmem:[#allocation10 + $0x158] sm:$0xff] %v1093_v24 }
 0x2c5   :  { %v506_v31 = vadd.f32 %v3924_v63, %v505_v30  ;;  %2762 = vmatpush3.bf16.msra.mxu0 %v3987_v29  ;;  %2987 = vmatprep.subr.bf16.mxu1 %v3223_v0 }
 0x2c6   :  { %v2499_v34 = vpop.f32.mrf.mxu0  ;;  %2763 = vmatprep.subr.bf16.mxu0 %v3223_v0  ;;  %2777 = vmatprep.mubr.msk.bf16.mxu0 %vm3224_vm0, %v3223_v0 }
 0x2c7   :  { %v512_v35 = vadd.f32 %v511_v9, %v506_v31 }
 0x2c8   :  { %v508_v36 = vpop.f32.mrf.mxu0  ;;  %2988 = vmatpush3.bf16.msra.mxu1 %v3837_v42 }
 0x2c9   :  { %v513_v6 = vsub.f32 %v512_v35, %v3937_v19  ;;  %2764 = vmatpush3.bf16.msra.mxu0 %v3996_v8  ;;  %2989 = vmatprep.subr.bf16.mxu1 %v3223_v0 }
 0x2ca   :  { %v2500_v12 = vpop.f32.mrf.mxu0  ;;  %2765 = vmatprep.subr.bf16.mxu0 %v3223_v0 }
 0x2cb   :  { %522 = vst [vmem:[#allocation10 + $0x58] sm:$0xff] %v513_v6  ;;  %vm514_vm9 = vcmp.gt.f32.partialorder %v513_v6, 1.0  ;;  %v615_v53 = vmul.f32 0.95, %v513_v6 }
 0x2cc   :  { %2990 = vmatpush3.bf16.msra.mxu1 %v3843_v46  ;;  %v515_v14 = vsel %vm514_vm9, 1.0, %v3223_v0 }
 0x2cd   :  { %2766 = vmatpush3.bf16.msra.mxu0 %v4003_v38  ;;  %2991 = vmatprep.subr.bf16.mxu1 %v3223_v0  ;;  %519 = vst [vmem:[#allocation10 + $0x40] sm:$0xff] %v515_v14 }
 0x2ce   :  { %2767 = vmatprep.subr.bf16.mxu0 %v3223_v0 }
 0x2d0   :  { %2992 = vmatpush3.bf16.msra.mxu1 %v3892_v54 }
 0x2d1   :  { %2768 = vmatpush3.bf16.msra.mxu0 %v4009_v16  ;;  %2993 = vmatprep.subr.bf16.mxu1 %v3223_v0 }
 0x2d2   :  { %2769 = vmatprep.subr.bf16.mxu0 %v3223_v0 }
 0x2d4   :  { %2994 = vmatpush3.bf16.msra.mxu1 %v3898_v55 }
 0x2d5   :  { %2770 = vmatpush3.bf16.msra.mxu0 %v4015_v39  ;;  %2995 = vmatprep.subr.bf16.mxu1 %v3223_v0 }
 0x2d6   :  { %2771 = vmatprep.subr.bf16.mxu0 %v3223_v0 }
 0x2d8   :  { %2996 = vmatpush3.bf16.msra.mxu1 %v3904_v56 }
 0x2d9   :  { %2772 = vmatpush3.bf16.msra.mxu0 %v4021_v40  ;;  %3021 = vmatprep.subr.bf16.mxu1 %v3223_v0 }
 0x2da   :  { %2773 = vmatprep.subr.bf16.mxu0 %v3223_v0 }
 0x2db   :  { %v1187_v44 = vpop.f32.mrf.mxu1  ;;  %2998 = vmatmul.mubr.msk.bf16.vlgmr.msra.gmra.mxu1 %vm2073_vm13, %v3225_v32 }
 0x2dc   :  { %v1188_v45 = vadd.f32 %v3638_v28, %v1187_v44  ;;  %3022 = vmatpush3.bf16.msra.mxu1 %v3813_v17  ;;  %3037 = vmatprep.mubr.msk.bf16.mxu1 %vm3224_vm0, %v3223_v0 }
 0x2dd   :  { %v2759_v23 = vpop.f32.mrf.mxu1  ;;  %2774 = vmatpush3.bf16.msra.mxu0 %v4034_v49  ;;  %3023 = vmatprep.subr.bf16.mxu1 %v3223_v0 }
 0x2de   :  { %v1194_v41 = vadd.f32 %v1193_v20, %v1188_v45  ;;  %2775 = vmatprep.subr.bf16.mxu0 %v3223_v0 }
 0x2df   :  { %v1190_v25 = vpop.f32.mrf.mxu1 }
 0x2e0   :  { %v1195_v26 = vsub.f32 %v1194_v41, %v1093_v24  ;;  %3024 = vmatpush3.bf16.msra.mxu1 %v3821_v43 }
 0x2e1   :  { %v2760_v50 = vpop.f32.mrf.mxu1  ;;  %2776 = vmatpush3.bf16.msra.mxu0 %v4040_v51  ;;  %3025 = vmatprep.subr.bf16.mxu1 %v3223_v0 }
 0x2e2   :  { %1249 = vst [vmem:[#allocation10 + $0x1a0] sm:$0xff] %v1195_v26  ;;  %vm1196_vm3 = vcmp.gt.f32.partialorder %v1195_v26, 1.0  ;;  %2801 = vmatprep.subr.bf16.mxu0 %v3223_v0 }
 0x2e3   :  { %vm2051_vm10 = vmpackc.low %vm1196_vm3, %vm1196_vm3  ;;  %v1197_v17 = vsel %vm1196_vm3, 1.0, %v3223_v0 }
 0x2e4   :  { %v609_v52 = vpop.f32.mrf.mxu0  ;;  %2778 = vmatmul.mubr.msk.bf16.vlgmr.msra.gmra.mxu0 %vm2051_vm10, %v3225_v32  ;;  %3026 = vmatpush3.bf16.msra.mxu1 %v3829_v48  ;;  %1246 = vst [vmem:[#allocation10 + $0x188] sm:$0xff] %v1197_v17 }
 0x2e5   :  { %v610_v43 = vadd.f32 %v3924_v63, %v609_v52  ;;  %2802 = vmatpush3.bf16.msra.mxu0 %v3987_v29  ;;  %3027 = vmatprep.subr.bf16.mxu1 %v3223_v0 }
 0x2e6   :  { %v2539_v57 = vpop.f32.mrf.mxu0  ;;  %2803 = vmatprep.subr.bf16.mxu0 %v3223_v0  ;;  %2817 = vmatprep.mubr.msk.bf16.mxu0 %vm3224_vm0, %v3223_v0 }
 0x2e7   :  { %v616_v59 = vadd.f32 %v615_v53, %v610_v43 }
 0x2e8   :  { %v612_v60 = vpop.f32.mrf.mxu0  ;;  %3028 = vmatpush3.bf16.msra.mxu1 %v3837_v42 }
 0x2e9   :  { %v617_v62 = vsub.f32 %v616_v59, %v515_v14  ;;  %2804 = vmatpush3.bf16.msra.mxu0 %v3996_v8  ;;  %3029 = vmatprep.subr.bf16.mxu1 %v3223_v0 }
 0x2ea   :  { %v2540_v48 = vpop.f32.mrf.mxu0  ;;  %2805 = vmatprep.subr.bf16.mxu0 %v3223_v0 }
 0x2eb   :  { %626 = vst [vmem:[#allocation10 + $0x88] sm:$0xff] %v617_v62  ;;  %vm618_vm5 = vcmp.gt.f32.partialorder %v617_v62, 1.0  ;;  %v719_v1 = vmul.f32 0.95, %v617_v62 }
 0x2ec   :  { %3030 = vmatpush3.bf16.msra.mxu1 %v3843_v46  ;;  %v619_v33 = vsel %vm618_vm5, 1.0, %v3223_v0 }
 0x2ed   :  { %2806 = vmatpush3.bf16.msra.mxu0 %v4003_v38  ;;  %3031 = vmatprep.subr.bf16.mxu1 %v3223_v0  ;;  %623 = vst [vmem:[#allocation10 + $0x70] sm:$0xff] %v619_v33 }
 0x2ee   :  { %2807 = vmatprep.subr.bf16.mxu0 %v3223_v0 }
 0x2f0   :  { %3032 = vmatpush3.bf16.msra.mxu1 %v3892_v54  ;;  %v1297_v54 = vmul.f32 0.95, %v1195_v26 }
 0x2f1   :  { %2808 = vmatpush3.bf16.msra.mxu0 %v4009_v16  ;;  %3033 = vmatprep.subr.bf16.mxu1 %v3223_v0 }
 0x2f2   :  { %2809 = vmatprep.subr.bf16.mxu0 %v3223_v0 }
 0x2f4   :  { %3034 = vmatpush3.bf16.msra.mxu1 %v3898_v55 }
 0x2f5   :  { %2810 = vmatpush3.bf16.msra.mxu0 %v4015_v39  ;;  %3035 = vmatprep.subr.bf16.mxu1 %v3223_v0 }
 0x2f6   :  { %2811 = vmatprep.subr.bf16.mxu0 %v3223_v0 }
 0x2f8   :  { %3036 = vmatpush3.bf16.msra.mxu1 %v3904_v56 }
 0x2f9   :  { %2812 = vmatpush3.bf16.msra.mxu0 %v4021_v40 }
 0x2fa   :  { %2813 = vmatprep.subr.bf16.mxu0 %v3223_v0 }
 0x2fb   :  { %v1291_v42 = vpop.f32.mrf.mxu1  ;;  %3038 = vmatmul.mubr.msk.bf16.vlgmr.msra.gmra.mxu1 %vm2077_vm15, %v3225_v32 }
 0x2fc   :  { %v1292_v46 = vadd.f32 %v3638_v28, %v1291_v42 }
 0x2fd   :  { %v2799_v55 = vpop.f32.mrf.mxu1  ;;  %2814 = vmatpush3.bf16.msra.mxu0 %v4034_v49 }
 0x2fe   :  { %v1298_v3 = vadd.f32 %v1297_v54, %v1292_v46  ;;  %2815 = vmatprep.subr.bf16.mxu0 %v3223_v0 }
 0x2ff   :  { %v1294_v56 = vpop.f32.mrf.mxu1 }
 0x300   :  { %v1299_v4 = vsub.f32 %v1298_v3, %v1197_v17 }
 0x301   :  { %v2800_v5 = vpop.f32.mrf.mxu1  ;;  %2816 = vmatpush3.bf16.msra.mxu0 %v4040_v51 }
 0x302   :  { %1353 = vst [vmem:[#allocation10 + $0x1d0] sm:$0xff] %v1299_v4  ;;  %vm1300_vm4 = vcmp.gt.f32.partialorder %v1299_v4, 1.0  ;;  %2841 = vmatprep.subr.bf16.mxu0 %v3223_v0  ;;  %v1401_v11 = vmul.f32 0.95, %v1299_v4 }
 0x303   :  { %vm2055_vm6 = vmpackc.low %vm1300_vm4, %vm1300_vm4  ;;  %v1301_v47 = vsel %vm1300_vm4, 1.0, %v3223_v0 }
 0x304   :  { %v713_v28 = vpop.f32.mrf.mxu0  ;;  %2818 = vmatmul.mubr.msk.bf16.vlgmr.msra.gmra.mxu0 %vm2055_vm6, %v3225_v32  ;;  %1350 = vst [vmem:[#allocation10 + $0x1b8] sm:$0xff] %v1301_v47 }
 0x305   :  { %v714_v10 = vadd.f32 %v3924_v63, %v713_v28  ;;  %2842 = vmatpush3.bf16.msra.mxu0 %v3987_v29  ;;  %2857 = vmatprep.mubr.msk.bf16.mxu0 %vm3224_vm0, %v3223_v0 }
 0x306   :  { %v2579_v13 = vpop.f32.mrf.mxu0  ;;  %2843 = vmatprep.subr.bf16.mxu0 %v3223_v0 }
 0x307   :  { %v720_v15 = vadd.f32 %v719_v1, %v714_v10 }
 0x308   :  { %v716_v19 = vpop.f32.mrf.mxu0 }
 0x309   :  { %v721_v21 = vsub.f32 %v720_v15, %v619_v33  ;;  %2844 = vmatpush3.bf16.msra.mxu0 %v3996_v8 }
 0x30a   :  { %v2580_v22 = vpop.f32.mrf.mxu0  ;;  %2845 = vmatprep.subr.bf16.mxu0 %v3223_v0 }
 0x30b   :  { %730 = vst [vmem:[#allocation10 + $0xb8] sm:$0xff] %v721_v21  ;;  %vm722_vm11 = vcmp.gt.f32.partialorder %v721_v21, 1.0  ;;  %v823_v35 = vmul.f32 0.95, %v721_v21 }
 0x30c   :  { %v723_v58 = vsel %vm722_vm11, 1.0, %v3223_v0 }
 0x30d   :  { %2846 = vmatpush3.bf16.msra.mxu0 %v4003_v38  ;;  %727 = vst [vmem:[#allocation10 + $0xa0] sm:$0xff] %v723_v58 }
 0x30e   :  { %2847 = vmatprep.subr.bf16.mxu0 %v3223_v0 }
 0x311   :  { %2848 = vmatpush3.bf16.msra.mxu0 %v4009_v16 }
 0x312   :  { %2849 = vmatprep.subr.bf16.mxu0 %v3223_v0 }
 0x315   :  { %2850 = vmatpush3.bf16.msra.mxu0 %v4015_v39 }
 0x316   :  { %2851 = vmatprep.subr.bf16.mxu0 %v3223_v0 }
 0x319   :  { %2852 = vmatpush3.bf16.msra.mxu0 %v4021_v40 }
 0x31a   :  { %2853 = vmatprep.subr.bf16.mxu0 %v3223_v0 }
 0x31b   :  { %v1395_v61 = vpop.f32.mrf.mxu1 }
 0x31c   :  { %v1396_v7 = vadd.f32 %v4104_v2, %v1395_v61 }
 0x31d   :  { %v2839_v18 = vpop.f32.mrf.mxu1  ;;  %2854 = vmatpush3.bf16.msra.mxu0 %v4034_v49 }
 0x31e   :  { %v1402_v37 = vadd.f32 %v1401_v11, %v1396_v7  ;;  %2855 = vmatprep.subr.bf16.mxu0 %v3223_v0 }
 0x31f   :  { %v1398_v27 = vpop.f32.mrf.mxu1 }
 0x320   :  { %v1403_v24 = vsub.f32 %v1402_v37, %v1301_v47 }
 0x321   :  { %v2840_v30 = vpop.f32.mrf.mxu1  ;;  %2856 = vmatpush3.bf16.msra.mxu0 %v4040_v51 }
 0x322   :  { %1457 = vst [vmem:[#allocation10 + $0x200] sm:$0xff] %v1403_v24  ;;  %vm1404_vm1 = vcmp.gt.f32.partialorder %v1403_v24, 1.0  ;;  %2881 = vmatprep.subr.bf16.mxu0 %v3223_v0  ;;  %v1505_v41 = vmul.f32 0.95, %v1403_v24 }
 0x323   :  { %vm2059_vm7 = vmpackc.low %vm1404_vm1, %vm1404_vm1  ;;  %v1405_v31 = vsel %vm1404_vm1, 1.0, %v3223_v0 }
 0x324   :  { %v817_v9 = vpop.f32.mrf.mxu0  ;;  %2858 = vmatmul.mubr.msk.bf16.vlgmr.msra.gmra.mxu0 %vm2059_vm7, %v3225_v32  ;;  %1454 = vst [vmem:[#allocation10 + $0x1e8] sm:$0xff] %v1405_v31 }
 0x325   :  { %v818_v34 = vadd.f32 %v3924_v63, %v817_v9  ;;  %2882 = vmatpush3.bf16.msra.mxu0 %v3987_v29  ;;  %2897 = vmatprep.mubr.msk.bf16.mxu0 %vm3224_vm0, %v3223_v0 }
 0x326   :  { %v2619_v36 = vpop.f32.mrf.mxu0  ;;  %2883 = vmatprep.subr.bf16.mxu0 %v3223_v0 }
 0x327   :  { %v824_v6 = vadd.f32 %v823_v35, %v818_v34 }
 0x328   :  { %v820_v12 = vpop.f32.mrf.mxu0 }
 0x329   :  { %v825_v14 = vsub.f32 %v824_v6, %v723_v58  ;;  %2884 = vmatpush3.bf16.msra.mxu0 %v3996_v8 }
 0x32a   :  { %v2620_v44 = vpop.f32.mrf.mxu0  ;;  %2885 = vmatprep.subr.bf16.mxu0 %v3223_v0 }
 0x32b   :  { %834 = vst [vmem:[#allocation10 + $0xe8] sm:$0xff] %v825_v14  ;;  %vm826_vm14 = vcmp.gt.f32.partialorder %v825_v14, 1.0  ;;  %v927_v59 = vmul.f32 0.95, %v825_v14 }
 0x32c   :  { %v827_v45 = vsel %vm826_vm14, 1.0, %v3223_v0 }
 0x32d   :  { %2886 = vmatpush3.bf16.msra.mxu0 %v4003_v38  ;;  %831 = vst [vmem:[#allocation10 + $0xd0] sm:$0xff] %v827_v45 }
 0x32e   :  { %2887 = vmatprep.subr.bf16.mxu0 %v3223_v0 }
 0x331   :  { %2888 = vmatpush3.bf16.msra.mxu0 %v4009_v16 }
 0x332   :  { %2889 = vmatprep.subr.bf16.mxu0 %v3223_v0 }
 0x335   :  { %2890 = vmatpush3.bf16.msra.mxu0 %v4015_v39 }
 0x336   :  { %2891 = vmatprep.subr.bf16.mxu0 %v3223_v0 }
 0x339   :  { %2892 = vmatpush3.bf16.msra.mxu0 %v4021_v40 }
 0x33a   :  { %2893 = vmatprep.subr.bf16.mxu0 %v3223_v0 }
 0x33b   :  { %v1499_v20 = vpop.f32.mrf.mxu1 }
 0x33c   :  { %v1500_v23 = vadd.f32 %v4104_v2, %v1499_v20 }
 0x33d   :  { %v2879_v25 = vpop.f32.mrf.mxu1  ;;  %2894 = vmatpush3.bf16.msra.mxu0 %v4034_v49 }
 0x33e   :  { %v1506_v26 = vadd.f32 %v1505_v41, %v1500_v23  ;;  %2895 = vmatprep.subr.bf16.mxu0 %v3223_v0 }
 0x33f   :  { %v1502_v50 = vpop.f32.mrf.mxu1 }
 0x340   :  { %v1507_v17 = vsub.f32 %v1506_v26, %v1405_v31 }
 0x341   :  { %v2880_v52 = vpop.f32.mrf.mxu1  ;;  %2896 = vmatpush3.bf16.msra.mxu0 %v4040_v51 }
 0x342   :  { %1561 = vst [vmem:[#allocation10 + $0x230] sm:$0xff] %v1507_v17  ;;  %vm1508_vm12 = vcmp.gt.f32.partialorder %v1507_v17, 1.0  ;;  %2921 = vmatprep.subr.bf16.mxu0 %v3223_v0  ;;  %v1609_v3 = vmul.f32 0.95, %v1507_v17 }
 0x343   :  { %vm2063_vm2 = vmpackc.low %vm1508_vm12, %vm1508_vm12  ;;  %v1509_v43 = vsel %vm1508_vm12, 1.0, %v3223_v0 }
 0x344   :  { %v921_v53 = vpop.f32.mrf.mxu0  ;;  %2898 = vmatmul.mubr.msk.bf16.vlgmr.msra.gmra.mxu0 %vm2063_vm2, %v3225_v32  ;;  %1558 = vst [vmem:[#allocation10 + $0x218] sm:$0xff] %v1509_v43 }
 0x345   :  { %v922_v57 = vadd.f32 %v3924_v63, %v921_v53  ;;  %2922 = vmatpush3.bf16.msra.mxu0 %v3987_v29  ;;  %2937 = vmatprep.mubr.msk.bf16.mxu0 %vm3224_vm0, %v3223_v0 }
 0x346   :  { %v2659_v60 = vpop.f32.mrf.mxu0  ;;  %2923 = vmatprep.subr.bf16.mxu0 %v3223_v0 }
 0x347   :  { %v928_v62 = vadd.f32 %v927_v59, %v922_v57 }
 0x348   :  { %v924_v48 = vpop.f32.mrf.mxu0 }
 0x349   :  { %v929_v33 = vsub.f32 %v928_v62, %v827_v45  ;;  %2924 = vmatpush3.bf16.msra.mxu0 %v3996_v8 }
 0x34a   :  { %v2660_v42 = vpop.f32.mrf.mxu0  ;;  %2925 = vmatprep.subr.bf16.mxu0 %v3223_v0 }
 0x34b   :  { %938 = vst [vmem:[#allocation10 + $0x118] sm:$0xff] %v929_v33  ;;  %vm930_vm8 = vcmp.gt.f32.partialorder %v929_v33, 1.0  ;;  %v1031_v15 = vmul.f32 0.95, %v929_v33 }
 0x34c   :  { %v931_v46 = vsel %vm930_vm8, 1.0, %v3223_v0 }
 0x34d   :  { %2926 = vmatpush3.bf16.msra.mxu0 %v4003_v38  ;;  %935 = vst [vmem:[#allocation10 + $0x100] sm:$0xff] %v931_v46 }
 0x34e   :  { %2927 = vmatprep.subr.bf16.mxu0 %v3223_v0 }
 0x351   :  { %2928 = vmatpush3.bf16.msra.mxu0 %v4009_v16 }
 0x352   :  { %2929 = vmatprep.subr.bf16.mxu0 %v3223_v0 }
 0x355   :  { %2930 = vmatpush3.bf16.msra.mxu0 %v4015_v39 }
 0x356   :  { %2931 = vmatprep.subr.bf16.mxu0 %v3223_v0 }
 0x359   :  { %2932 = vmatpush3.bf16.msra.mxu0 %v4021_v40 }
 0x35a   :  { %2933 = vmatprep.subr.bf16.mxu0 %v3223_v0 }
 0x35b   :  { %v1603_v54 = vpop.f32.mrf.mxu1 }
 0x35c   :  { %v1604_v55 = vadd.f32 %v4104_v2, %v1603_v54 }
 0x35d   :  { %v2919_v56 = vpop.f32.mrf.mxu1  ;;  %2934 = vmatpush3.bf16.msra.mxu0 %v4034_v49 }
 0x35e   :  { %v1610_v4 = vadd.f32 %v1609_v3, %v1604_v55  ;;  %2935 = vmatprep.subr.bf16.mxu0 %v3223_v0 }
 0x35f   :  { %v1606_v5 = vpop.f32.mrf.mxu1 }
 0x360   :  { %v1611_v47 = vsub.f32 %v1610_v4, %v1509_v43 }
 0x361   :  { %v2920_v28 = vpop.f32.mrf.mxu1  ;;  %2936 = vmatpush3.bf16.msra.mxu0 %v4040_v51 }
 0x362   :  { %1665 = vst [vmem:[#allocation10 + $0x260] sm:$0xff] %v1611_v47  ;;  %vm1612_vm9 = vcmp.gt.f32.partialorder %v1611_v47, 1.0  ;;  %2961 = vmatprep.subr.bf16.mxu0 %v3223_v0  ;;  %v1713_v37 = vmul.f32 0.95, %v1611_v47 }
 0x363   :  { %vm2067_vm13 = vmpackc.low %vm1612_vm9, %vm1612_vm9  ;;  %v1613_v10 = vsel %vm1612_vm9, 1.0, %v3223_v0 }
 0x364   :  { %v1025_v1 = vpop.f32.mrf.mxu0  ;;  %2938 = vmatmul.mubr.msk.bf16.vlgmr.msra.gmra.mxu0 %vm2067_vm13, %v3225_v32  ;;  %1662 = vst [vmem:[#allocation10 + $0x248] sm:$0xff] %v1613_v10 }
 0x365   :  { %v1026_v13 = vadd.f32 %v3924_v63, %v1025_v1  ;;  %2962 = vmatpush3.bf16.msra.mxu0 %v3987_v29  ;;  %2977 = vmatprep.mubr.msk.bf16.mxu0 %vm3224_vm0, %v3223_v0 }
 0x366   :  { %v2699_v19 = vpop.f32.mrf.mxu0  ;;  %2963 = vmatprep.subr.bf16.mxu0 %v3223_v0 }
 0x367   :  { %v1032_v21 = vadd.f32 %v1031_v15, %v1026_v13 }
 0x368   :  { %v1028_v22 = vpop.f32.mrf.mxu0 }
 0x369   :  { %v1033_v58 = vsub.f32 %v1032_v21, %v931_v46  ;;  %2964 = vmatpush3.bf16.msra.mxu0 %v3996_v8 }
 0x36a   :  { %v2700_v61 = vpop.f32.mrf.mxu0  ;;  %2965 = vmatprep.subr.bf16.mxu0 %v3223_v0 }
 0x36b   :  { %1042 = vst [vmem:[#allocation10 + $0x148] sm:$0xff] %v1033_v58  ;;  %vm1034_vm3 = vcmp.gt.f32.partialorder %v1033_v58, 1.0  ;;  %v1135_v6 = vmul.f32 0.95, %v1033_v58 }
 0x36c   :  { %v1035_v7 = vsel %vm1034_vm3, 1.0, %v3223_v0 }
 0x36d   :  { %2966 = vmatpush3.bf16.msra.mxu0 %v4003_v38  ;;  %1039 = vst [vmem:[#allocation10 + $0x130] sm:$0xff] %v1035_v7 }
 0x36e   :  { %2967 = vmatprep.subr.bf16.mxu0 %v3223_v0 }
 0x371   :  { %2968 = vmatpush3.bf16.msra.mxu0 %v4009_v16 }
 0x372   :  { %2969 = vmatprep.subr.bf16.mxu0 %v3223_v0 }
 0x375   :  { %2970 = vmatpush3.bf16.msra.mxu0 %v4015_v39 }
 0x376   :  { %2971 = vmatprep.subr.bf16.mxu0 %v3223_v0 }
 0x379   :  { %2972 = vmatpush3.bf16.msra.mxu0 %v4021_v40 }
 0x37a   :  { %2973 = vmatprep.subr.bf16.mxu0 %v3223_v0 }
 0x37b   :  { %v1707_v11 = vpop.f32.mrf.mxu1 }
 0x37c   :  { %v1708_v18 = vadd.f32 %v4104_v2, %v1707_v11 }
 0x37d   :  { %v2959_v27 = vpop.f32.mrf.mxu1  ;;  %2974 = vmatpush3.bf16.msra.mxu0 %v4034_v49 }
 0x37e   :  { %v1714_v24 = vadd.f32 %v1713_v37, %v1708_v18  ;;  %2975 = vmatprep.subr.bf16.mxu0 %v3223_v0 }
 0x37f   :  { %v1710_v30 = vpop.f32.mrf.mxu1 }
 0x380   :  { %v1715_v31 = vsub.f32 %v1714_v24, %v1613_v10 }
 0x381   :  { %v2960_v9 = vpop.f32.mrf.mxu1  ;;  %2976 = vmatpush3.bf16.msra.mxu0 %v4040_v51 }
 0x382   :  { %1769 = vst [vmem:[#allocation10 + $0x290] sm:$0xff] %v1715_v31  ;;  %vm1716_vm10 = vcmp.gt.f32.partialorder %v1715_v31, 1.0  ;;  %3001 = vmatprep.subr.bf16.mxu0 %v3223_v0  ;;  %v1817_v26 = vmul.f32 0.95, %v1715_v31 }
 0x383   :  { %vm2071_vm5 = vmpackc.low %vm1716_vm10, %vm1716_vm10  ;;  %v1717_v34 = vsel %vm1716_vm10, 1.0, %v3223_v0 }
 0x384   :  { %v1129_v35 = vpop.f32.mrf.mxu0  ;;  %2978 = vmatmul.mubr.msk.bf16.vlgmr.msra.gmra.mxu0 %vm2071_vm5, %v3225_v32  ;;  %1766 = vst [vmem:[#allocation10 + $0x278] sm:$0xff] %v1717_v34 }
 0x385   :  { %v1130_v36 = vadd.f32 %v3924_v63, %v1129_v35  ;;  %3002 = vmatpush3.bf16.msra.mxu0 %v3987_v29  ;;  %3017 = vmatprep.mubr.msk.bf16.mxu0 %vm3224_vm0, %v3223_v0 }
 0x386   :  { %v2739_v12 = vpop.f32.mrf.mxu0  ;;  %3003 = vmatprep.subr.bf16.mxu0 %v3223_v0 }
 0x387   :  { %v1136_v14 = vadd.f32 %v1135_v6, %v1130_v36 }
 0x388   :  { %v1132_v44 = vpop.f32.mrf.mxu0 }
 0x389   :  { %v1137_v45 = vsub.f32 %v1136_v14, %v1035_v7  ;;  %3004 = vmatpush3.bf16.msra.mxu0 %v3996_v8 }
 0x38a   :  { %v2740_v20 = vpop.f32.mrf.mxu0  ;;  %3005 = vmatprep.subr.bf16.mxu0 %v3223_v0 }
 0x38b   :  { %1146 = vst [vmem:[#allocation10 + $0x178] sm:$0xff] %v1137_v45  ;;  %vm1138_vm15 = vcmp.gt.f32.partialorder %v1137_v45, 1.0  ;;  %v1239_v62 = vmul.f32 0.95, %v1137_v45 }
 0x38c   :  { %v1139_v23 = vsel %vm1138_vm15, 1.0, %v3223_v0 }
 0x38d   :  { %3006 = vmatpush3.bf16.msra.mxu0 %v4003_v38  ;;  %1143 = vst [vmem:[#allocation10 + $0x160] sm:$0xff] %v1139_v23 }
 0x38e   :  { %3007 = vmatprep.subr.bf16.mxu0 %v3223_v0 }
 0x391   :  { %3008 = vmatpush3.bf16.msra.mxu0 %v4009_v16 }
 0x392   :  { %3009 = vmatprep.subr.bf16.mxu0 %v3223_v0 }
 0x395   :  { %3010 = vmatpush3.bf16.msra.mxu0 %v4015_v39 }
 0x396   :  { %3011 = vmatprep.subr.bf16.mxu0 %v3223_v0 }
 0x399   :  { %3012 = vmatpush3.bf16.msra.mxu0 %v4021_v40 }
 0x39a   :  { %3013 = vmatprep.subr.bf16.mxu0 %v3223_v0 }
 0x39b   :  { %v1811_v41 = vpop.f32.mrf.mxu1 }
 0x39c   :  { %v1812_v25 = vadd.f32 %v4104_v2, %v1811_v41 }
 0x39d   :  { %v2999_v50 = vpop.f32.mrf.mxu1  ;;  %3014 = vmatpush3.bf16.msra.mxu0 %v4034_v49 }
 0x39e   :  { %v1818_v17 = vadd.f32 %v1817_v26, %v1812_v25  ;;  %3015 = vmatprep.subr.bf16.mxu0 %v3223_v0 }
 0x39f   :  { %v1814_v52 = vpop.f32.mrf.mxu1 }
 0x3a0   :  { %v1819_v43 = vsub.f32 %v1818_v17, %v1717_v34 }
 0x3a1   :  { %v3000_v53 = vpop.f32.mrf.mxu1  ;;  %3016 = vmatpush3.bf16.msra.mxu0 %v4040_v51 }
 0x3a2   :  { %1873 = vst [vmem:[#allocation10 + $0x2c0] sm:$0xff] %v1819_v43  ;;  %vm1820_vm4 = vcmp.gt.f32.partialorder %v1819_v43, 1.0  ;;  %3041 = vmatprep.subr.bf16.mxu0 %v3223_v0  ;;  %v1921_v3 = vmul.f32 0.95, %v1819_v43 }
 0x3a3   :  { %vm2075_vm6 = vmpackc.low %vm1820_vm4, %vm1820_vm4  ;;  %v1821_v57 = vsel %vm1820_vm4, 1.0, %v3223_v0 }
 0x3a4   :  { %v1233_v59 = vpop.f32.mrf.mxu0  ;;  %3018 = vmatmul.mubr.msk.bf16.vlgmr.msra.gmra.mxu0 %vm2075_vm6, %v3225_v32  ;;  %1870 = vst [vmem:[#allocation10 + $0x2a8] sm:$0xff] %v1821_v57 }
 0x3a5   :  { %v1234_v60 = vadd.f32 %v3924_v63, %v1233_v59  ;;  %3042 = vmatpush3.bf16.msra.mxu0 %v3987_v29  ;;  %3057 = vmatprep.mubr.msk.bf16.mxu0 %vm3224_vm0, %v3223_v0 }
 0x3a6   :  { %v2779_v48 = vpop.f32.mrf.mxu0  ;;  %3043 = vmatprep.subr.bf16.mxu0 %v3223_v0 }
 0x3a7   :  { %v1240_v33 = vadd.f32 %v1239_v62, %v1234_v60 }
 0x3a8   :  { %v1236_v42 = vpop.f32.mrf.mxu0 }
 0x3a9   :  { %v1241_v46 = vsub.f32 %v1240_v33, %v1139_v23  ;;  %3044 = vmatpush3.bf16.msra.mxu0 %v3996_v8 }
 0x3aa   :  { %v2780_v54 = vpop.f32.mrf.mxu0  ;;  %3045 = vmatprep.subr.bf16.mxu0 %v3223_v0 }
 0x3ab   :  { %1250 = vst [vmem:[#allocation10 + $0x1a8] sm:$0xff] %v1241_v46  ;;  %vm1242_vm11 = vcmp.gt.f32.partialorder %v1241_v46, 1.0 }
 0x3ac   :  { %v1243_v55 = vsel %vm1242_vm11, 1.0, %v3223_v0 }
 0x3ad   :  { %3046 = vmatpush3.bf16.msra.mxu0 %v4003_v38  ;;  %1247 = vst [vmem:[#allocation10 + $0x190] sm:$0xff] %v1243_v55 }
 0x3ae   :  { %3047 = vmatprep.subr.bf16.mxu0 %v3223_v0 }
 0x3b1   :  { %3048 = vmatpush3.bf16.msra.mxu0 %v4009_v16 }
 0x3b2   :  { %3049 = vmatprep.subr.bf16.mxu0 %v3223_v0 }
 0x3b5   :  { %3050 = vmatpush3.bf16.msra.mxu0 %v4015_v39 }
 0x3b6   :  { %3051 = vmatprep.subr.bf16.mxu0 %v3223_v0 }
 0x3b9   :  { %3052 = vmatpush3.bf16.msra.mxu0 %v4021_v40 }
 0x3ba   :  { %3053 = vmatprep.subr.bf16.mxu0 %v3223_v0 }
 0x3bb   :  { %v1915_v29 = vpop.f32.mrf.mxu1 }
 0x3bc   :  { %v1916_v8 = vadd.f32 %v4104_v2, %v1915_v29 }
 0x3bd   :  { %v3039_v38 = vpop.f32.mrf.mxu1  ;;  %3054 = vmatpush3.bf16.msra.mxu0 %v4034_v49  ;;  %v1343_v49 = vmul.f32 0.95, %v1241_v46 }
 0x3be   :  { %v1922_v56 = vadd.f32 %v1921_v3, %v1916_v8  ;;  %3055 = vmatprep.subr.bf16.mxu0 %v3223_v0  ;;  %v3106_v3 = vld [vmem:[%s4255_s6] ss:$0 sm:$0xff] }
 0x3bf   :  { %v1918_v16 = vpop.f32.mrf.mxu1 }
 0x3c0   :  { %v1923_v4 = vsub.f32 %v1922_v56, %v1821_v57 }
 0x3c1   :  { %v3040_v5 = vpop.f32.mrf.mxu1  ;;  %3056 = vmatpush3.bf16.msra.mxu0 %v4040_v51 }
 0x3c2   :  { %vm1924_vm0 = vcmp.gt.f32.partialorder %v1923_v4, 1.0  ;;  %1977 = vst [vmem:[#allocation10 + $0x2f0] sm:$0xff] %v1923_v4 }
 0x3c3   :  { %v1925_v39 = vsel %vm1924_vm0, 1.0, %v3223_v0  ;;  %vm2079_vm1 = vmpackc.low %vm1924_vm0, %vm1924_vm0 }
 0x3c4   :  { %1974 = vst [vmem:[#allocation10 + $0x2d8] sm:$0xff] %v1925_v39  ;;  %v1337_v40 = vpop.f32.mrf.mxu0  ;;  %3058 = vmatmul.mubr.msk.bf16.vlgmr.msra.gmra.mxu0 %vm2079_vm1, %v3225_v32 }
 0x3c5   :  { %v1338_v2 = vadd.f32 %v3924_v63, %v1337_v40 }
 0x3c6   :  { %v2819_v47 = vpop.f32.mrf.mxu0 }
 0x3c7   :  { %v1344_v28 = vadd.f32 %v1343_v49, %v1338_v2 }
 0x3c8   :  { %v1340_v10 = vpop.f32.mrf.mxu0 }
 0x3c9   :  { %v1345_v1 = vsub.f32 %v1344_v28, %v1243_v55 }
 0x3ca   :  { %v2820_v13 = vpop.f32.mrf.mxu0 }
 0x3cb   :  { %1354 = vst [vmem:[#allocation10 + $0x1d8] sm:$0xff] %v1345_v1  ;;  %vm1346_vm7 = vcmp.gt.f32.partialorder %v1345_v1, 1.0  ;;  %v1447_v21 = vmul.f32 0.95, %v1345_v1 }
 0x3cc   :  { %v1347_v51 = vsel %vm1346_vm7, 1.0, %v3223_v0 }
 0x3cd   :  { %1351 = vst [vmem:[#allocation10 + $0x1c0] sm:$0xff] %v1347_v51 }
 0x3e4   :  { %v1441_v15 = vpop.f32.mrf.mxu0 }
 0x3e5   :  { %v1442_v19 = vadd.f32 %v3924_v63, %v1441_v15 }
 0x3e6   :  { %v2859_v22 = vpop.f32.mrf.mxu0 }
 0x3e7   :  { %v1448_v58 = vadd.f32 %v1447_v21, %v1442_v19 }
 0x3e8   :  { %v1444_v32 = vpop.f32.mrf.mxu0 }
 0x3e9   :  { %v1449_v61 = vsub.f32 %v1448_v58, %v1347_v51 }
 0x3ea   :  { %v2860_v7 = vpop.f32.mrf.mxu0 }
 0x3eb   :  { %1458 = vst [vmem:[#allocation10 + $0x208] sm:$0xff] %v1449_v61  ;;  %vm1450_vm14 = vcmp.gt.f32.partialorder %v1449_v61, 1.0  ;;  %v1551_v27 = vmul.f32 0.95, %v1449_v61 }
 0x3ec   :  { %v1451_v11 = vsel %vm1450_vm14, 1.0, %v3223_v0 }
 0x3ed   :  { %1455 = vst [vmem:[#allocation10 + $0x1f0] sm:$0xff] %v1451_v11 }
 0x404   :  { %v1545_v18 = vpop.f32.mrf.mxu0 }
 0x405   :  { %v1546_v37 = vadd.f32 %v3924_v63, %v1545_v18 }
 0x406   :  { %v2899_v24 = vpop.f32.mrf.mxu0 }
 0x407   :  { %v1552_v30 = vadd.f32 %v1551_v27, %v1546_v37 }
 0x408   :  { %v1548_v31 = vpop.f32.mrf.mxu0 }
 0x409   :  { %v1553_v9 = vsub.f32 %v1552_v30, %v1451_v11 }
 0x40a   :  { %v2900_v34 = vpop.f32.mrf.mxu0 }
 0x40b   :  { %1562 = vst [vmem:[#allocation10 + $0x238] sm:$0xff] %v1553_v9  ;;  %vm1554_vm12 = vcmp.gt.f32.partialorder %v1553_v9, 1.0  ;;  %v1655_v12 = vmul.f32 0.95, %v1553_v9 }
 0x40c   :  { %v1555_v35 = vsel %vm1554_vm12, 1.0, %v3223_v0 }
 0x40d   :  { %1559 = vst [vmem:[#allocation10 + $0x220] sm:$0xff] %v1555_v35 }
 0x424   :  { %v1649_v36 = vpop.f32.mrf.mxu0 }
 0x425   :  { %v1650_v6 = vadd.f32 %v3924_v63, %v1649_v36 }
 0x426   :  { %v2939_v14 = vpop.f32.mrf.mxu0 }
 0x427   :  { %v1656_v44 = vadd.f32 %v1655_v12, %v1650_v6 }
 0x428   :  { %v1652_v45 = vpop.f32.mrf.mxu0 }
 0x429   :  { %v1657_v20 = vsub.f32 %v1656_v44, %v1555_v35 }
 0x42a   :  { %v2940_v23 = vpop.f32.mrf.mxu0 }
 0x42b   :  { %1666 = vst [vmem:[#allocation10 + $0x268] sm:$0xff] %v1657_v20  ;;  %vm1658_vm2 = vcmp.gt.f32.partialorder %v1657_v20, 1.0  ;;  %v1759_v50 = vmul.f32 0.95, %v1657_v20 }
 0x42c   :  { %v1659_v41 = vsel %vm1658_vm2, 1.0, %v3223_v0 }
 0x42d   :  { %1663 = vst [vmem:[#allocation10 + $0x250] sm:$0xff] %v1659_v41 }
 0x444   :  { %v1753_v25 = vpop.f32.mrf.mxu0 }
 0x445   :  { %v1754_v26 = vadd.f32 %v3924_v63, %v1753_v25 }
 0x446   :  { %v2979_v17 = vpop.f32.mrf.mxu0 }
 0x447   :  { %v1760_v52 = vadd.f32 %v1759_v50, %v1754_v26 }
 0x448   :  { %v1756_v43 = vpop.f32.mrf.mxu0 }
 0x449   :  { %v1761_v53 = vsub.f32 %v1760_v52, %v1659_v41 }
 0x44a   :  { %v2980_v57 = vpop.f32.mrf.mxu0 }
 0x44b   :  { %1770 = vst [vmem:[#allocation10 + $0x298] sm:$0xff] %v1761_v53  ;;  %vm1762_vm8 = vcmp.gt.f32.partialorder %v1761_v53, 1.0  ;;  %v1863_v48 = vmul.f32 0.95, %v1761_v53 }
 0x44c   :  { %v1763_v59 = vsel %vm1762_vm8, 1.0, %v3223_v0 }
 0x44d   :  { %1767 = vst [vmem:[#allocation10 + $0x280] sm:$0xff] %v1763_v59 }
 0x464   :  { %v1857_v60 = vpop.f32.mrf.mxu0 }
 0x465   :  { %v1858_v62 = vadd.f32 %v3924_v63, %v1857_v60 }
 0x466   :  { %v3019_v33 = vpop.f32.mrf.mxu0 }
 0x467   :  { %v1864_v42 = vadd.f32 %v1863_v48, %v1858_v62 }
 0x468   :  { %v1860_v46 = vpop.f32.mrf.mxu0 }
 0x469   :  { %v1865_v54 = vsub.f32 %v1864_v42, %v1763_v59 }
 0x46a   :  { %v3020_v55 = vpop.f32.mrf.mxu0 }
 0x46b   :  { %1874 = vst [vmem:[#allocation10 + $0x2c8] sm:$0xff] %v1865_v54  ;;  %vm1866_vm9 = vcmp.gt.f32.partialorder %v1865_v54, 1.0  ;;  %v1967_v56 = vmul.f32 0.95, %v1865_v54 }
 0x46c   :  { %v1867_v29 = vsel %vm1866_vm9, 1.0, %v3223_v0 }
 0x46d   :  { %1871 = vst [vmem:[#allocation10 + $0x2b0] sm:$0xff] %v1867_v29 }
 0x484   :  { %v1961_v8 = vpop.f32.mrf.mxu0 }
 0x485   :  { %v1962_v38 = vadd.f32 %v3106_v3, %v1961_v8 }
 0x486   :  { %v3059_v16 = vpop.f32.mrf.mxu0 }
 0x487   :  { %v1968_v63 = vadd.f32 %v1967_v56, %v1962_v38 }
 0x488   :  { %v1964_v4 = vpop.f32.mrf.mxu0 }
 0x489   :  { %v1969_v5 = vsub.f32 %v1968_v63, %v1867_v29 }
 0x48a   :  { %v3060_v39 = vpop.f32.mrf.mxu0 }
 0x48b   :  { %vm1970_vm13 = vcmp.gt.f32.partialorder %v1969_v5, 1.0  ;;  %1978 = vst [vmem:[#allocation10 + $0x2f8] sm:$0xff] %v1969_v5 }
 0x48c   :  { %v1971_v40 = vsel %vm1970_vm13, 1.0, %v3223_v0 }
 0x48d   :  { %1975 = vst [vmem:[#allocation10 + $0x2e0] sm:$0xff] %v1971_v40 }
 0x48e   :  { %3198 = shalt.err (!%p3195_p10)
}
 0x48f   :  { %1990 = dma.vmem_to_hbm [thread:$0]  %s1985_s9, 12288, %s4256_s7, [#allocation4], %s3216_s27, %s3216_s27, %s3217_s28  }
 0x490   :  { %3213 = dma.done.wait [#allocation4], 12288  }
 0x491   :  { %3214 = vsyncadd [#allocation4], 4294955008 }
 0x492   :  { %1994 = vsyncpa [#allocation3], 1 }
 0x493   :  { %1995 = vsyncpa [#allocation6], 1 }
 0x494   :  { %1996 = vsyncpa [#allocation9], 1 }
 0x495   :  { %1997 = vsyncpa [#allocation4], 1 }

</bundles_post_ra>
